<compile_context>
chip_gen: v5e
topology: v5e:2x2
jax: 0.10.0
libtpu: 0.0.40
codegen_flags: <defaults>
</compile_context>

<pallas_src>
import jax
import jax.numpy as jnp
from jax.experimental import pallas as pl
from jax.experimental.pallas import tpu as pltpu

TILE_B = 256  # multiple of 256 -> full MXU passes on v6e/v7x; multiple of 128 for v5e.


def mlp_kernel(x_ref, w1_ref, b1_ref, w2_ref, b2_ref, w3_ref, b3_ref,
               w4_ref, b4_ref, o_ref):
    # fc1 + relu   (x tile is bf16, weights bf16, accumulate f32 on the MXU)
    h = jnp.dot(x_ref[...], w1_ref[...], preferred_element_type=jnp.float32)
    h = jnp.maximum(h + b1_ref[...], 0.0)
    # fc2 + relu
    h = jnp.dot(h.astype(jnp.bfloat16), w2_ref[...],
                preferred_element_type=jnp.float32)
    h = jnp.maximum(h + b2_ref[...], 0.0)
    # fc3 + relu
    h = jnp.dot(h.astype(jnp.bfloat16), w3_ref[...],
                preferred_element_type=jnp.float32)
    h = jnp.maximum(h + b3_ref[...], 0.0)
    # fc4 (N=1): VPU multiply + XLU lane-reduce instead of an MXU pass with 1 column.
    y = jnp.sum(h * w4_ref[...], axis=-1, keepdims=True) + b4_ref[...]
    # sigmoid: exp on EUP, approx reciprocal also on EUP (free slot).
    o_ref[...] = pl.reciprocal(1.0 + jnp.exp(-y), approx=True)


def salary_predictor_forward(x, params, *, tile_b=TILE_B):
    """x: (B, 8) float32 -> (B, 1) float32."""
    B = x.shape[0]
    b_pad = pl.cdiv(B, tile_b) * tile_b
    if b_pad != B:
        x = jnp.pad(x, ((0, b_pad - B), (0, 0)))
    x_bf16 = x.astype(jnp.bfloat16)
    num_tiles = b_pad // tile_b

    args = (x_bf16,
            params["w1"], params["b1"],
            params["w2"], params["b2"],
            params["w3"], params["b3"],
            params["w4"], params["b4"])

    def resident(arr):
        # Full-array block, constant index_map -> stays in VMEM across grid steps.
        return pl.BlockSpec(arr.shape, lambda i: (0, 0))

    in_specs = [pl.BlockSpec((tile_b, 8), lambda i: (i, 0))] + \
               [resident(a) for a in args[1:]]
    out_specs = pl.BlockSpec((tile_b, 1), lambda i: (i, 0))

    flops = 2 * b_pad * (8 * 512 + 512 * 512 + 512 * 256 + 256 * 1)
    bytes_accessed = sum(a.size * a.dtype.itemsize for a in args) + b_pad * 1 * 4
    cost = pl.CostEstimate(flops=flops,
                           transcendentals=2 * b_pad,
                           bytes_accessed=bytes_accessed)

    out = pl.pallas_call(
        mlp_kernel,
        out_shape=jax.ShapeDtypeStruct((b_pad, 1), jnp.float32),
        grid=(num_tiles,),
        in_specs=in_specs,
        out_specs=out_specs,
        compiler_params=pltpu.CompilerParams(
            dimension_semantics=("parallel",)),
        cost_estimate=cost,
    )(*args)
    return out[:B]


def init_params(key):
    """Init mirroring torch.nn.Linear default U(-1/sqrt(in), 1/sqrt(in)).

    Matmul weights are stored transposed vs torch ((in, out)) and cast to bf16;
    biases stay f32. The last layer's weight is kept as an f32 (1, 256) row for
    the VPU-reduce formulation of fc4.
    """
    dims = [(8, 512), (512, 512), (512, 256), (256, 1)]
    params = {}
    for i, (fin, fout) in enumerate(dims, start=1):
        key, kw, kb = jax.random.split(key, 3)
        bound = 1.0 / jnp.sqrt(jnp.float32(fin))
        w = jax.random.uniform(kw, (fin, fout), jnp.float32,
                               minval=-bound, maxval=bound)
        b = jax.random.uniform(kb, (1, fout), jnp.float32,
                               minval=-bound, maxval=bound)
        if i < 4:
            params[f"w{i}"] = w.astype(jnp.bfloat16)
            params[f"b{i}"] = b
        else:
            params["w4"] = w.reshape(1, fin)      # (1, 256) f32 row
            params["b4"] = b.reshape(1, 1)        # (1, 1) f32
    return params


def reference_forward(x, params):
    """Pure-JAX reference mirroring the kernel's numerics (bf16 weights, f32 accum)."""
    x = x.astype(jnp.bfloat16)
    h = jnp.maximum(jnp.dot(x, params["w1"],
                            preferred_element_type=jnp.float32) + params["b1"], 0.0)
    h = jnp.maximum(jnp.dot(h.astype(jnp.bfloat16), params["w2"],
                            preferred_element_type=jnp.float32) + params["b2"], 0.0)
    h = jnp.maximum(jnp.dot(h.astype(jnp.bfloat16), params["w3"],
                            preferred_element_type=jnp.float32) + params["b3"], 0.0)
    y = jnp.sum(h * params["w4"], axis=-1, keepdims=True) + params["b4"]
    return jax.nn.sigmoid(y)


if __name__ == "__main__":
    key = jax.random.PRNGKey(0)
    kp, kx = jax.random.split(key)
    params = init_params(kp)

    B = 260  # small, deliberately not a multiple of TILE_B to exercise padding + 2 grid tiles
    x = jax.random.normal(kx, (B, 8), jnp.float32)

    out = salary_predictor_forward(x, params)
    out = jax.block_until_ready(out)

    ref = reference_forward(x, params)
    assert out.shape == (B, 1)
    # Only expected divergence from the reference is the approx EUP reciprocal (~2e-4 abs).
    assert jnp.allclose(out, ref, atol=2e-3, rtol=0.0), float(jnp.max(jnp.abs(out - ref)))
    print("KERNEL_OK")
</pallas_src>

<mosaic_0001>
module attributes {stable_mosaic.version = 11 : i64} {
  func.func @mlp_kernel(%arg0: i32, %arg1: memref<256x8xbf16, #tpu.memory_space<vmem>>, %arg2: memref<8x512xbf16, #tpu.memory_space<vmem>>, %arg3: memref<1x512xf32, #tpu.memory_space<vmem>>, %arg4: memref<512x512xbf16, #tpu.memory_space<vmem>>, %arg5: memref<1x512xf32, #tpu.memory_space<vmem>>, %arg6: memref<512x256xbf16, #tpu.memory_space<vmem>>, %arg7: memref<1x256xf32, #tpu.memory_space<vmem>>, %arg8: memref<1x256xf32, #tpu.memory_space<vmem>>, %arg9: memref<1x1xf32, #tpu.memory_space<vmem>>, %arg10: memref<256x1xf32, #tpu.memory_space<vmem>>) attributes {dimension_semantics = [#tpu.dimension_semantics<parallel>], iteration_bounds = array<i64: 2>, scalar_prefetch = 0 : i64, scratch_operands = 0 : i64, tpu.core_type = #tpu.core_type<tc>, window_params = [{transform_indices = @transform_0, window_bounds = array<i64: 256, 8>}, {pipeline_mode = #tpu.pipeline_mode<synchronous>, transform_indices = @transform_1, window_bounds = array<i64: 8, 512>}, {pipeline_mode = #tpu.pipeline_mode<synchronous>, transform_indices = @transform_2, window_bounds = array<i64: 1, 512>}, {pipeline_mode = #tpu.pipeline_mode<synchronous>, transform_indices = @transform_3, window_bounds = array<i64: 512, 512>}, {pipeline_mode = #tpu.pipeline_mode<synchronous>, transform_indices = @transform_4, window_bounds = array<i64: 1, 512>}, {pipeline_mode = #tpu.pipeline_mode<synchronous>, transform_indices = @transform_5, window_bounds = array<i64: 512, 256>}, {pipeline_mode = #tpu.pipeline_mode<synchronous>, transform_indices = @transform_6, window_bounds = array<i64: 1, 256>}, {pipeline_mode = #tpu.pipeline_mode<synchronous>, transform_indices = @transform_7, window_bounds = array<i64: 1, 256>}, {pipeline_mode = #tpu.pipeline_mode<synchronous>, transform_indices = @transform_8, window_bounds = array<i64: 1, 1>}, {transform_indices = @transform_9, window_bounds = array<i64: 256, 1>}]} {
    %c0 = arith.constant 0 : index
    %c0_0 = arith.constant 0 : index
    %0 = vector.load %arg1[%c0, %c0_0] : memref<256x8xbf16, #tpu.memory_space<vmem>>, vector<256x8xbf16>
    %c0_1 = arith.constant 0 : index
    %c0_2 = arith.constant 0 : index
    %1 = vector.load %arg2[%c0_1, %c0_2] : memref<8x512xbf16, #tpu.memory_space<vmem>>, vector<8x512xbf16>
    %cst = arith.constant dense<0.000000e+00> : vector<256x512xf32>
    %2 = tpu.matmul %0, %1, %cst {dimension_numbers = #tpu.dot_dimension_numbers<[1], [0], [0], [1], [0, 0, 1, 1], [], []>} : vector<256x8xbf16>, vector<8x512xbf16>, vector<256x512xf32> -> vector<256x512xf32>
    %c0_3 = arith.constant 0 : index
    %c0_4 = arith.constant 0 : index
    %3 = vector.load %arg3[%c0_3, %c0_4] : memref<1x512xf32, #tpu.memory_space<vmem>>, vector<1x512xf32>
    %4 = vector.broadcast %3 : vector<1x512xf32> to vector<256x512xf32>
    %5 = arith.addf %2, %4 : vector<256x512xf32>
    %cst_5 = arith.constant 0.000000e+00 : f32
    %6 = vector.broadcast %cst_5 : f32 to vector<256x512xf32>
    %7 = arith.maximumf %5, %6 : vector<256x512xf32>
    %8 = arith.truncf %7 : vector<256x512xf32> to vector<256x512xbf16>
    %c0_6 = arith.constant 0 : index
    %c0_7 = arith.constant 0 : index
    %9 = vector.load %arg4[%c0_6, %c0_7] : memref<512x512xbf16, #tpu.memory_space<vmem>>, vector<512x512xbf16>
    %cst_8 = arith.constant dense<0.000000e+00> : vector<256x512xf32>
    %10 = tpu.matmul %8, %9, %cst_8 {dimension_numbers = #tpu.dot_dimension_numbers<[1], [0], [0], [1], [0, 0, 1, 1], [], []>} : vector<256x512xbf16>, vector<512x512xbf16>, vector<256x512xf32> -> vector<256x512xf32>
    %c0_9 = arith.constant 0 : index
    %c0_10 = arith.constant 0 : index
    %11 = vector.load %arg5[%c0_9, %c0_10] : memref<1x512xf32, #tpu.memory_space<vmem>>, vector<1x512xf32>
    %12 = vector.broadcast %11 : vector<1x512xf32> to vector<256x512xf32>
    %13 = arith.addf %10, %12 : vector<256x512xf32>
    %cst_11 = arith.constant 0.000000e+00 : f32
    %14 = vector.broadcast %cst_11 : f32 to vector<256x512xf32>
    %15 = arith.maximumf %13, %14 : vector<256x512xf32>
    %16 = arith.truncf %15 : vector<256x512xf32> to vector<256x512xbf16>
    %c0_12 = arith.constant 0 : index
    %c0_13 = arith.constant 0 : index
    %17 = vector.load %arg6[%c0_12, %c0_13] : memref<512x256xbf16, #tpu.memory_space<vmem>>, vector<512x256xbf16>
    %cst_14 = arith.constant dense<0.000000e+00> : vector<256x256xf32>
    %18 = tpu.matmul %16, %17, %cst_14 {dimension_numbers = #tpu.dot_dimension_numbers<[1], [0], [0], [1], [0, 0, 1, 1], [], []>} : vector<256x512xbf16>, vector<512x256xbf16>, vector<256x256xf32> -> vector<256x256xf32>
    %c0_15 = arith.constant 0 : index
    %c0_16 = arith.constant 0 : index
    %19 = vector.load %arg7[%c0_15, %c0_16] : memref<1x256xf32, #tpu.memory_space<vmem>>, vector<1x256xf32>
    %20 = vector.broadcast %19 : vector<1x256xf32> to vector<256x256xf32>
    %21 = arith.addf %18, %20 : vector<256x256xf32>
    %cst_17 = arith.constant 0.000000e+00 : f32
    %22 = vector.broadcast %cst_17 : f32 to vector<256x256xf32>
    %23 = arith.maximumf %21, %22 : vector<256x256xf32>
    %c0_18 = arith.constant 0 : index
    %c0_19 = arith.constant 0 : index
    %24 = vector.load %arg8[%c0_18, %c0_19] : memref<1x256xf32, #tpu.memory_space<vmem>>, vector<1x256xf32>
    %25 = vector.broadcast %24 : vector<1x256xf32> to vector<256x256xf32>
    %26 = arith.mulf %23, %25 : vector<256x256xf32>
    %cst_20 = arith.constant dense<0.000000e+00> : vector<256xf32>
    %27 = vector.multi_reduction <add>, %26, %cst_20 [1] : vector<256x256xf32> to vector<256xf32>
    %28 = vector.shape_cast %27 : vector<256xf32> to vector<256x1xf32>
    %c0_21 = arith.constant 0 : index
    %c0_22 = arith.constant 0 : index
    %29 = vector.load %arg9[%c0_21, %c0_22] : memref<1x1xf32, #tpu.memory_space<vmem>>, vector<1x1xf32>
    %30 = vector.broadcast %29 : vector<1x1xf32> to vector<256x1xf32>
    %31 = arith.addf %28, %30 : vector<256x1xf32>
    %cst_23 = arith.constant 0.000000e+00 : f32
    %32 = vector.broadcast %cst_23 : f32 to vector<256x1xf32>
    %33 = arith.subf %32, %31 : vector<256x1xf32>
    %34 = math.exp %33 : vector<256x1xf32>
    %cst_24 = arith.constant 1.000000e+00 : f32
    %35 = vector.broadcast %cst_24 : f32 to vector<256x1xf32>
    %36 = arith.addf %35, %34 : vector<256x1xf32>
    %37 = tpu.reciprocal %36 {approx = true} : vector<256x1xf32> -> vector<256x1xf32>
    %c0_25 = arith.constant 0 : index
    %c0_26 = arith.constant 0 : index
    %38 = vector.load %arg10[%c0_25, %c0_26] : memref<256x1xf32, #tpu.memory_space<vmem>>, vector<256x1xf32>
    tpu.vector_store %arg10[%c0_25, %c0_26], %37 {strides = array<i32>} : memref<256x1xf32, #tpu.memory_space<vmem>>, vector<256x1xf32>,
    return
  }
  func.func @transform_0(%arg0: i32) -> (i32, i32) {
    %c0_i32 = arith.constant 0 : i32
    %c0_i32_0 = arith.constant 0 : i32
    return %arg0, %c0_i32 : i32, i32
  }
  func.func @transform_1(%arg0: i32) -> (i32, i32) {
    %c0_i32 = arith.constant 0 : i32
    %c0_i32_0 = arith.constant 0 : i32
    %c0_i32_1 = arith.constant 0 : i32
    return %c0_i32, %c0_i32_0 : i32, i32
  }
  func.func @transform_2(%arg0: i32) -> (i32, i32) {
    %c0_i32 = arith.constant 0 : i32
    %c0_i32_0 = arith.constant 0 : i32
    %c0_i32_1 = arith.constant 0 : i32
    return %c0_i32, %c0_i32_0 : i32, i32
  }
  func.func @transform_3(%arg0: i32) -> (i32, i32) {
    %c0_i32 = arith.constant 0 : i32
    %c0_i32_0 = arith.constant 0 : i32
    %c0_i32_1 = arith.constant 0 : i32
    return %c0_i32, %c0_i32_0 : i32, i32
  }
  func.func @transform_4(%arg0: i32) -> (i32, i32) {
    %c0_i32 = arith.constant 0 : i32
    %c0_i32_0 = arith.constant 0 : i32
    %c0_i32_1 = arith.constant 0 : i32
    return %c0_i32, %c0_i32_0 : i32, i32
  }
  func.func @transform_5(%arg0: i32) -> (i32, i32) {
    %c0_i32 = arith.constant 0 : i32
    %c0_i32_0 = arith.constant 0 : i32
    %c0_i32_1 = arith.constant 0 : i32
    return %c0_i32, %c0_i32_0 : i32, i32
  }
  func.func @transform_6(%arg0: i32) -> (i32, i32) {
    %c0_i32 = arith.constant 0 : i32
    %c0_i32_0 = arith.constant 0 : i32
    %c0_i32_1 = arith.constant 0 : i32
    return %c0_i32, %c0_i32_0 : i32, i32
  }
  func.func @transform_7(%arg0: i32) -> (i32, i32) {
    %c0_i32 = arith.constant 0 : i32
    %c0_i32_0 = arith.constant 0 : i32
    %c0_i32_1 = arith.constant 0 : i32
    return %c0_i32, %c0_i32_0 : i32, i32
  }
  func.func @transform_8(%arg0: i32) -> (i32, i32) {
    %c0_i32 = arith.constant 0 : i32
    %c0_i32_0 = arith.constant 0 : i32
    %c0_i32_1 = arith.constant 0 : i32
    return %c0_i32, %c0_i32_0 : i32, i32
  }
  func.func @transform_9(%arg0: i32) -> (i32, i32) {
    %c0_i32 = arith.constant 0 : i32
    %c0_i32_0 = arith.constant 0 : i32
    return %arg0, %c0_i32 : i32, i32
  }
}

</mosaic_0001>

<bundles_post_ra>
// kernel: tpu_custom_call.1
= control target key start
LH: loop header
LB: loop body
LE: loop exit
PB: predicated region body
PF: predicated region fallthrough
CT: control target
= control target key end

     0   :  { %s7977_s0 = inlined_call_operand.vmem [shape: bf16[512,8], index: 0, kind: input, shape index: {}]   ;;  %s7978_s1 = inlined_call_operand.vmem [shape: bf16[8,512], index: 1, kind: input, shape index: {}]   ;;  %s7979_s2 = inlined_call_operand.vmem [shape: f32[1,512], index: 2, kind: input, shape index: {}]   ;;  %s7980_s3 = inlined_call_operand.hbm [shape: bf16[512,512], index: 3, kind: input, shape index: {}]   ;;  %s7981_s4 = inlined_call_operand.vmem [shape: f32[1,512], index: 4, kind: input, shape index: {}]   ;;  %s7982_s5 = inlined_call_operand.hbm [shape: bf16[512,256], index: 5, kind: input, shape index: {}]   ;;  %s7983_s6 = inlined_call_operand.vmem [shape: f32[1,256], index: 6, kind: input, shape index: {}]   ;;  %s7984_s7 = inlined_call_operand.vmem [shape: f32[1,256], index: 7, kind: input, shape index: {}]   ;;  %s7985_s8 = inlined_call_operand.<no memory space> [shape: f32[1,1], index: 8, kind: input, shape index: {}]   ;;  %s7986_s9 = inlined_call_operand.vmem [shape: f32[512,1], index: 9, kind: output, shape index: {}]  }
   0x1   :  { %v14_v0 = vstv %s7985_s8 }
   0x2   :  { %15 = vst [vmem:[#allocation2] sm:$0x1] %v14_v0 }
   0x3   :  { %16 = vsyncpa [#allocation4], 0 }
   0x4   :  { %17 = vsyncpa [#allocation6], 0  ;;  %s6568_s11 = smov 0  }
   0x5 LB: > { %s265_s14 = sshll.u32 %s7980_s3, 4  ;;  %s5150_s15 = sadd.s32 4294967295, %s6507_s11   ;;  %s6507_s11 = sphi %s6568_s11, %s23_s11   ;;  %s266_s14 = int_to_ptr.hbm [resolvable:$true] %s265_s14 }
   0x6   : > { %p5152_p0 = scmp.ge.s32.totalorder %s6507_s11, 1  ;;  %p248_p1 = scmp.lt.s32.totalorder %s6507_s11, 3 }
   0x7   : > { %p6579_p2 = scmp.eq.s32.totalorder %s5150_s15, 0  ;;  %s6509_s17 = smov [#allocation3]  }
   0x8   : > { %p6583_p3 = pnand %p5152_p0, %p248_p1  ;;  %s267_s18 = sshll.u32 %s6509_s17, 4  ;;  %s268_s18 = int_to_ptr.vmem [resolvable:$true] %s267_s18 }
   0x9   : > { %s282_s21 = sshll.u32 %s7982_s5, 4  ;;  %s6510_s22 = smov [#allocation5]   ;;  %s283_s21 = int_to_ptr.hbm [resolvable:$true] %s282_s21 }
   0xa   : > { %p6277_p4 = pneg %p6583_p3  ;;  %s284_s23 = sshll.u32 %s6510_s22, 4  ;;  %s285_s23 = int_to_ptr.vmem [resolvable:$true] %s284_s23 }
   0xb   : > { %s6511_s24 = smov 256   ;;  %s6512_s25 = smov 16  }
   0xc   : > { %p6278_p5 = pnand %p6579_p2, %p6277_p4  ;;  %s6513_s26 = smov 128  }
   0xd   : > { %s6514_s27 = smov 8   ;;  %318 = sbr.rel (%p6583_p3) target bundleno = 2096 (0x830), region = 56 }
   0xe   : > { %6280 = dma.hbm_to_vmem [thread:$0]  (!%p6278_p5), %s266_s14, 16384, %s268_s18, [#allocation4], %s6511_s24, %s6511_s24, %s6512_s25  }
   0xf   : > { %6283 = dma.hbm_to_vmem [thread:$0]  (!%p6278_p5), %s283_s21, 8192, %s285_s23, [#allocation6], %s6513_s26, %s6513_s26, %s6514_s27  }
  0x12   : > { %6498 = dma.done.wait (%p6579_p2), [#allocation4], 16384  }
  0x13   : > { %6500 = vsyncadd (%p6579_p2), [#allocation4], 4294950912 }
  0x14   : > { %6502 = dma.done.wait (%p6579_p2), [#allocation6], 8192  }
  0x15   : > { %6504 = vsyncadd (%p6579_p2), [#allocation6], 4294959104  ;;  %s5159_s28 = sshll.u32 %s5150_s15, 5  ;;  %v405_v1 = vld [vmem:[%s7978_s1] sm:$0xff]  ;;  %v406_v2 = vld [vmem:[%s7978_s1 + $0x8] sm:$0xff]  ;;  %vm556_vm0 = vcmask 1043456  }
  0x16   : > { %p361_p6 = scmp.lt.s32.totalorder %s5159_s28, 63  ;;  %v499_v3 = vunpack.c.l.b16 %v405_v1  ;;  %v500_v4 = vunpack.c.h.b16 %v405_v1  ;;  %v501_v5 = vunpack.c.l.b16 %v406_v2  ;;  %v502_v6 = vunpack.c.h.b16 %v406_v2  ;;  %v5661_v7 = vld [vmem:[#allocation3 + $0x2e0] sm:$0xf]  ;;  %v6171_v8 = vld [vmem:[#allocation3 + $0x2ec] sm:$0xf0] }
  0x17   : > { %v5405_v9 = vld [vmem:[#allocation3 + $0xe0] sm:$0xf]  ;;  %v6107_v10 = vld [vmem:[#allocation3 + $0xec] sm:$0xf0]  ;;  %v5662_v17 = vor.u32 %v6171_v8, %v5661_v7  ;;  %vm507_vm1 = vcmask 64512   ;;  %vm5039_vm2 = vcmask 7168  }
  0x18   : > { %s8321_s28 = smov (!%p361_p6, %s5159_s28), 63  ;;  %v503_v11 = vpack.c.b16 %v499_v3, %v499_v3  ;;  %v504_v12 = vpack.c.b16 %v500_v4, %v500_v4  ;;  %v505_v13 = vpack.c.b16 %v501_v5, %v501_v5  ;;  %v506_v14 = vpack.c.b16 %v502_v6, %v502_v6  ;;  %v5789_v15 = vld [vmem:[#allocation3 + $0x3e0] sm:$0xf]  ;;  %v6203_v16 = vld [vmem:[#allocation3 + $0x3ec] sm:$0xf0] }
  0x19   : > { %s5160_s29 = sshll.u32 %s8321_s28, 2  ;;  %v5406_v18 = vor.u32 %v6107_v10, %v5405_v9  ;;  %v5533_v19 = vld [vmem:[#allocation3 + $0x1e0] sm:$0xf]  ;;  %v6139_v20 = vld [vmem:[#allocation3 + $0x1ec] sm:$0xf0]  ;;  %v5790_v26 = vor.u32 %v6203_v16, %v5789_v15  ;;  %s5162_s26 = sshll.u32 %s8321_s28, 3 }
  0x1a   : > { %s6616_s8 = scalar_lea.vmem %s7977_s0, %s5160_s29  ;;  %v558_v21 = vsel %vm556_vm0, %v503_v11, 0  ;;  %v561_v22 = vsel %vm556_vm0, %v504_v12, 0  ;;  %v564_v23 = vsel %vm556_vm0, %v505_v13, 0  ;;  %v567_v24 = vsel %vm556_vm0, %v506_v14, 0  ;;  %v5645_v28 = vld [vmem:[#allocation3 + $0x2c0] sm:$0xf]  ;;  %s7827_s30 = scalar_lea.vmem %s7986_s9, %s5162_s26 }
  0x1b   : > { %v6061_v25 = vld [vmem:[%s6616_s8] sm:$0xff]  ;;  %576 = vmatpush.bf16.msra.mxu0 %v558_v21  ;;  %665 = vmatpush.bf16.msra.mxu1 %v561_v22  ;;  %v5534_v27 = vor.u32 %v6139_v20, %v5533_v19  ;;  %v6167_v29 = vld [vmem:[#allocation3 + $0x2cc] sm:$0xf0]  ;;  %v6062_v40 = vld [vmem:[%s6616_s8 + $0x8] sm:$0xff] }
  0x1c   : > { %754 = vmatpush.bf16.msra.mxu2 %v564_v23  ;;  %843 = vmatpush.bf16.msra.mxu3 %v567_v24  ;;  %v5389_v30 = vld [vmem:[#allocation3 + $0xc0] sm:$0xf]  ;;  %v5646_v31 = vor.u32 %v6167_v29, %v5645_v28  ;;  %v6103_v32 = vld [vmem:[#allocation3 + $0xcc] sm:$0xf0]  ;;  %v6064_v54 = vld [vmem:[%s6616_s8 + $0x18] sm:$0xff] }
  0x1d   : > { %v5773_v33 = vld [vmem:[#allocation3 + $0x3c0] sm:$0xf]  ;;  %v6199_v34 = vld [vmem:[#allocation3 + $0x3cc] sm:$0xf0]  ;;  %v5390_v35 = vor.u32 %v6103_v32, %v5389_v30  ;;  %v6066_v4 = vld [vmem:[%s6616_s8 + $0x28] sm:$0xff] }
  0x1e   : > { %5227 = vmatmul.msk.bf16.vlgmr.msra.gmra.mxu0 %vm507_vm1, %v6061_v25  ;;  %5243 = vmatmul.msk.bf16.vlgmr.msra.gmra.mxu1 %vm507_vm1, %v6061_v25  ;;  %v5774_v36 = vor.u32 %v6199_v34, %v5773_v33  ;;  %v5517_v37 = vld [vmem:[#allocation3 + $0x1c0] sm:$0xf]  ;;  %v6135_v38 = vld [vmem:[#allocation3 + $0x1cc] sm:$0xf0] }
  0x1f   : > { %1895 = vmatpush.bf16.msrb.mxu0 %v5406_v18  ;;  %5259 = vmatmul.msk.bf16.vlgmr.msra.gmra.mxu2 %vm507_vm1, %v6061_v25  ;;  %v5518_v39 = vor.u32 %v6135_v38, %v5517_v37  ;;  %v6063_v41 = vld [vmem:[%s6616_s8 + $0x10] sm:$0xff]  ;;  %v5629_v42 = vld [vmem:[#allocation3 + $0x2a0] sm:$0xf]  ;;  %v6068_v18 = vld [vmem:[%s6616_s8 + $0x38] sm:$0xff] }
  0x20   : > { %2073 = vmatpush.bf16.msrb.mxu2 %v5662_v17  ;;  %5275 = vmatmul.msk.bf16.vlgmr.msra.gmra.mxu3 %vm507_vm1, %v6061_v25  ;;  %v6163_v43 = vld [vmem:[#allocation3 + $0x2ac] sm:$0xf0]  ;;  %v5373_v44 = vld [vmem:[#allocation3 + $0xa0] sm:$0xf] }
  0x21   : > { %2162 = vmatpush.bf16.msrb.mxu3 %v5790_v26  ;;  %1984 = vmatpush.bf16.msrb.mxu1 %v5534_v27  ;;  %v5630_v45 = vor.u32 %v6163_v43, %v5629_v42  ;;  %v6099_v46 = vld [vmem:[#allocation3 + $0xac] sm:$0xf0]  ;;  %v5757_v47 = vld [vmem:[#allocation3 + $0x3a0] sm:$0xf] }
  0x22   : > { %v6195_v48 = vld [vmem:[#allocation3 + $0x3ac] sm:$0xf0]  ;;  %v5374_v49 = vor.u32 %v6099_v46, %v5373_v44  ;;  %v5501_v51 = vld [vmem:[#allocation3 + $0x1a0] sm:$0xf] }
  0x23   : > { %1896 = vmatpush.bf16.msrb.mxu0 %v5390_v35  ;;  %v5758_v50 = vor.u32 %v6195_v48, %v5757_v47  ;;  %v6131_v52 = vld [vmem:[#allocation3 + $0x1ac] sm:$0xf0]  ;;  %v6065_v55 = vld [vmem:[%s6616_s8 + $0x20] sm:$0xff] }
  0x24   : > { %2074 = vmatpush.bf16.msrb.mxu2 %v5646_v31  ;;  %v5502_v53 = vor.u32 %v6131_v52, %v5501_v51  ;;  %v5613_v56 = vld [vmem:[#allocation3 + $0x280] sm:$0xf]  ;;  %v6159_v57 = vld [vmem:[#allocation3 + $0x28c] sm:$0xf0] }
  0x25   : > { %2163 = vmatpush.bf16.msrb.mxu3 %v5774_v36  ;;  %1985 = vmatpush.bf16.msrb.mxu1 %v5518_v39  ;;  %v5357_v58 = vld [vmem:[#allocation3 + $0x80] sm:$0xf]  ;;  %v5614_v59 = vor.u32 %v6159_v57, %v5613_v56  ;;  %v6095_v60 = vld [vmem:[#allocation3 + $0x8c] sm:$0xf0]  ;;  %v6070_v57 = vld [vmem:[%s6616_s8 + $0x48] sm:$0xff] }
  0x26   : > { %v5741_v61 = vld [vmem:[#allocation3 + $0x380] sm:$0xf]  ;;  %v6191_v62 = vld [vmem:[#allocation3 + $0x38c] sm:$0xf0]  ;;  %v5358_v63 = vor.u32 %v6095_v60, %v5357_v58 }
  0x27   : > { %1897 = vmatpush.bf16.msrb.mxu0 %v5374_v49  ;;  %v5742_v0 = vor.u32 %v6191_v62, %v5741_v61  ;;  %v5485_v1 = vld [vmem:[#allocation3 + $0x180] sm:$0xf]  ;;  %v6127_v2 = vld [vmem:[#allocation3 + $0x18c] sm:$0xf0] }
  0x28   : > { %2075 = vmatpush.bf16.msrb.mxu2 %v5630_v45  ;;  %v5486_v3 = vor.u32 %v6127_v2, %v5485_v1  ;;  %v6067_v5 = vld [vmem:[%s6616_s8 + $0x30] sm:$0xff]  ;;  %v5597_v6 = vld [vmem:[#allocation3 + $0x260] sm:$0xf] }
  0x29   : > { %2164 = vmatpush.bf16.msrb.mxu3 %v5758_v50  ;;  %1986 = vmatpush.bf16.msrb.mxu1 %v5502_v53  ;;  %v6155_v7 = vld [vmem:[#allocation3 + $0x26c] sm:$0xf0]  ;;  %v5341_v8 = vld [vmem:[#allocation3 + $0x60] sm:$0xf] }
  0x2a   : > { %v5598_v9 = vor.u32 %v6155_v7, %v5597_v6  ;;  %v6091_v10 = vld [vmem:[#allocation3 + $0x6c] sm:$0xf0]  ;;  %v5725_v11 = vld [vmem:[#allocation3 + $0x360] sm:$0xf] }
  0x2b   : > { %1898 = vmatpush.bf16.msrb.mxu0 %v5358_v63  ;;  %v6187_v12 = vld [vmem:[#allocation3 + $0x36c] sm:$0xf0]  ;;  %v5342_v13 = vor.u32 %v6091_v10, %v5341_v8  ;;  %v5469_v15 = vld [vmem:[#allocation3 + $0x160] sm:$0xf] }
  0x2c   : > { %2076 = vmatpush.bf16.msrb.mxu2 %v5614_v59  ;;  %v5726_v14 = vor.u32 %v6187_v12, %v5725_v11  ;;  %v6123_v16 = vld [vmem:[#allocation3 + $0x16c] sm:$0xf0]  ;;  %v407_v19 = vld [vmem:[%s7979_s2] sm:$0xf] }
  0x2d   : > { %2165 = vmatpush.bf16.msrb.mxu3 %v5742_v0  ;;  %1987 = vmatpush.bf16.msrb.mxu1 %v5486_v3  ;;  %v5470_v17 = vor.u32 %v6123_v16, %v5469_v15  ;;  %v6069_v20 = vld [vmem:[%s6616_s8 + $0x40] sm:$0xff]  ;;  %v6666_v23 = vperm.slane %v407_v19, 0  ;;  %v6668_v24 = vperm.slane %v407_v19, 1  ;;  %v6151_v26 = vld [vmem:[#allocation3 + $0x24c] sm:$0xf0]  ;;  %v6680_v44 = vperm.slane %v407_v19, 3 }
  0x2e   : > { %5228 = vmatmul.msk.bf16.gmra.mxu0 %vm507_vm1, %v6062_v40  ;;  %5244 = vmatmul.msk.bf16.gmra.mxu1 %vm507_vm1, %v6062_v40  ;;  %v5581_v25 = vld [vmem:[#allocation3 + $0x240] sm:$0xf]  ;;  %v6087_v29 = vld [vmem:[#allocation3 + $0x4c] sm:$0xf0] }
  0x2f   : > { %5260 = vmatmul.msk.bf16.gmra.mxu2 %vm507_vm1, %v6062_v40  ;;  %1899 = vmatpush.bf16.msrb.mxu0 %v5342_v13  ;;  %v5325_v27 = vld [vmem:[#allocation3 + $0x40] sm:$0xf]  ;;  %v5582_v28 = vor.u32 %v6151_v26, %v5581_v25  ;;  %v6183_v31 = vld [vmem:[#allocation3 + $0x34c] sm:$0xf0] }
  0x30   : > { %5276 = vmatmul.msk.bf16.gmra.mxu3 %vm507_vm1, %v6062_v40  ;;  %2077 = vmatpush.bf16.msrb.mxu2 %v5598_v9  ;;  %v5709_v30 = vld [vmem:[#allocation3 + $0x340] sm:$0xf]  ;;  %v5326_v33 = vor.u32 %v6087_v29, %v5325_v27  ;;  %v6676_v40 = vperm.slane %v407_v19, 2  ;;  %v6119_v46 = vld [vmem:[#allocation3 + $0x14c] sm:$0xf0] }
  0x31   : > { %2166 = vmatpush.bf16.msrb.mxu3 %v5726_v14  ;;  %1988 = vmatpush.bf16.msrb.mxu1 %v5470_v17  ;;  %v5710_v34 = vor.u32 %v6183_v31, %v5709_v30  ;;  %v5453_v45 = vld [vmem:[#allocation3 + $0x140] sm:$0xf] }
  0x32   : > { %v5454_v50 = vor.u32 %v6119_v46, %v5453_v45 }
  0x33   : > { %1900 = vmatpush.bf16.msrb.mxu0 %v5326_v33 }
  0x34   : > { %2078 = vmatpush.bf16.msrb.mxu2 %v5582_v28 }
  0x35   : > { %2167 = vmatpush.bf16.msrb.mxu3 %v5710_v34  ;;  %1989 = vmatpush.bf16.msrb.mxu1 %v5454_v50 }
  0x3e   : > { %5229 = vmatmul.msk.bf16.gmra.mxu0 %vm507_vm1, %v6063_v41  ;;  %5245 = vmatmul.msk.bf16.gmra.mxu1 %vm507_vm1, %v6063_v41 }
  0x3f   : > { %5261 = vmatmul.msk.bf16.gmra.mxu2 %vm507_vm1, %v6063_v41 }
  0x40   : > { %5277 = vmatmul.msk.bf16.gmra.mxu3 %vm507_vm1, %v6063_v41 }
  0x4e   : > { %5230 = vmatmul.msk.bf16.gmra.mxu0 %vm507_vm1, %v6064_v54  ;;  %5246 = vmatmul.msk.bf16.gmra.mxu1 %vm507_vm1, %v6064_v54 }
  0x4f   : > { %5262 = vmatmul.msk.bf16.gmra.mxu2 %vm507_vm1, %v6064_v54 }
  0x50   : > { %5278 = vmatmul.msk.bf16.gmra.mxu3 %vm507_vm1, %v6064_v54 }
  0x5e   : > { %5231 = vmatmul.msk.bf16.gmra.mxu0 %vm507_vm1, %v6065_v55  ;;  %5247 = vmatmul.msk.bf16.gmra.mxu1 %vm507_vm1, %v6065_v55 }
  0x5f   : > { %5263 = vmatmul.msk.bf16.gmra.mxu2 %vm507_vm1, %v6065_v55 }
  0x60   : > { %5279 = vmatmul.msk.bf16.gmra.mxu3 %vm507_vm1, %v6065_v55 }
  0x6e   : > { %5232 = vmatmul.msk.bf16.gmra.mxu0 %vm507_vm1, %v6066_v4  ;;  %5248 = vmatmul.msk.bf16.gmra.mxu1 %vm507_vm1, %v6066_v4 }
  0x6f   : > { %5264 = vmatmul.msk.bf16.gmra.mxu2 %vm507_vm1, %v6066_v4 }
  0x70   : > { %5280 = vmatmul.msk.bf16.gmra.mxu3 %vm507_vm1, %v6066_v4 }
  0x7e   : > { %5233 = vmatmul.msk.bf16.gmra.mxu0 %vm507_vm1, %v6067_v5  ;;  %5249 = vmatmul.msk.bf16.gmra.mxu1 %vm507_vm1, %v6067_v5 }
  0x7f   : > { %5265 = vmatmul.msk.bf16.gmra.mxu2 %vm507_vm1, %v6067_v5 }
  0x80   : > { %5281 = vmatmul.msk.bf16.gmra.mxu3 %vm507_vm1, %v6067_v5 }
  0x8e   : > { %5234 = vmatmul.msk.bf16.gmra.mxu0 %vm507_vm1, %v6068_v18  ;;  %5250 = vmatmul.msk.bf16.gmra.mxu1 %vm507_vm1, %v6068_v18 }
  0x8f   : > { %5266 = vmatmul.msk.bf16.gmra.mxu2 %vm507_vm1, %v6068_v18 }
  0x90   : > { %5282 = vmatmul.msk.bf16.gmra.mxu3 %vm507_vm1, %v6068_v18 }
  0x9b   : > { %v578_v21 = vpop.f32.mrf.mxu0  ;;  %v667_v22 = vpop.f32.mrf.mxu1 }
  0x9c   : > { %v579_v32 = vadd.f32 %v578_v21, %v6666_v23  ;;  %v668_v35 = vadd.f32 %v667_v22, %v6668_v24  ;;  %v6071_v22 = vld [vmem:[%s6616_s8 + $0x50] sm:$0xff] }
  0x9e   : > { %5235 = vmatmul.msk.bf16.gmra.mxu0 %vm507_vm1, %v6069_v20  ;;  %5251 = vmatmul.msk.bf16.gmra.mxu1 %vm507_vm1, %v6069_v20  ;;  %v925_v43 = vmax.f32 %v579_v32, 0.0  ;;  %v926_v47 = vmax.f32 %v668_v35, 0.0  ;;  %v5565_v35 = vld [vmem:[#allocation3 + $0x220] sm:$0xf] }
  0x9f   : > { %5267 = vmatmul.msk.bf16.gmra.mxu2 %vm507_vm1, %v6069_v20 }
  0xa0   : > { %5283 = vmatmul.msk.bf16.gmra.mxu3 %vm507_vm1, %v6069_v20 }
  0xa2   : > { %v756_v36 = vpop.f32.mrf.mxu2 }
  0xa3   : > { %v845_v37 = vpop.f32.mrf.mxu3  ;;  %v580_v38 = vpop.f32.mrf.mxu0  ;;  %v757_v53 = vadd.f32 %v756_v36, %v6676_v40  ;;  %v6147_v36 = vld [vmem:[#allocation3 + $0x22c] sm:$0xf0] }
  0xa4   : > { %v669_v39 = vpop.f32.mrf.mxu1  ;;  %v581_v41 = vadd.f32 %v580_v38, %v6666_v23  ;;  %v846_v54 = vadd.f32 %v845_v37, %v6680_v44  ;;  %v5309_v37 = vld [vmem:[#allocation3 + $0x20] sm:$0xf]  ;;  %v5566_v38 = vor.u32 %v6147_v36, %v5565_v35 }
  0xa5   : > { %v670_v42 = vadd.f32 %v669_v39, %v6668_v24  ;;  %v927_v62 = vmax.f32 %v757_v53, 0.0  ;;  %v6083_v39 = vld [vmem:[#allocation3 + $0x2c] sm:$0xf0] }
  0xa6   : > { %v929_v48 = vmax.f32 %v581_v41, 0.0  ;;  %v928_v63 = vmax.f32 %v846_v54, 0.0  ;;  %v5693_v41 = vld [vmem:[#allocation3 + $0x320] sm:$0xf]  ;;  %v5310_v45 = vor.u32 %v6083_v39, %v5309_v37  ;;  %2079 = vmatpush.bf16.msrb.mxu2 %v5566_v38 }
  0xa7   : > { %v930_v49 = vmax.f32 %v670_v42, 0.0  ;;  %v6179_v42 = vld [vmem:[#allocation3 + $0x32c] sm:$0xf0] }
  0xa8   : > { %v6682_v51 = vpack.c.bf16 %v929_v48, %v925_v43  ;;  %v5694_v46 = vor.u32 %v6179_v42, %v5693_v41  ;;  %1901 = vmatpush.bf16.msrb.mxu0 %v5310_v45 }
  0xa9   : > { %v6684_v52 = vpack.c.bf16 %v930_v49, %v926_v47 }
  0xaa   : > { %v758_v55 = vpop.f32.mrf.mxu2  ;;  %2168 = vmatpush.bf16.msrb.mxu3 %v5694_v46 }
  0xab   : > { %v847_v56 = vpop.f32.mrf.mxu3  ;;  %v759_v58 = vadd.f32 %v758_v55, %v6676_v40  ;;  %v583_v60 = vpop.f32.mrf.mxu0 }
  0xac   : > { %v848_v59 = vadd.f32 %v847_v56, %v6680_v44  ;;  %v672_v61 = vpop.f32.mrf.mxu1  ;;  %v584_v4 = vadd.f32 %v583_v60, %v6666_v23 }
  0xad   : > { %v931_v0 = vmax.f32 %v759_v58, 0.0  ;;  %v673_v5 = vadd.f32 %v672_v61, %v6668_v24  ;;  %v6115_v58 = vld [vmem:[#allocation3 + $0x12c] sm:$0xf0] }
  0xae   : > { %v932_v1 = vmax.f32 %v848_v59, 0.0  ;;  %5236 = vmatmul.msk.bf16.gmra.mxu0 %vm507_vm1, %v6070_v57  ;;  %5252 = vmatmul.msk.bf16.gmra.mxu1 %vm507_vm1, %v6070_v57  ;;  %v933_v12 = vmax.f32 %v584_v4, 0.0 }
  0xaf   : > { %v6693_v2 = vpack.c.bf16 %v931_v0, %v927_v62  ;;  %5268 = vmatmul.msk.bf16.gmra.mxu2 %vm507_vm1, %v6070_v57  ;;  %v934_v13 = vmax.f32 %v673_v5, 0.0 }
  0xb0   : > { %v6695_v3 = vpack.c.bf16 %v932_v1, %v928_v63  ;;  %5284 = vmatmul.msk.bf16.gmra.mxu3 %vm507_vm1, %v6070_v57  ;;  %v5437_v57 = vld [vmem:[#allocation3 + $0x120] sm:$0xf] }
  0xb1   : > { %v5438_v62 = vor.u32 %v6115_v58, %v5437_v57  ;;  %v5549_v57 = vld [vmem:[#allocation3 + $0x200] sm:$0xf]  ;;  %v6143_v58 = vld [vmem:[#allocation3 + $0x20c] sm:$0xf0] }
  0xb2   : > { %v761_v6 = vpop.f32.mrf.mxu2 }
  0xb3   : > { %v850_v7 = vpop.f32.mrf.mxu3  ;;  %v585_v8 = vpop.f32.mrf.mxu0  ;;  %v762_v18 = vadd.f32 %v761_v6, %v6676_v40  ;;  %1990 = vmatpush.bf16.msrb.mxu1 %v5438_v62  ;;  %v5677_v62 = vld [vmem:[#allocation3 + $0x300] sm:$0xf] }
  0xb4   : > { %v674_v9 = vpop.f32.mrf.mxu1  ;;  %v586_v10 = vadd.f32 %v585_v8, %v6666_v23  ;;  %v851_v19 = vadd.f32 %v850_v7, %v6680_v44  ;;  %v6072_v7 = vld [vmem:[%s6616_s8 + $0x58] sm:$0xff] }
  0xb5   : > { %v675_v11 = vadd.f32 %v674_v9, %v6668_v24  ;;  %v935_v29 = vmax.f32 %v762_v18, 0.0 }
  0xb6   : > { %v937_v14 = vmax.f32 %v586_v10, 0.0  ;;  %v936_v30 = vmax.f32 %v851_v19, 0.0 }
  0xb7   : > { %v938_v15 = vmax.f32 %v675_v11, 0.0 }
  0xb8   : > { %v6703_v16 = vpack.c.bf16 %v937_v14, %v933_v12 }
  0xb9   : > { %v6705_v17 = vpack.c.bf16 %v938_v15, %v934_v13 }
  0xba   : > { %v763_v20 = vpop.f32.mrf.mxu2 }
  0xbb   : > { %v852_v21 = vpop.f32.mrf.mxu3  ;;  %v764_v25 = vadd.f32 %v763_v20, %v6676_v40  ;;  %v588_v27 = vpop.f32.mrf.mxu0 }
  0xbc   : > { %v853_v26 = vadd.f32 %v852_v21, %v6680_v44  ;;  %v677_v28 = vpop.f32.mrf.mxu1  ;;  %v589_v43 = vadd.f32 %v588_v27, %v6666_v23 }
  0xbd   : > { %v939_v31 = vmax.f32 %v764_v25, 0.0  ;;  %v678_v47 = vadd.f32 %v677_v28, %v6668_v24 }
  0xbe   : > { %v940_v32 = vmax.f32 %v853_v26, 0.0  ;;  %5237 = vmatmul.msk.bf16.gmra.mxu0 %vm507_vm1, %v6071_v22  ;;  %5253 = vmatmul.msk.bf16.gmra.mxu1 %vm507_vm1, %v6071_v22  ;;  %v941_v56 = vmax.f32 %v589_v43, 0.0  ;;  %v6073_v43 = vld [vmem:[%s6616_s8 + $0x60] sm:$0xff] }
  0xbf   : > { %v6714_v33 = vpack.c.bf16 %v939_v31, %v935_v29  ;;  %5269 = vmatmul.msk.bf16.gmra.mxu2 %vm507_vm1, %v6071_v22  ;;  %v942_v59 = vmax.f32 %v678_v47, 0.0 }
  0xc0   : > { %v6716_v34 = vpack.c.bf16 %v940_v32, %v936_v30  ;;  %5285 = vmatmul.msk.bf16.gmra.mxu3 %vm507_vm1, %v6071_v22 }
  0xc2   : > { %v766_v48 = vpop.f32.mrf.mxu2 }
  0xc3   : > { %v855_v49 = vpop.f32.mrf.mxu3  ;;  %v590_v50 = vpop.f32.mrf.mxu0  ;;  %v767_v1 = vadd.f32 %v766_v48, %v6676_v40 }
  0xc4   : > { %v679_v53 = vpop.f32.mrf.mxu1  ;;  %v591_v54 = vadd.f32 %v590_v50, %v6666_v23  ;;  %v856_v4 = vadd.f32 %v855_v49, %v6680_v44 }
  0xc5   : > { %v680_v55 = vadd.f32 %v679_v53, %v6668_v24  ;;  %v943_v12 = vmax.f32 %v767_v1, 0.0  ;;  %v6175_v1 = vld [vmem:[#allocation3 + $0x30c] sm:$0xf0] }
  0xc6   : > { %v945_v60 = vmax.f32 %v591_v54, 0.0  ;;  %v944_v13 = vmax.f32 %v856_v4, 0.0 }
  0xc7   : > { %v946_v61 = vmax.f32 %v680_v55, 0.0 }
  0xc8   : > { %v6724_v63 = vpack.c.bf16 %v945_v60, %v941_v56  ;;  %v5550_v60 = vor.u32 %v6143_v58, %v5549_v57 }
  0xc9   : > { %v6726_v0 = vpack.c.bf16 %v946_v61, %v942_v59  ;;  %v5293_v59 = vld [vmem:[#allocation3] sm:$0xf]  ;;  %v6079_v61 = vld [vmem:[#allocation3 + $0xc] sm:$0xf0] }
  0xca   : > { %v768_v5 = vpop.f32.mrf.mxu2  ;;  %2080 = vmatpush.bf16.msrb.mxu2 %v5550_v60 }
  0xcb   : > { %v857_v6 = vpop.f32.mrf.mxu3  ;;  %v769_v8 = vadd.f32 %v768_v5, %v6676_v40  ;;  %v593_v10 = vpop.f32.mrf.mxu0  ;;  %v5294_v5 = vor.u32 %v6079_v61, %v5293_v59 }
  0xcc   : > { %v858_v9 = vadd.f32 %v857_v6, %v6680_v44  ;;  %v682_v11 = vpop.f32.mrf.mxu1  ;;  %v594_v20 = vadd.f32 %v593_v10, %v6666_v23  ;;  %v5678_v6 = vor.u32 %v6175_v1, %v5677_v62 }
  0xcd   : > { %v947_v14 = vmax.f32 %v769_v8, 0.0  ;;  %v683_v21 = vadd.f32 %v682_v11, %v6668_v24  ;;  %1902 = vmatpush.bf16.msrb.mxu0 %v5294_v5 }
  0xce   : > { %v948_v15 = vmax.f32 %v858_v9, 0.0  ;;  %5238 = vmatmul.msk.bf16.gmra.mxu0 %vm507_vm1, %v6072_v7  ;;  %5254 = vmatmul.msk.bf16.gmra.mxu1 %vm507_vm1, %v6072_v7  ;;  %v949_v30 = vmax.f32 %v594_v20, 0.0  ;;  %v6111_v20 = vld [vmem:[#allocation3 + $0x10c] sm:$0xf0] }
  0xcf   : > { %v6735_v18 = vpack.c.bf16 %v947_v14, %v943_v12  ;;  %5270 = vmatmul.msk.bf16.gmra.mxu2 %vm507_vm1, %v6072_v7  ;;  %v950_v31 = vmax.f32 %v683_v21, 0.0  ;;  %2169 = vmatpush.bf16.msrb.mxu3 %v5678_v6 }
  0xd0   : > { %v6737_v19 = vpack.c.bf16 %v948_v15, %v944_v13  ;;  %5286 = vmatmul.msk.bf16.gmra.mxu3 %vm507_vm1, %v6072_v7  ;;  %v5421_v15 = vld [vmem:[#allocation3 + $0x100] sm:$0xf] }
  0xd2   : > { %8093 = vst [vmem:[#allocation9_spill] sm:$0xff] %v6737_v19  ;;  %v771_v22 = vpop.f32.mrf.mxu2 }
  0xd3   : > { %v860_v25 = vpop.f32.mrf.mxu3  ;;  %v595_v26 = vpop.f32.mrf.mxu0  ;;  %v772_v38 = vadd.f32 %v771_v22, %v6676_v40 }
  0xd4   : > { %v684_v27 = vpop.f32.mrf.mxu1  ;;  %v596_v28 = vadd.f32 %v595_v26, %v6666_v23  ;;  %v861_v39 = vadd.f32 %v860_v25, %v6680_v44  ;;  %v5422_v26 = vor.u32 %v6111_v20, %v5421_v15 }
  0xd5   : > { %v685_v29 = vadd.f32 %v684_v27, %v6668_v24  ;;  %v951_v49 = vmax.f32 %v772_v38, 0.0 }
  0xd6   : > { %v953_v32 = vmax.f32 %v596_v28, 0.0  ;;  %v952_v50 = vmax.f32 %v861_v39, 0.0  ;;  %1991 = vmatpush.bf16.msrb.mxu1 %v5422_v26 }
  0xd7   : > { %v954_v35 = vmax.f32 %v685_v29, 0.0 }
  0xd8   : > { %v6745_v36 = vpack.c.bf16 %v953_v32, %v949_v30 }
  0xd9   : > { %v6747_v37 = vpack.c.bf16 %v954_v35, %v950_v31  ;;  %v6074_v35 = vld [vmem:[%s6616_s8 + $0x68] sm:$0xff] }
  0xda   : > { %8094 = vst [vmem:[#allocation10_spill] sm:$0xff] %v6745_v36  ;;  %v773_v41 = vpop.f32.mrf.mxu2 }
  0xdb   : > { %8095 = vst [vmem:[#allocation11_spill] sm:$0xff] %v6747_v37  ;;  %v862_v42 = vpop.f32.mrf.mxu3  ;;  %v774_v45 = vadd.f32 %v773_v41, %v6676_v40  ;;  %v598_v47 = vpop.f32.mrf.mxu0 }
  0xdc   : > { %v863_v46 = vadd.f32 %v862_v42, %v6680_v44  ;;  %v687_v48 = vpop.f32.mrf.mxu1  ;;  %v599_v4 = vadd.f32 %v598_v47, %v6666_v23 }
  0xdd   : > { %v955_v53 = vmax.f32 %v774_v45, 0.0  ;;  %v688_v7 = vadd.f32 %v687_v48, %v6668_v24 }
  0xde   : > { %v956_v54 = vmax.f32 %v863_v46, 0.0  ;;  %5239 = vmatmul.msk.bf16.gmra.mxu0 %vm507_vm1, %v6073_v43  ;;  %5255 = vmatmul.msk.bf16.gmra.mxu1 %vm507_vm1, %v6073_v43  ;;  %v957_v14 = vmax.f32 %v599_v4, 0.0 }
  0xdf   : > { %v6756_v55 = vpack.c.bf16 %v955_v53, %v951_v49  ;;  %5271 = vmatmul.msk.bf16.gmra.mxu2 %vm507_vm1, %v6073_v43  ;;  %v958_v21 = vmax.f32 %v688_v7, 0.0 }
  0xe0   : > { %v6758_v56 = vpack.c.bf16 %v956_v54, %v952_v50  ;;  %5287 = vmatmul.msk.bf16.gmra.mxu3 %vm507_vm1, %v6073_v43 }
  0xe1   : > { %8096 = vst [vmem:[#allocation12_spill] sm:$0xff] %v6756_v55 }
  0xe2   : > { %8097 = vst [vmem:[#allocation13_spill] sm:$0xff] %v6758_v56  ;;  %v776_v8 = vpop.f32.mrf.mxu2 }
  0xe3   : > { %v865_v9 = vpop.f32.mrf.mxu3  ;;  %v600_v10 = vpop.f32.mrf.mxu0  ;;  %v777_v29 = vadd.f32 %v776_v8, %v6676_v40 }
  0xe4   : > { %v689_v11 = vpop.f32.mrf.mxu1  ;;  %v601_v12 = vadd.f32 %v600_v10, %v6666_v23  ;;  %v866_v30 = vadd.f32 %v865_v9, %v6680_v44 }
  0xe5   : > { %v690_v13 = vadd.f32 %v689_v11, %v6668_v24  ;;  %v959_v43 = vmax.f32 %v777_v29, 0.0 }
  0xe6   : > { %v961_v22 = vmax.f32 %v601_v12, 0.0  ;;  %v960_v45 = vmax.f32 %v866_v30, 0.0  ;;  %v6075_v12 = vld [vmem:[%s6616_s8 + $0x70] sm:$0xff] }
  0xe7   : > { %v962_v25 = vmax.f32 %v690_v13, 0.0 }
  0xe8   : > { %v6766_v27 = vpack.c.bf16 %v961_v22, %v957_v14 }
  0xe9   : > { %v6768_v28 = vpack.c.bf16 %v962_v25, %v958_v21 }
  0xea   : > { %8098 = vst [vmem:[#allocation14_spill] sm:$0xff] %v6766_v27  ;;  %v778_v31 = vpop.f32.mrf.mxu2 }
  0xeb   : > { %8099 = vst [vmem:[#allocation15_spill] sm:$0xff] %v6768_v28  ;;  %v867_v32 = vpop.f32.mrf.mxu3  ;;  %v779_v38 = vadd.f32 %v778_v31, %v6676_v40  ;;  %v603_v41 = vpop.f32.mrf.mxu0  ;;  %v6169_v31 = vld [vmem:[#allocation3 + $0x2e4] sm:$0xf] }
  0xec   : > { %v868_v39 = vadd.f32 %v867_v32, %v6680_v44  ;;  %v692_v42 = vpop.f32.mrf.mxu1  ;;  %v604_v50 = vadd.f32 %v603_v41, %v6666_v23  ;;  %v5663_v32 = vld [vmem:[#allocation3 + $0x2f0] sm:$0xf0]  ;;  %v6201_v41 = vld [vmem:[#allocation3 + $0x3e4] sm:$0xf] }
  0xed   : > { %v963_v46 = vmax.f32 %v779_v38, 0.0  ;;  %v693_v53 = vadd.f32 %v692_v42, %v6668_v24  ;;  %v5666_v38 = vor.u32 %v6169_v31, %v5663_v32  ;;  %v5791_v42 = vld [vmem:[#allocation3 + $0x3f0] sm:$0xf0] }
  0xee   : > { %v964_v47 = vmax.f32 %v868_v39, 0.0  ;;  %5240 = vmatmul.msk.bf16.gmra.mxu0 %vm507_vm1, %v6074_v35  ;;  %5256 = vmatmul.msk.bf16.gmra.mxu1 %vm507_vm1, %v6074_v35  ;;  %v965_v62 = vmax.f32 %v604_v50, 0.0  ;;  %v5407_v39 = vld [vmem:[#allocation3 + $0xf0] sm:$0xf0] }
  0xef   : > { %v6777_v48 = vpack.c.bf16 %v963_v46, %v959_v43  ;;  %5272 = vmatmul.msk.bf16.gmra.mxu2 %vm507_vm1, %v6074_v35  ;;  %v966_v1 = vmax.f32 %v693_v53, 0.0  ;;  %v5794_v46 = vor.u32 %v6201_v41, %v5791_v42 }
  0xf0   : > { %v6779_v49 = vpack.c.bf16 %v964_v47, %v960_v45  ;;  %5288 = vmatmul.msk.bf16.gmra.mxu3 %vm507_vm1, %v6074_v35  ;;  %v6105_v35 = vld [vmem:[#allocation3 + $0xe4] sm:$0xf]  ;;  %2429 = vmatpush.bf16.msra.mxu2 %v5666_v38 }
  0xf1   : > { %8100 = vst [vmem:[#allocation16_spill] sm:$0xff] %v6777_v48  ;;  %v5410_v45 = vor.u32 %v6105_v35, %v5407_v39  ;;  %2518 = vmatpush.bf16.msra.mxu3 %v5794_v46 }
  0xf2   : > { %8101 = vst [vmem:[#allocation17_spill] sm:$0xff] %v6779_v49  ;;  %v781_v54 = vpop.f32.mrf.mxu2 }
  0xf3   : > { %v870_v57 = vpop.f32.mrf.mxu3  ;;  %v605_v58 = vpop.f32.mrf.mxu0  ;;  %v782_v8 = vadd.f32 %v781_v54, %v6676_v40  ;;  %2251 = vmatpush.bf16.msra.mxu0 %v5410_v45 }
  0xf4   : > { %v694_v59 = vpop.f32.mrf.mxu1  ;;  %v606_v60 = vadd.f32 %v605_v58, %v6666_v23  ;;  %v871_v9 = vadd.f32 %v870_v57, %v6680_v44 }
  0xf5   : > { %v695_v61 = vadd.f32 %v694_v59, %v6668_v24  ;;  %v967_v21 = vmax.f32 %v782_v8, 0.0 }
  0xf6   : > { %v969_v4 = vmax.f32 %v606_v60, 0.0  ;;  %v968_v22 = vmax.f32 %v871_v9, 0.0 }
  0xf7   : > { %v970_v5 = vmax.f32 %v695_v61, 0.0  ;;  %v6137_v61 = vld [vmem:[#allocation3 + $0x1e4] sm:$0xf] }
  0xf8   : > { %v6787_v6 = vpack.c.bf16 %v969_v4, %v965_v62  ;;  %v5535_v62 = vld [vmem:[#allocation3 + $0x1f0] sm:$0xf0] }
  0xf9   : > { %v6789_v7 = vpack.c.bf16 %v970_v5, %v966_v1  ;;  %v5538_v8 = vor.u32 %v6137_v61, %v5535_v62 }
  0xfa   : > { %8102 = vst [vmem:[#allocation18_spill] sm:$0xff] %v6787_v6  ;;  %v783_v10 = vpop.f32.mrf.mxu2 }
  0xfb   : > { %8103 = vst [vmem:[#allocation19_spill] sm:$0xff] %v6789_v7  ;;  %v872_v11 = vpop.f32.mrf.mxu3  ;;  %v784_v13 = vadd.f32 %v783_v10, %v6676_v40  ;;  %v608_v15 = vpop.f32.mrf.mxu0  ;;  %2340 = vmatpush.bf16.msra.mxu1 %v5538_v8 }
  0xfc   : > { %v873_v14 = vadd.f32 %v872_v11, %v6680_v44  ;;  %v697_v20 = vpop.f32.mrf.mxu1  ;;  %v609_v43 = vadd.f32 %v608_v15, %v6666_v23  ;;  %v6076_v15 = vld [vmem:[%s6616_s8 + $0x78] sm:$0xff] }
  0xfd   : > { %v971_v25 = vmax.f32 %v784_v13, 0.0  ;;  %v698_v47 = vadd.f32 %v697_v20, %v6668_v24 }
  0xfe   : > { %v972_v26 = vmax.f32 %v873_v14, 0.0  ;;  %5241 = vmatmul.msk.bf16.gmra.mxu0 %vm507_vm1, %v6075_v12  ;;  %5257 = vmatmul.msk.bf16.gmra.mxu1 %vm507_vm1, %v6075_v12  ;;  %v973_v60 = vmax.f32 %v609_v43, 0.0 }
  0xff   : > { %v6798_v29 = vpack.c.bf16 %v971_v25, %v967_v21  ;;  %5273 = vmatmul.msk.bf16.gmra.mxu2 %vm507_vm1, %v6075_v12  ;;  %v974_v1 = vmax.f32 %v698_v47, 0.0 }
 0x100   : > { %v6800_v30 = vpack.c.bf16 %v972_v26, %v968_v22  ;;  %5289 = vmatmul.msk.bf16.gmra.mxu3 %vm507_vm1, %v6075_v12 }
 0x101   : > { %8104 = vst [vmem:[#allocation20_spill] sm:$0xff] %v6798_v29 }
 0x102   : > { %8105 = vst [vmem:[#allocation21_spill] sm:$0xff] %v6800_v30  ;;  %v786_v50 = vpop.f32.mrf.mxu2 }
 0x103   : > { %v875_v53 = vpop.f32.mrf.mxu3  ;;  %v610_v54 = vpop.f32.mrf.mxu0  ;;  %v787_v11 = vadd.f32 %v786_v50, %v6676_v40 }
 0x104   : > { %v699_v57 = vpop.f32.mrf.mxu1  ;;  %v611_v58 = vadd.f32 %v610_v54, %v6666_v23  ;;  %v876_v12 = vadd.f32 %v875_v53, %v6680_v44 }
 0x105   : > { %v700_v59 = vadd.f32 %v699_v57, %v6668_v24  ;;  %v975_v26 = vmax.f32 %v787_v11, 0.0 }
 0x106   : > { %v977_v4 = vmax.f32 %v611_v58, 0.0  ;;  %v976_v31 = vmax.f32 %v876_v12, 0.0 }
 0x107   : > { %v978_v5 = vmax.f32 %v700_v59, 0.0 }
 0x108   : > { %v6808_v9 = vpack.c.bf16 %v977_v4, %v973_v60 }
 0x109   : > { %v6810_v10 = vpack.c.bf16 %v978_v5, %v974_v1 }
 0x10a   : > { %8106 = vst [vmem:[#allocation22_spill] sm:$0xff] %v6808_v9  ;;  %v788_v13 = vpop.f32.mrf.mxu2 }
 0x10b   : > { %8107 = vst [vmem:[#allocation23_spill] sm:$0xff] %v6810_v10  ;;  %v877_v14 = vpop.f32.mrf.mxu3  ;;  %v789_v20 = vadd.f32 %v788_v13, %v6676_v40  ;;  %v613_v22 = vpop.f32.mrf.mxu0 }
 0x10c   : > { %v878_v21 = vadd.f32 %v877_v14, %v6680_v44  ;;  %v702_v25 = vpop.f32.mrf.mxu1  ;;  %v614_v41 = vadd.f32 %v613_v22, %v6666_v23 }
 0x10d   : > { %v979_v32 = vmax.f32 %v789_v20, 0.0  ;;  %v703_v42 = vadd.f32 %v702_v25, %v6668_v24 }
 0x10e   : > { %v980_v35 = vmax.f32 %v878_v21, 0.0  ;;  %5242 = vmatmul.msk.bf16.gmra.mxu0 %vm507_vm1, %v6076_v15  ;;  %5258 = vmatmul.msk.bf16.gmra.mxu1 %vm507_vm1, %v6076_v15  ;;  %v981_v54 = vmax.f32 %v614_v41, 0.0  ;;  %v5391_v41 = vld [vmem:[#allocation3 + $0xd0] sm:$0xf0] }
 0x10f   : > { %v6819_v38 = vpack.c.bf16 %v979_v32, %v975_v26  ;;  %5274 = vmatmul.msk.bf16.gmra.mxu2 %vm507_vm1, %v6076_v15  ;;  %v982_v57 = vmax.f32 %v703_v42, 0.0  ;;  %v6165_v26 = vld [vmem:[#allocation3 + $0x2c4] sm:$0xf] }
 0x110   : > { %v6821_v39 = vpack.c.bf16 %v980_v35, %v976_v31  ;;  %5290 = vmatmul.msk.bf16.gmra.mxu3 %vm507_vm1, %v6076_v15  ;;  %v5647_v31 = vld [vmem:[#allocation3 + $0x2d0] sm:$0xf0]  ;;  %v6101_v32 = vld [vmem:[#allocation3 + $0xc4] sm:$0xf] }
 0x111   : > { %8108 = vst [vmem:[#allocation24_spill] sm:$0xff] %v6819_v38  ;;  %v5650_v35 = vor.u32 %v6165_v26, %v5647_v31  ;;  %v6197_v42 = vld [vmem:[#allocation3 + $0x3c4] sm:$0xf] }
 0x112   : > { %8109 = vst [vmem:[#allocation25_spill] sm:$0xff] %v6821_v39  ;;  %v791_v43 = vpop.f32.mrf.mxu2 }
 0x113   : > { %v880_v45 = vpop.f32.mrf.mxu3  ;;  %v615_v46 = vpop.f32.mrf.mxu0  ;;  %v792_v62 = vadd.f32 %v791_v43, %v6676_v40  ;;  %v5775_v43 = vld [vmem:[#allocation3 + $0x3d0] sm:$0xf0]  ;;  %2430 = vmatpush.bf16.msra.mxu2 %v5650_v35 }
 0x114   : > { %v704_v47 = vpop.f32.mrf.mxu1  ;;  %v616_v50 = vadd.f32 %v615_v46, %v6666_v23  ;;  %v881_v1 = vadd.f32 %v880_v45, %v6680_v44  ;;  %v5394_v46 = vor.u32 %v6101_v32, %v5391_v41 }
 0x115   : > { %v705_v53 = vadd.f32 %v704_v47, %v6668_v24  ;;  %v983_v14 = vmax.f32 %v792_v62, 0.0  ;;  %v5778_v47 = vor.u32 %v6197_v42, %v5775_v43 }
 0x116   : > { %v985_v58 = vmax.f32 %v616_v50, 0.0  ;;  %v984_v15 = vmax.f32 %v881_v1, 0.0  ;;  %2252 = vmatpush.bf16.msra.mxu0 %v5394_v46 }
 0x117   : > { %v986_v59 = vmax.f32 %v705_v53, 0.0  ;;  %2519 = vmatpush.bf16.msra.mxu3 %v5778_v47 }
 0x118   : > { %v6829_v60 = vpack.c.bf16 %v985_v58, %v981_v54 }
 0x119   : > { %v6831_v61 = vpack.c.bf16 %v986_v59, %v982_v57 }
 0x11a   : > { %v793_v4 = vpop.f32.mrf.mxu2 }
 0x11b   : > { %v882_v5 = vpop.f32.mrf.mxu3  ;;  %v794_v8 = vadd.f32 %v793_v4, %v6676_v40  ;;  %v618_v12 = vpop.f32.mrf.mxu0  ;;  %v6133_v4 = vld [vmem:[#allocation3 + $0x1c4] sm:$0xf] }
 0x11c   : > { %v883_v11 = vadd.f32 %v882_v5, %v6680_v44  ;;  %v707_v13 = vpop.f32.mrf.mxu1  ;;  %v619_v45 = vadd.f32 %v618_v12, %v6666_v23  ;;  %v5519_v5 = vld [vmem:[#allocation3 + $0x1d0] sm:$0xf0] }
 0x11d   : > { %v987_v20 = vmax.f32 %v794_v8, 0.0  ;;  %v708_v50 = vadd.f32 %v707_v13, %v6668_v24 }
 0x11e   : > { %v988_v21 = vmax.f32 %v883_v11, 0.0  ;;  %1903 = vmatmul.bf16.vlgmr.msrb.gmra.mxu0 %v6682_v51  ;;  %1992 = vmatmul.bf16.vlgmr.msrb.gmra.mxu1 %v6684_v52  ;;  %v989_v1 = vmax.f32 %v619_v45, 0.0 }
 0x11f   : > { %v6839_v22 = vpack.c.bf16 %v987_v20, %v983_v14  ;;  %2081 = vmatmul.bf16.vlgmr.msrb.gmra.mxu2 %v6693_v2  ;;  %v990_v8 = vmax.f32 %v708_v50, 0.0  ;;  %v5522_v14 = vor.u32 %v6133_v4, %v5519_v5 }
 0x120   : > { %v6841_v25 = vpack.c.bf16 %v988_v21, %v984_v15  ;;  %2170 = vmatmul.bf16.vlgmr.msrb.gmra.mxu3 %v6695_v3 }
 0x121   : > { %2341 = vmatpush.bf16.msra.mxu1 %v5522_v14 }
 0x122   : > { %8110 = vst [vmem:[#allocation26_spill] sm:$0xff] %v6841_v25  ;;  %v796_v53 = vpop.f32.mrf.mxu2 }
 0x123   : > { %v885_v54 = vpop.f32.mrf.mxu3  ;;  %v620_v57 = vpop.f32.mrf.mxu0  ;;  %v797_v20 = vadd.f32 %v796_v53, %v6676_v40 }
 0x124   : > { %v709_v58 = vpop.f32.mrf.mxu1  ;;  %v621_v59 = vadd.f32 %v620_v57, %v6666_v23  ;;  %v886_v21 = vadd.f32 %v885_v54, %v6680_v44 }
 0x125   : > { %v710_v62 = vadd.f32 %v709_v58, %v6668_v24  ;;  %v991_v43 = vmax.f32 %v797_v20, 0.0 }
 0x126   : > { %v993_v11 = vmax.f32 %v621_v59, 0.0  ;;  %v992_v45 = vmax.f32 %v886_v21, 0.0 }
 0x127   : > { %v994_v12 = vmax.f32 %v710_v62, 0.0 }
 0x128   : > { %v6849_v15 = vpack.c.bf16 %v993_v11, %v989_v1 }
 0x129   : > { %v6851_v13 = vpack.c.bf16 %v994_v12, %v990_v8 }
 0x12a   : > { %8111 = vst [vmem:[#allocation27_spill] sm:$0xff] %v6849_v15  ;;  %v798_v26 = vpop.f32.mrf.mxu2 }
 0x12b   : > { %8112 = vst [vmem:[#allocation28_spill] sm:$0xff] %v6851_v13  ;;  %v887_v31 = vpop.f32.mrf.mxu3  ;;  %v799_v32 = vadd.f32 %v798_v26, %v6676_v40  ;;  %v623_v41 = vpop.f32.mrf.mxu0 }
 0x12c   : > { %v888_v35 = vadd.f32 %v887_v31, %v6680_v44  ;;  %v712_v42 = vpop.f32.mrf.mxu1  ;;  %v624_v54 = vadd.f32 %v623_v41, %v6666_v23 }
 0x12d   : > { %v995_v46 = vmax.f32 %v799_v32, 0.0  ;;  %v713_v57 = vadd.f32 %v712_v42, %v6668_v24 }
 0x12e   : > { %v996_v47 = vmax.f32 %v888_v35, 0.0  ;;  %1908 = vmatmul.bf16.gmra.mxu0 %v6703_v16  ;;  %1997 = vmatmul.bf16.gmra.mxu1 %v6705_v17  ;;  %v997_v8 = vmax.f32 %v624_v54, 0.0 }
 0x12f   : > { %v6859_v50 = vpack.c.bf16 %v995_v46, %v991_v43  ;;  %2086 = vmatmul.bf16.gmra.mxu2 %v6714_v33  ;;  %v998_v11 = vmax.f32 %v713_v57, 0.0 }
 0x130   : > { %v6861_v53 = vpack.c.bf16 %v996_v47, %v992_v45  ;;  %2175 = vmatmul.bf16.gmra.mxu3 %v6716_v34 }
 0x131   : > { %8113 = vst [vmem:[#allocation29_spill] sm:$0xff] %v6859_v50 }
 0x132   : > { %8114 = vst [vmem:[#allocation30_spill] sm:$0xff] %v6861_v53  ;;  %v801_v58 = vpop.f32.mrf.mxu2 }
 0x133   : > { %v890_v59 = vpop.f32.mrf.mxu3  ;;  %v625_v62 = vpop.f32.mrf.mxu0  ;;  %v802_v26 = vadd.f32 %v801_v58, %v6676_v40 }
 0x134   : > { %v714_v1 = vpop.f32.mrf.mxu1  ;;  %v626_v4 = vadd.f32 %v625_v62, %v6666_v23  ;;  %v891_v31 = vadd.f32 %v890_v59, %v6680_v44  ;;  %v6161_v59 = vld [vmem:[#allocation3 + $0x2a4] sm:$0xf] }
 0x135   : > { %v715_v5 = vadd.f32 %v714_v1, %v6668_v24  ;;  %v999_v46 = vmax.f32 %v802_v26, 0.0  ;;  %v5631_v1 = vld [vmem:[#allocation3 + $0x2b0] sm:$0xf0] }
 0x136   : > { %v1001_v12 = vmax.f32 %v626_v4, 0.0  ;;  %v1000_v47 = vmax.f32 %v891_v31, 0.0  ;;  %v6097_v4 = vld [vmem:[#allocation3 + $0xa4] sm:$0xf] }
 0x137   : > { %v1002_v14 = vmax.f32 %v715_v5, 0.0  ;;  %v5634_v5 = vor.u32 %v6161_v59, %v5631_v1  ;;  %v6129_v59 = vld [vmem:[#allocation3 + $0x1a4] sm:$0xf]  ;;  %v5503_v1 = vld [vmem:[#allocation3 + $0x1b0] sm:$0xf0] }
 0x138   : > { %v6869_v20 = vpack.c.bf16 %v1001_v12, %v997_v8  ;;  %v5375_v8 = vld [vmem:[#allocation3 + $0xb0] sm:$0xf0] }
 0x139   : > { %v6871_v21 = vpack.c.bf16 %v1002_v14, %v998_v11  ;;  %v6193_v11 = vld [vmem:[#allocation3 + $0x3a4] sm:$0xf]  ;;  %v5759_v12 = vld [vmem:[#allocation3 + $0x3b0] sm:$0xf0]  ;;  %v5378_v26 = vor.u32 %v6097_v4, %v5375_v8  ;;  %2431 = vmatpush.bf16.msra.mxu2 %v5634_v5  ;;  %v5506_v8 = vor.u32 %v6129_v59, %v5503_v1 }
 0x13a   : > { %v803_v32 = vpop.f32.mrf.mxu2  ;;  %v5762_v31 = vor.u32 %v6193_v11, %v5759_v12 }
 0x13b   : > { %v892_v35 = vpop.f32.mrf.mxu3  ;;  %v804_v41 = vadd.f32 %v803_v32, %v6676_v40  ;;  %v628_v43 = vpop.f32.mrf.mxu0  ;;  %2253 = vmatpush.bf16.msra.mxu0 %v5378_v26  ;;  %2342 = vmatpush.bf16.msra.mxu1 %v5506_v8 }
 0x13c   : > { %v893_v42 = vadd.f32 %v892_v35, %v6680_v44  ;;  %v717_v45 = vpop.f32.mrf.mxu1  ;;  %v629_v14 = vadd.f32 %v628_v43, %v6666_v23  ;;  %2520 = vmatpush.bf16.msra.mxu3 %v5762_v31 }
 0x13d   : > { %v1003_v54 = vmax.f32 %v804_v41, 0.0  ;;  %v718_v32 = vadd.f32 %v717_v45, %v6668_v24 }
 0x13e   : > { %v1004_v57 = vmax.f32 %v893_v42, 0.0  ;;  %1913 = vmatmul.bf16.gmra.mxu0 %v6724_v63  ;;  %2002 = vmatmul.bf16.gmra.mxu1 %v6726_v0 }
 0x13f   : > { %v6879_v62 = vpack.c.bf16 %v1003_v54, %v999_v46  ;;  %2091 = vmatmul.bf16.gmra.mxu2 %v6735_v18 }
 0x140   : > { %v6881_v58 = vpack.c.bf16 %v1004_v57, %v1000_v47  ;;  %2180 = vmatmul.bf16.gmra.mxu3 %v6737_v19  ;;  %v1005_v57 = vmax.f32 %v629_v14, 0.0  ;;  %v1006_v19 = vmax.f32 %v718_v32, 0.0 }
 0x142   : > { %v806_v35 = vpop.f32.mrf.mxu2 }
 0x143   : > { %v895_v41 = vpop.f32.mrf.mxu3  ;;  %v630_v42 = vpop.f32.mrf.mxu0  ;;  %v807_v5 = vadd.f32 %v806_v35, %v6676_v40 }
 0x144   : > { %v719_v46 = vpop.f32.mrf.mxu1  ;;  %v631_v47 = vadd.f32 %v630_v42, %v6666_v23  ;;  %v896_v12 = vadd.f32 %v895_v41, %v6680_v44 }
 0x145   : > { %v720_v54 = vadd.f32 %v719_v46, %v6668_v24 }
 0x146   : > { %v1009_v43 = vmax.f32 %v631_v47, 0.0  ;;  %v1007_v47 = vmax.f32 %v807_v5, 0.0 }
 0x147   : > { %v1010_v4 = vmax.f32 %v720_v54, 0.0  ;;  %v1008_v54 = vmax.f32 %v896_v12, 0.0 }
 0x148   : > { %v6889_v11 = vpack.c.bf16 %v1009_v43, %v1005_v57 }
 0x149   : > { %v6891_v45 = vpack.c.bf16 %v1010_v4, %v1006_v19 }
 0x14a   : > { %v808_v26 = vpop.f32.mrf.mxu2 }
 0x14b   : > { %v897_v31 = vpop.f32.mrf.mxu3  ;;  %v809_v42 = vadd.f32 %v808_v26, %v6676_v40  ;;  %v633_v46 = vpop.f32.mrf.mxu0 }
 0x14c   : > { %v898_v14 = vadd.f32 %v897_v31, %v6680_v44  ;;  %v722_v32 = vpop.f32.mrf.mxu1  ;;  %v634_v41 = vadd.f32 %v633_v46, %v6666_v23 }
 0x14d   : > { %v1011_v59 = vmax.f32 %v809_v42, 0.0  ;;  %v723_v1 = vadd.f32 %v722_v32, %v6668_v24 }
 0x14e   : > { %v1012_v57 = vmax.f32 %v898_v14, 0.0  ;;  %1918 = vmatmul.bf16.gmra.mxu0 %v6745_v36  ;;  %2007 = vmatmul.bf16.gmra.mxu1 %v6747_v37  ;;  %v1013_v31 = vmax.f32 %v634_v41, 0.0 }
 0x14f   : > { %v6899_v19 = vpack.c.bf16 %v1011_v59, %v1007_v47  ;;  %2096 = vmatmul.bf16.gmra.mxu2 %v6756_v55  ;;  %v1014_v42 = vmax.f32 %v723_v1, 0.0 }
 0x150   : > { %v6901_v35 = vpack.c.bf16 %v1012_v57, %v1008_v54  ;;  %2185 = vmatmul.bf16.gmra.mxu3 %v6758_v56 }
 0x152   : > { %8115 = vst [vmem:[#allocation31_spill] sm:$0xff] %v6901_v35  ;;  %v811_v43 = vpop.f32.mrf.mxu2 }
 0x153   : > { %v900_v4 = vpop.f32.mrf.mxu3  ;;  %v635_v8 = vpop.f32.mrf.mxu0  ;;  %v812_v46 = vadd.f32 %v811_v43, %v6676_v40 }
 0x154   : > { %v724_v5 = vpop.f32.mrf.mxu1  ;;  %v636_v12 = vadd.f32 %v635_v8, %v6666_v23  ;;  %v901_v32 = vadd.f32 %v900_v4, %v6680_v44  ;;  %v6157_v4 = vld [vmem:[#allocation3 + $0x284] sm:$0xf] }
 0x155   : > { %v725_v26 = vadd.f32 %v724_v5, %v6668_v24  ;;  %v1015_v41 = vmax.f32 %v812_v46, 0.0  ;;  %v6189_v46 = vld [vmem:[#allocation3 + $0x384] sm:$0xf] }
 0x156   : > { %v1017_v14 = vmax.f32 %v636_v12, 0.0  ;;  %v1016_v1 = vmax.f32 %v901_v32, 0.0 }
 0x157   : > { %v1018_v47 = vmax.f32 %v725_v26, 0.0 }
 0x158   : > { %v6909_v54 = vpack.c.bf16 %v1017_v14, %v1013_v31 }
 0x159   : > { %v6911_v59 = vpack.c.bf16 %v1018_v47, %v1014_v42  ;;  %v6093_v42 = vld [vmem:[#allocation3 + $0x84] sm:$0xf]  ;;  %v5359_v47 = vld [vmem:[#allocation3 + $0x90] sm:$0xf0] }
 0x15a   : > { %v813_v57 = vpop.f32.mrf.mxu2 }
 0x15b   : > { %v902_v56 = vpop.f32.mrf.mxu3  ;;  %v814_v55 = vadd.f32 %v813_v57, %v6676_v40  ;;  %v638_v37 = vpop.f32.mrf.mxu0  ;;  %v5362_v57 = vor.u32 %v6093_v42, %v5359_v47 }
 0x15c   : > { %v903_v8 = vadd.f32 %v902_v56, %v6680_v44  ;;  %v727_v5 = vpop.f32.mrf.mxu1  ;;  %v5615_v56 = vld [vmem:[#allocation3 + $0x290] sm:$0xf0]  ;;  %v639_v32 = vadd.f32 %v638_v37, %v6666_v23 }
 0x15d   : > { %v1019_v12 = vmax.f32 %v814_v55, 0.0  ;;  %v5618_v14 = vor.u32 %v6157_v4, %v5615_v56  ;;  %v5743_v55 = vld [vmem:[#allocation3 + $0x390] sm:$0xf0]  ;;  %2254 = vmatpush.bf16.msra.mxu0 %v5362_v57 }
 0x15e   : > { %v1020_v26 = vmax.f32 %v903_v8, 0.0  ;;  %1923 = vmatmul.bf16.gmra.mxu0 %v6766_v27  ;;  %2012 = vmatmul.bf16.gmra.mxu1 %v6768_v28  ;;  %v5746_v8 = vor.u32 %v6189_v46, %v5743_v55  ;;  %v1021_v56 = vmax.f32 %v639_v32, 0.0  ;;  %v6125_v28 = vld [vmem:[#allocation3 + $0x184] sm:$0xf]  ;;  %v5487_v27 = vld [vmem:[#allocation3 + $0x190] sm:$0xf0] }
 0x15f   : > { %v6919_v31 = vpack.c.bf16 %v1019_v12, %v1015_v41  ;;  %2101 = vmatmul.bf16.gmra.mxu2 %v6777_v48  ;;  %v728_v41 = vadd.f32 %v727_v5, %v6668_v24  ;;  %v5490_v47 = vor.u32 %v6125_v28, %v5487_v27 }
 0x160   : > { %v6921_v43 = vpack.c.bf16 %v1020_v26, %v1016_v1  ;;  %2190 = vmatmul.bf16.gmra.mxu3 %v6779_v49  ;;  %2432 = vmatpush.bf16.msra.mxu2 %v5618_v14 }
 0x161   : > { %2521 = vmatpush.bf16.msra.mxu3 %v5746_v8  ;;  %v1022_v36 = vmax.f32 %v728_v41, 0.0  ;;  %2343 = vmatpush.bf16.msra.mxu1 %v5490_v47 }
 0x162   : > { %v816_v12 = vpop.f32.mrf.mxu2 }
 0x163   : > { %v905_v1 = vpop.f32.mrf.mxu3  ;;  %v640_v26 = vpop.f32.mrf.mxu0  ;;  %v817_v14 = vadd.f32 %v816_v12, %v6676_v40 }
 0x164   : > { %v729_v48 = vpop.f32.mrf.mxu1  ;;  %v641_v49 = vadd.f32 %v640_v26, %v6666_v23  ;;  %v906_v55 = vadd.f32 %v905_v1, %v6680_v44 }
 0x165   : > { %v730_v4 = vadd.f32 %v729_v48, %v6668_v24 }
 0x166   : > { %v1025_v37 = vmax.f32 %v641_v49, 0.0  ;;  %v1023_v49 = vmax.f32 %v817_v14, 0.0 }
 0x167   : > { %v1026_v42 = vmax.f32 %v730_v4, 0.0  ;;  %v1024_v4 = vmax.f32 %v906_v55, 0.0 }
 0x168   : > { %v6929_v46 = vpack.c.bf16 %v1025_v37, %v1021_v56 }
 0x169   : > { %v6931_v5 = vpack.c.bf16 %v1026_v42, %v1022_v36 }
 0x16a   : > { %v818_v57 = vpop.f32.mrf.mxu2 }
 0x16b   : > { %v907_v8 = vpop.f32.mrf.mxu3  ;;  %v819_v48 = vadd.f32 %v818_v57, %v6676_v40  ;;  %v643_v26 = vpop.f32.mrf.mxu0 }
 0x16c   : > { %v908_v32 = vadd.f32 %v907_v8, %v6680_v44  ;;  %v732_v41 = vpop.f32.mrf.mxu1  ;;  %v644_v1 = vadd.f32 %v643_v26, %v6666_v23 }
 0x16d   : > { %v1027_v27 = vmax.f32 %v819_v48, 0.0  ;;  %v733_v56 = vadd.f32 %v732_v41, %v6668_v24 }
 0x16e   : > { %v1028_v28 = vmax.f32 %v908_v32, 0.0  ;;  %1928 = vmatmul.bf16.gmra.mxu0 %v6787_v6  ;;  %2017 = vmatmul.bf16.gmra.mxu1 %v6789_v7  ;;  %v1029_v8 = vmax.f32 %v644_v1, 0.0 }
 0x16f   : > { %v6939_v36 = vpack.c.bf16 %v1027_v27, %v1023_v49  ;;  %2106 = vmatmul.bf16.gmra.mxu2 %v6798_v29  ;;  %v1030_v48 = vmax.f32 %v733_v56, 0.0 }
 0x170   : > { %v6941_v12 = vpack.c.bf16 %v1028_v28, %v1024_v4  ;;  %2195 = vmatmul.bf16.gmra.mxu3 %v6800_v30 }
 0x172   : > { %v821_v37 = vpop.f32.mrf.mxu2 }
 0x173   : > { %v910_v42 = vpop.f32.mrf.mxu3  ;;  %v645_v47 = vpop.f32.mrf.mxu0  ;;  %v822_v26 = vadd.f32 %v821_v37, %v6676_v40 }
 0x174   : > { %v734_v14 = vpop.f32.mrf.mxu1  ;;  %v646_v55 = vadd.f32 %v645_v47, %v6666_v23  ;;  %v911_v41 = vadd.f32 %v910_v42, %v6680_v44  ;;  %v6153_v42 = vld [vmem:[#allocation3 + $0x264] sm:$0xf] }
 0x175   : > { %v735_v57 = vadd.f32 %v734_v14, %v6668_v24  ;;  %v1031_v1 = vmax.f32 %v822_v26, 0.0  ;;  %v6185_v26 = vld [vmem:[#allocation3 + $0x364] sm:$0xf] }
 0x176   : > { %v1033_v32 = vmax.f32 %v646_v55, 0.0  ;;  %v1032_v56 = vmax.f32 %v911_v41, 0.0 }
 0x177   : > { %v1034_v49 = vmax.f32 %v735_v57, 0.0 }
 0x178   : > { %v6949_v4 = vpack.c.bf16 %v1033_v32, %v1029_v8 }
 0x179   : > { %v6951_v27 = vpack.c.bf16 %v1034_v49, %v1030_v48  ;;  %v6089_v48 = vld [vmem:[#allocation3 + $0x64] sm:$0xf]  ;;  %v5343_v49 = vld [vmem:[#allocation3 + $0x70] sm:$0xf0] }
 0x17a   : > { %v823_v28 = vpop.f32.mrf.mxu2  ;;  %v5346_v41 = vor.u32 %v6089_v48, %v5343_v49  ;;  %v6121_v49 = vld [vmem:[#allocation3 + $0x164] sm:$0xf] }
 0x17b   : > { %v912_v30 = vpop.f32.mrf.mxu3  ;;  %v824_v29 = vadd.f32 %v823_v28, %v6676_v40  ;;  %v648_v7 = vpop.f32.mrf.mxu0 }
 0x17c   : > { %v913_v47 = vadd.f32 %v912_v30, %v6680_v44  ;;  %v737_v14 = vpop.f32.mrf.mxu1  ;;  %v5599_v30 = vld [vmem:[#allocation3 + $0x270] sm:$0xf0]  ;;  %2255 = vmatpush.bf16.msra.mxu0 %v5346_v41 }
 0x17d   : > { %v1035_v55 = vmax.f32 %v824_v29, 0.0  ;;  %v5602_v32 = vor.u32 %v6153_v42, %v5599_v30  ;;  %v5727_v29 = vld [vmem:[#allocation3 + $0x370] sm:$0xf0] }
 0x17e   : > { %v1036_v57 = vmax.f32 %v913_v47, 0.0  ;;  %1933 = vmatmul.bf16.gmra.mxu0 %v6808_v9  ;;  %2022 = vmatmul.bf16.gmra.mxu1 %v6810_v10  ;;  %v5730_v28 = vor.u32 %v6185_v26, %v5727_v29  ;;  %v649_v47 = vadd.f32 %v648_v7, %v6666_v23  ;;  %v5471_v26 = vld [vmem:[#allocation3 + $0x170] sm:$0xf0] }
 0x17f   : > { %v6959_v8 = vpack.c.bf16 %v1035_v55, %v1031_v1  ;;  %2111 = vmatmul.bf16.gmra.mxu2 %v6819_v38  ;;  %v738_v1 = vadd.f32 %v737_v14, %v6668_v24  ;;  %v5474_v29 = vor.u32 %v6121_v49, %v5471_v26 }
 0x180   : > { %v6961_v37 = vpack.c.bf16 %v1036_v57, %v1032_v56  ;;  %2200 = vmatmul.bf16.gmra.mxu3 %v6821_v39  ;;  %2433 = vmatpush.bf16.msra.mxu2 %v5602_v32  ;;  %v1037_v30 = vmax.f32 %v649_v47, 0.0 }
 0x181   : > { %2522 = vmatpush.bf16.msra.mxu3 %v5730_v28  ;;  %v1038_v10 = vmax.f32 %v738_v1, 0.0  ;;  %2344 = vmatpush.bf16.msra.mxu1 %v5474_v29 }
 0x182   : > { %v826_v55 = vpop.f32.mrf.mxu2 }
 0x183   : > { %v915_v56 = vpop.f32.mrf.mxu3  ;;  %v650_v57 = vpop.f32.mrf.mxu0  ;;  %v827_v32 = vadd.f32 %v826_v55, %v6676_v40 }
 0x184   : > { %v739_v38 = vpop.f32.mrf.mxu1  ;;  %v651_v39 = vadd.f32 %v650_v57, %v6666_v23  ;;  %v916_v41 = vadd.f32 %v915_v56, %v6680_v44 }
 0x185   : > { %v740_v42 = vadd.f32 %v739_v38, %v6668_v24  ;;  %v1039_v57 = vmax.f32 %v827_v32, 0.0 }
 0x186   : > { %v1041_v9 = vmax.f32 %v651_v39, 0.0 }
 0x187   : > { %v1042_v48 = vmax.f32 %v740_v42, 0.0  ;;  %v1040_v42 = vmax.f32 %v916_v41, 0.0 }
 0x188   : > { %v6969_v7 = vpack.c.bf16 %v1041_v9, %v1037_v30 }
 0x189   : > { %v6971_v14 = vpack.c.bf16 %v1042_v48, %v1038_v10 }
 0x18a   : > { %v828_v28 = vpop.f32.mrf.mxu2 }
 0x18b   : > { %v917_v6 = vpop.f32.mrf.mxu3  ;;  %v829_v38 = vadd.f32 %v828_v28, %v6676_v40  ;;  %v653_v39 = vpop.f32.mrf.mxu0  ;;  %v6992_v28 = vld [vmem:[%s7981_s4] sm:$0xf] }
 0x18c   : > { %v918_v47 = vadd.f32 %v917_v6, %v6680_v44  ;;  %v742_v1 = vpop.f32.mrf.mxu1  ;;  %v654_v6 = vadd.f32 %v653_v39, %v6666_v23  ;;  %8116 = vst [vmem:[#allocation32_spill] sm:$0xff] %v6992_v28 }
 0x18d   : > { %v1043_v9 = vmax.f32 %v829_v38, 0.0  ;;  %v743_v56 = vadd.f32 %v742_v1, %v6668_v24 }
 0x18e   : > { %v1044_v30 = vmax.f32 %v918_v47, 0.0  ;;  %1938 = vmatmul.bf16.gmra.mxu0 %v6829_v60  ;;  %2027 = vmatmul.bf16.gmra.mxu1 %v6831_v61  ;;  %v1045_v38 = vmax.f32 %v654_v6, 0.0 }
 0x18f   : > { %v6979_v10 = vpack.c.bf16 %v1043_v9, %v1039_v57  ;;  %2116 = vmatmul.bf16.gmra.mxu2 %v6839_v22  ;;  %v1046_v47 = vmax.f32 %v743_v56, 0.0  ;;  %v6999_v9 = vperm.slane %v6992_v28, 0 }
 0x190   : > { %v6981_v55 = vpack.c.bf16 %v1044_v30, %v1040_v42  ;;  %2205 = vmatmul.bf16.gmra.mxu3 %v6841_v25 }
 0x192   : > { %v831_v48 = vpop.f32.mrf.mxu2 }
 0x193   : > { %v920_v49 = vpop.f32.mrf.mxu3  ;;  %v655_v26 = vpop.f32.mrf.mxu0 }
 0x194   : > { %v744_v29 = vpop.f32.mrf.mxu1  ;;  %v656_v32 = vadd.f32 %v655_v26, %v6666_v23  ;;  %v832_v23 = vadd.f32 %v831_v48, %v6676_v40 }
 0x195   : > { %v745_v41 = vadd.f32 %v744_v29, %v6668_v24  ;;  %v921_v24 = vadd.f32 %v920_v49, %v6680_v44 }
 0x196   : > { %v1049_v57 = vmax.f32 %v656_v32, 0.0 }
 0x197   : > { %v1050_v42 = vmax.f32 %v745_v41, 0.0 }
 0x198   : > { %v6994_v39 = vpack.c.bf16 %v1049_v57, %v1045_v38  ;;  %v1047_v38 = vmax.f32 %v832_v23, 0.0 }
 0x199   : > { %v6996_v1 = vpack.c.bf16 %v1050_v42, %v1046_v47  ;;  %v1048_v47 = vmax.f32 %v921_v24, 0.0  ;;  %v5327_v24 = vld [vmem:[#allocation3 + $0x50] sm:$0xf0] }
 0x19a   : > { %v833_v30 = vpop.f32.mrf.mxu2 }
 0x19b   : > { %v922_v26 = vpop.f32.mrf.mxu3  ;;  %v834_v29 = vadd.f32 %v833_v30, %v6676_v40  ;;  %v1904_v56 = vpop.f32.mrf.mxu0  ;;  %v6149_v40 = vld [vmem:[#allocation3 + $0x244] sm:$0xf] }
 0x19c   : > { %v923_v6 = vadd.f32 %v922_v26, %v6680_v44  ;;  %v1993_v32 = vpop.f32.mrf.mxu1  ;;  %v1905_v41 = vadd.f32 %v1904_v56, %v6999_v9  ;;  %v5583_v44 = vld [vmem:[#allocation3 + $0x250] sm:$0xf0]  ;;  %v6085_v30 = vld [vmem:[#allocation3 + $0x44] sm:$0xf] }
 0x19d   : > { %v1051_v57 = vmax.f32 %v834_v29, 0.0  ;;  %v5586_v23 = vor.u32 %v6149_v40, %v5583_v44  ;;  %v6181_v26 = vld [vmem:[#allocation3 + $0x344] sm:$0xf]  ;;  %v5711_v29 = vld [vmem:[#allocation3 + $0x350] sm:$0xf0] }
 0x19e   : > { %v1052_v42 = vmax.f32 %v923_v6, 0.0  ;;  %v1994_v28 = vadd.f32 %v1993_v32, %v1905_v41  ;;  %1943 = vmatmul.bf16.gmra.mxu0 %v6849_v15  ;;  %2032 = vmatmul.bf16.gmra.mxu1 %v6851_v13  ;;  %v5330_v6 = vor.u32 %v6085_v30, %v5327_v24  ;;  %v5714_v56 = vor.u32 %v6181_v26, %v5711_v29  ;;  %v6117_v13 = vld [vmem:[#allocation3 + $0x144] sm:$0xf]  ;;  %v5455_v15 = vld [vmem:[#allocation3 + $0x150] sm:$0xf0] }
 0x19f   : > { %v7008_v48 = vpack.c.bf16 %v1051_v57, %v1047_v38  ;;  %2121 = vmatmul.bf16.gmra.mxu2 %v6859_v50  ;;  %v5458_v40 = vor.u32 %v6117_v13, %v5455_v15 }
 0x1a0   : > { %v7010_v49 = vpack.c.bf16 %v1052_v42, %v1048_v47  ;;  %2210 = vmatmul.bf16.gmra.mxu3 %v6861_v53  ;;  %2434 = vmatpush.bf16.msra.mxu2 %v5586_v23 }
 0x1a1   : > { %2256 = vmatpush.bf16.msra.mxu0 %v5330_v6  ;;  %2523 = vmatpush.bf16.msra.mxu3 %v5714_v56 }
 0x1a2   : > { %v2082_v32 = vpop.f32.mrf.mxu2  ;;  %2345 = vmatpush.bf16.msra.mxu1 %v5458_v40 }
 0x1a3   : > { %v2171_v41 = vpop.f32.mrf.mxu3  ;;  %v2083_v38 = vadd.f32 %v2082_v32, %v1994_v28  ;;  %v1906_v57 = vpop.f32.mrf.mxu0 }
 0x1a4   : > { %v1995_v47 = vpop.f32.mrf.mxu1  ;;  %v1907_v42 = vadd.f32 %v1906_v57, %v6999_v9 }
 0x1a5   : > { %v2172_v53 = vadd.f32 %v2171_v41, %v2083_v38 }
 0x1a6   : > { %v1996_v50 = vadd.f32 %v1995_v47, %v1907_v42 }
 0x1a7   : > { %v3319_v6 = vmax.f32 %v2172_v53, 0.0 }
 0x1aa   : > { %v2084_v44 = vpop.f32.mrf.mxu2 }
 0x1ab   : > { %v2173_v25 = vpop.f32.mrf.mxu3  ;;  %v2085_v30 = vadd.f32 %v2084_v44, %v1996_v50  ;;  %v1909_v24 = vpop.f32.mrf.mxu0 }
 0x1ac   : > { %v1998_v26 = vpop.f32.mrf.mxu1  ;;  %v1910_v23 = vadd.f32 %v1909_v24, %v6999_v9 }
 0x1ad   : > { %v2174_v28 = vadd.f32 %v2173_v25, %v2085_v30 }
 0x1ae   : > { %v1999_v29 = vadd.f32 %v1998_v26, %v1910_v23  ;;  %1948 = vmatmul.bf16.gmra.mxu0 %v6869_v20  ;;  %2037 = vmatmul.bf16.gmra.mxu1 %v6871_v21 }
 0x1af   : > { %v3323_v56 = vmax.f32 %v2174_v28, 0.0  ;;  %2126 = vmatmul.bf16.gmra.mxu2 %v6879_v62 }
 0x1b0   : > { %2215 = vmatmul.bf16.gmra.mxu3 %v6881_v58 }
 0x1b1   : > { %v7020_v15 = vpack.c.bf16 %v3323_v56, %v3319_v6  ;;  %v6145_v6 = vld [vmem:[#allocation3 + $0x224] sm:$0xf]  ;;  %v5567_v56 = vld [vmem:[#allocation3 + $0x230] sm:$0xf0] }
 0x1b2   : > { %v2087_v13 = vpop.f32.mrf.mxu2 }
 0x1b3   : > { %8117 = vst [vmem:[#allocation33_spill] sm:$0xff] %v7020_v15  ;;  %v2176_v50 = vpop.f32.mrf.mxu3  ;;  %v2088_v32 = vadd.f32 %v2087_v13, %v1999_v29  ;;  %v1911_v41 = vpop.f32.mrf.mxu0  ;;  %v5570_v13 = vor.u32 %v6145_v6, %v5567_v56  ;;  %v6113_v56 = vld [vmem:[#allocation3 + $0x124] sm:$0xf]  ;;  %v5439_v15 = vld [vmem:[#allocation3 + $0x130] sm:$0xf0] }
 0x1b4   : > { %v2000_v38 = vpop.f32.mrf.mxu1  ;;  %v1912_v25 = vadd.f32 %v1911_v41, %v6999_v9  ;;  %v6177_v41 = vld [vmem:[#allocation3 + $0x324] sm:$0xf] }
 0x1b5   : > { %v2177_v57 = vadd.f32 %v2176_v50, %v2088_v32  ;;  %v6081_v50 = vld [vmem:[#allocation3 + $0x24] sm:$0xf]  ;;  %v5311_v32 = vld [vmem:[#allocation3 + $0x30] sm:$0xf0]  ;;  %2435 = vmatpush.bf16.msra.mxu2 %v5570_v13 }
 0x1b6   : > { %v2001_v47 = vadd.f32 %v2000_v38, %v1912_v25  ;;  %v5314_v38 = vor.u32 %v6081_v50, %v5311_v32  ;;  %v5695_v25 = vld [vmem:[#allocation3 + $0x330] sm:$0xf0] }
 0x1b7   : > { %v3327_v28 = vmax.f32 %v2177_v57, 0.0 }
 0x1b8   : > { %2257 = vmatpush.bf16.msra.mxu0 %v5314_v38 }
 0x1ba   : > { %v2089_v42 = vpop.f32.mrf.mxu2 }
 0x1bb   : > { %v2178_v40 = vpop.f32.mrf.mxu3  ;;  %v2090_v44 = vadd.f32 %v2089_v42, %v2001_v47  ;;  %v1914_v53 = vpop.f32.mrf.mxu0 }
 0x1bc   : > { %v2003_v30 = vpop.f32.mrf.mxu1  ;;  %v1915_v24 = vadd.f32 %v1914_v53, %v6999_v9 }
 0x1bd   : > { %v2179_v26 = vadd.f32 %v2178_v40, %v2090_v44  ;;  %v5698_v44 = vor.u32 %v6177_v41, %v5695_v25 }
 0x1be   : > { %v2004_v23 = vadd.f32 %v2003_v30, %v1915_v24  ;;  %1953 = vmatmul.bf16.gmra.mxu0 %v6889_v11  ;;  %2042 = vmatmul.bf16.gmra.mxu1 %v6891_v45 }
 0x1bf   : > { %v3331_v29 = vmax.f32 %v2179_v26, 0.0  ;;  %2131 = vmatmul.bf16.gmra.mxu2 %v6899_v19  ;;  %2524 = vmatpush.bf16.msra.mxu3 %v5698_v44 }
 0x1c0   : > { %2220 = vmatmul.bf16.gmra.mxu3 %v6901_v35  ;;  %v5442_v35 = vor.u32 %v6113_v56, %v5439_v15 }
 0x1c1   : > { %v7028_v47 = vpack.c.bf16 %v3331_v29, %v3327_v28 }
 0x1c2   : > { %v2092_v42 = vpop.f32.mrf.mxu2  ;;  %2346 = vmatpush.bf16.msra.mxu1 %v5442_v35 }
 0x1c3   : > { %8118 = vst [vmem:[#allocation34_spill] sm:$0xff] %v7028_v47  ;;  %v2181_v40 = vpop.f32.mrf.mxu3  ;;  %v2093_v57 = vadd.f32 %v2092_v42, %v2004_v23  ;;  %v1916_v53 = vpop.f32.mrf.mxu0 }
 0x1c4   : > { %v2005_v30 = vpop.f32.mrf.mxu1  ;;  %v1917_v24 = vadd.f32 %v1916_v53, %v6999_v9 }
 0x1c5   : > { %v2182_v26 = vadd.f32 %v2181_v40, %v2093_v57 }
 0x1c6   : > { %v2006_v6 = vadd.f32 %v2005_v30, %v1917_v24 }
 0x1c7   : > { %v3335_v38 = vmax.f32 %v2182_v26, 0.0 }
 0x1ca   : > { %v2094_v50 = vpop.f32.mrf.mxu2 }
 0x1cb   : > { %v2183_v32 = vpop.f32.mrf.mxu3  ;;  %v2095_v28 = vadd.f32 %v2094_v50, %v2006_v6  ;;  %v1919_v29 = vpop.f32.mrf.mxu0 }
 0x1cc   : > { %v2008_v47 = vpop.f32.mrf.mxu1  ;;  %v1920_v13 = vadd.f32 %v1919_v29, %v6999_v9 }
 0x1cd   : > { %v2184_v23 = vadd.f32 %v2183_v32, %v2095_v28 }
 0x1ce   : > { %v2009_v41 = vadd.f32 %v2008_v47, %v1920_v13  ;;  %1958 = vmatmul.bf16.gmra.mxu0 %v6909_v54  ;;  %2047 = vmatmul.bf16.gmra.mxu1 %v6911_v59 }
 0x1cf   : > { %v3339_v25 = vmax.f32 %v2184_v23, 0.0  ;;  %2136 = vmatmul.bf16.gmra.mxu2 %v6919_v31 }
 0x1d0   : > { %2225 = vmatmul.bf16.gmra.mxu3 %v6921_v43 }
 0x1d1   : > { %v7036_v15 = vpack.c.bf16 %v3339_v25, %v3335_v38  ;;  %v5551_v38 = vld [vmem:[#allocation3 + $0x210] sm:$0xf0] }
 0x1d2   : > { %v2097_v35 = vpop.f32.mrf.mxu2 }
 0x1d3   : > { %8119 = vst [vmem:[#allocation35_spill] sm:$0xff] %v7036_v15  ;;  %v2186_v42 = vpop.f32.mrf.mxu3  ;;  %v2098_v40 = vadd.f32 %v2097_v35, %v2009_v41  ;;  %v1921_v44 = vpop.f32.mrf.mxu0  ;;  %v6141_v41 = vld [vmem:[#allocation3 + $0x204] sm:$0xf] }
 0x1d4   : > { %v2010_v57 = vpop.f32.mrf.mxu1  ;;  %v1922_v53 = vadd.f32 %v1921_v44, %v6999_v9  ;;  %v5554_v25 = vor.u32 %v6141_v41, %v5551_v38  ;;  %v6077_v35 = vld [vmem:[#allocation3 + $0x4] sm:$0xf]  ;;  %v5423_v38 = vld [vmem:[#allocation3 + $0x110] sm:$0xf0] }
 0x1d5   : > { %v2187_v47 = vadd.f32 %v2186_v42, %v2098_v40  ;;  %v5295_v42 = vld [vmem:[#allocation3 + $0x10] sm:$0xf0]  ;;  %v6173_v40 = vld [vmem:[#allocation3 + $0x304] sm:$0xf] }
 0x1d6   : > { %v2011_v30 = vadd.f32 %v2010_v57, %v1922_v53  ;;  %v5298_v44 = vor.u32 %v6077_v35, %v5295_v42  ;;  %v5679_v57 = vld [vmem:[#allocation3 + $0x310] sm:$0xf0]  ;;  %2436 = vmatpush.bf16.msra.mxu2 %v5554_v25  ;;  %v6109_v41 = vld [vmem:[#allocation3 + $0x104] sm:$0xf] }
 0x1d7   : > { %v3343_v13 = vmax.f32 %v2187_v47, 0.0  ;;  %v5426_v15 = vor.u32 %v6109_v41, %v5423_v38 }
 0x1d8   : > { %2258 = vmatpush.bf16.msra.mxu0 %v5298_v44 }
 0x1d9   : > { %2347 = vmatpush.bf16.msra.mxu1 %v5426_v15 }
 0x1da   : > { %v2099_v24 = vpop.f32.mrf.mxu2 }
 0x1db   : > { %v2188_v6 = vpop.f32.mrf.mxu3  ;;  %v2100_v56 = vadd.f32 %v2099_v24, %v2011_v30  ;;  %v1924_v26 = vpop.f32.mrf.mxu0 }
 0x1dc   : > { %v2013_v50 = vpop.f32.mrf.mxu1  ;;  %v1925_v32 = vadd.f32 %v1924_v26, %v6999_v9 }
 0x1dd   : > { %v2189_v28 = vadd.f32 %v2188_v6, %v2100_v56  ;;  %v5682_v6 = vor.u32 %v6173_v40, %v5679_v57 }
 0x1de   : > { %v2014_v29 = vadd.f32 %v2013_v50, %v1925_v32  ;;  %1963 = vmatmul.bf16.gmra.mxu0 %v6929_v46  ;;  %2052 = vmatmul.bf16.gmra.mxu1 %v6931_v5 }
 0x1df   : > { %v3347_v23 = vmax.f32 %v2189_v28, 0.0  ;;  %2141 = vmatmul.bf16.gmra.mxu2 %v6939_v36  ;;  %2525 = vmatpush.bf16.msra.mxu3 %v5682_v6 }
 0x1e0   : > { %2230 = vmatmul.bf16.gmra.mxu3 %v6941_v12 }
 0x1e1   : > { %v7044_v53 = vpack.c.bf16 %v3347_v23, %v3343_v13 }
 0x1e2   : > { %v2102_v30 = vpop.f32.mrf.mxu2 }
 0x1e3   : > { %8120 = vst [vmem:[#allocation36_spill] sm:$0xff] %v7044_v53  ;;  %v2191_v24 = vpop.f32.mrf.mxu3  ;;  %v2103_v47 = vadd.f32 %v2102_v30, %v2014_v29  ;;  %v1926_v56 = vpop.f32.mrf.mxu0 }
 0x1e4   : > { %v2015_v26 = vpop.f32.mrf.mxu1  ;;  %v1927_v50 = vadd.f32 %v1926_v56, %v6999_v9 }
 0x1e5   : > { %v2192_v32 = vadd.f32 %v2191_v24, %v2103_v47 }
 0x1e6   : > { %v2016_v28 = vadd.f32 %v2015_v26, %v1927_v50 }
 0x1e7   : > { %v3351_v44 = vmax.f32 %v2192_v32, 0.0 }
 0x1ea   : > { %v2104_v35 = vpop.f32.mrf.mxu2 }
 0x1eb   : > { %v2193_v42 = vpop.f32.mrf.mxu3  ;;  %v2105_v13 = vadd.f32 %v2104_v35, %v2016_v28  ;;  %v1929_v23 = vpop.f32.mrf.mxu0 }
 0x1ec   : > { %v2018_v53 = vpop.f32.mrf.mxu1  ;;  %v1930_v25 = vadd.f32 %v1929_v23, %v6999_v9 }
 0x1ed   : > { %v2194_v29 = vadd.f32 %v2193_v42, %v2105_v13 }
 0x1ee   : > { %v2019_v40 = vadd.f32 %v2018_v53, %v1930_v25  ;;  %1968 = vmatmul.bf16.gmra.mxu0 %v6949_v4  ;;  %2057 = vmatmul.bf16.gmra.mxu1 %v6951_v27 }
 0x1ef   : > { %v3355_v57 = vmax.f32 %v2194_v29, 0.0  ;;  %2146 = vmatmul.bf16.gmra.mxu2 %v6959_v8 }
 0x1f0   : > { %2235 = vmatmul.bf16.gmra.mxu3 %v6961_v37 }
 0x1f1   : > { %v7052_v30 = vpack.c.bf16 %v3355_v57, %v3351_v44  ;;  %v6172_v44 = vld [vmem:[#allocation3 + $0x2f4] sm:$0xf0] }
 0x1f2   : > { %v2107_v15 = vpop.f32.mrf.mxu2 }
 0x1f3   : > { %8121 = vst [vmem:[#allocation37_spill] sm:$0xff] %v7052_v30  ;;  %v2196_v24 = vpop.f32.mrf.mxu3  ;;  %v2108_v6 = vadd.f32 %v2107_v15, %v2019_v40  ;;  %v1931_v47 = vpop.f32.mrf.mxu0  ;;  %v5669_v40 = vld [vmem:[#allocation3 + $0x2e8] sm:$0xf] }
 0x1f4   : > { %v2020_v56 = vpop.f32.mrf.mxu1  ;;  %v1932_v26 = vadd.f32 %v1931_v47, %v6999_v9  ;;  %v5670_v57 = vor.u32 %v6172_v44, %v5669_v40  ;;  %v5413_v15 = vld [vmem:[#allocation3 + $0xe8] sm:$0xf]  ;;  %v6140_v44 = vld [vmem:[#allocation3 + $0x1f4] sm:$0xf0] }
 0x1f5   : > { %v2197_v53 = vadd.f32 %v2196_v24, %v2108_v6  ;;  %v6108_v24 = vld [vmem:[#allocation3 + $0xf4] sm:$0xf0]  ;;  %v5797_v6 = vld [vmem:[#allocation3 + $0x3e8] sm:$0xf] }
 0x1f6   : > { %v2021_v50 = vadd.f32 %v2020_v56, %v1932_v26  ;;  %v5414_v47 = vor.u32 %v6108_v24, %v5413_v15  ;;  %v6204_v56 = vld [vmem:[#allocation3 + $0x3f4] sm:$0xf0]  ;;  %2785 = vmatpush.bf16.msrb.mxu2 %v5670_v57  ;;  %v5541_v40 = vld [vmem:[#allocation3 + $0x1e8] sm:$0xf] }
 0x1f7   : > { %v3359_v25 = vmax.f32 %v2197_v53, 0.0  ;;  %v5542_v30 = vor.u32 %v6140_v44, %v5541_v40 }
 0x1f8   : > { %2607 = vmatpush.bf16.msrb.mxu0 %v5414_v47 }
 0x1f9   : > { %2696 = vmatpush.bf16.msrb.mxu1 %v5542_v30 }
 0x1fa   : > { %v2109_v28 = vpop.f32.mrf.mxu2 }
 0x1fb   : > { %v2198_v41 = vpop.f32.mrf.mxu3  ;;  %v2110_v38 = vadd.f32 %v2109_v28, %v2021_v50  ;;  %v1934_v32 = vpop.f32.mrf.mxu0 }
 0x1fc   : > { %v2023_v35 = vpop.f32.mrf.mxu1  ;;  %v1935_v42 = vadd.f32 %v1934_v32, %v6999_v9 }
 0x1fd   : > { %v2199_v13 = vadd.f32 %v2198_v41, %v2110_v38  ;;  %v5798_v41 = vor.u32 %v6204_v56, %v5797_v6 }
 0x1fe   : > { %v2024_v23 = vadd.f32 %v2023_v35, %v1935_v42  ;;  %1973 = vmatmul.bf16.gmra.mxu0 %v6969_v7  ;;  %2062 = vmatmul.bf16.gmra.mxu1 %v6971_v14 }
 0x1ff   : > { %v3363_v29 = vmax.f32 %v2199_v13, 0.0  ;;  %2151 = vmatmul.bf16.gmra.mxu2 %v6979_v10  ;;  %2874 = vmatpush.bf16.msrb.mxu3 %v5798_v41 }
 0x200   : > { %2240 = vmatmul.bf16.gmra.mxu3 %v6981_v55 }
 0x201   : > { %v7060_v26 = vpack.c.bf16 %v3363_v29, %v3359_v25 }
 0x202   : > { %v2112_v50 = vpop.f32.mrf.mxu2 }
 0x203   : > { %8122 = vst [vmem:[#allocation38_spill] sm:$0xff] %v7060_v26  ;;  %v2201_v28 = vpop.f32.mrf.mxu3  ;;  %v2113_v53 = vadd.f32 %v2112_v50, %v2024_v23  ;;  %v1936_v38 = vpop.f32.mrf.mxu0 }
 0x204   : > { %v2025_v32 = vpop.f32.mrf.mxu1  ;;  %v1937_v35 = vadd.f32 %v1936_v38, %v6999_v9 }
 0x205   : > { %v2202_v42 = vadd.f32 %v2201_v28, %v2113_v53 }
 0x206   : > { %v2026_v13 = vadd.f32 %v2025_v32, %v1937_v35 }
 0x207   : > { %v3367_v47 = vmax.f32 %v2202_v42, 0.0 }
 0x20a   : > { %v2114_v15 = vpop.f32.mrf.mxu2 }
 0x20b   : > { %v2203_v24 = vpop.f32.mrf.mxu3  ;;  %v2115_v25 = vadd.f32 %v2114_v15, %v2026_v13  ;;  %v1939_v29 = vpop.f32.mrf.mxu0 }
 0x20c   : > { %v2028_v26 = vpop.f32.mrf.mxu1  ;;  %v1940_v57 = vadd.f32 %v1939_v29, %v6999_v9 }
 0x20d   : > { %v2204_v23 = vadd.f32 %v2203_v24, %v2115_v25 }
 0x20e   : > { %v2029_v6 = vadd.f32 %v2028_v26, %v1940_v57  ;;  %1978 = vmatmul.bf16.gmra.mxu0 %v6994_v39  ;;  %2067 = vmatmul.bf16.gmra.mxu1 %v6996_v1 }
 0x20f   : > { %v3371_v56 = vmax.f32 %v2204_v23, 0.0  ;;  %2156 = vmatmul.bf16.gmra.mxu2 %v7008_v48 }
 0x210   : > { %2245 = vmatmul.bf16.gmra.mxu3 %v7010_v49 }
 0x211   : > { %v7068_v50 = vpack.c.bf16 %v3371_v56, %v3367_v47  ;;  %v6168_v47 = vld [vmem:[#allocation3 + $0x2d4] sm:$0xf0] }
 0x212   : > { %v2117_v30 = vpop.f32.mrf.mxu2 }
 0x213   : > { %8123 = vst [vmem:[#allocation39_spill] sm:$0xff] %v7068_v50  ;;  %v2206_v28 = vpop.f32.mrf.mxu3  ;;  %v2118_v41 = vadd.f32 %v2117_v30, %v2029_v6  ;;  %v1941_v53 = vpop.f32.mrf.mxu0  ;;  %v5653_v6 = vld [vmem:[#allocation3 + $0x2c8] sm:$0xf] }
 0x214   : > { %v2030_v38 = vpop.f32.mrf.mxu1  ;;  %v1942_v32 = vadd.f32 %v1941_v53, %v6999_v9  ;;  %v5654_v56 = vor.u32 %v6168_v47, %v5653_v6  ;;  %v5397_v30 = vld [vmem:[#allocation3 + $0xc8] sm:$0xf]  ;;  %v6136_v47 = vld [vmem:[#allocation3 + $0x1d4] sm:$0xf0] }
 0x215   : > { %v2207_v26 = vadd.f32 %v2206_v28, %v2118_v41  ;;  %v6104_v28 = vld [vmem:[#allocation3 + $0xd4] sm:$0xf0]  ;;  %v5781_v41 = vld [vmem:[#allocation3 + $0x3c8] sm:$0xf] }
 0x216   : > { %v2031_v35 = vadd.f32 %v2030_v38, %v1942_v32  ;;  %v5398_v53 = vor.u32 %v6104_v28, %v5397_v30  ;;  %v6200_v38 = vld [vmem:[#allocation3 + $0x3d4] sm:$0xf0]  ;;  %2786 = vmatpush.bf16.msrb.mxu2 %v5654_v56  ;;  %v5525_v6 = vld [vmem:[#allocation3 + $0x1c8] sm:$0xf] }
 0x217   : > { %v3375_v57 = vmax.f32 %v2207_v26, 0.0  ;;  %v5526_v50 = vor.u32 %v6136_v47, %v5525_v6 }
 0x218   : > { %2608 = vmatpush.bf16.msrb.mxu0 %v5398_v53 }
 0x219   : > { %2697 = vmatpush.bf16.msrb.mxu1 %v5526_v50 }
 0x21a   : > { %v2119_v13 = vpop.f32.mrf.mxu2 }
 0x21b   : > { %v2208_v40 = vpop.f32.mrf.mxu3  ;;  %v2120_v44 = vadd.f32 %v2119_v13, %v2031_v35  ;;  %v1944_v42 = vpop.f32.mrf.mxu0 }
 0x21c   : > { %v2033_v15 = vpop.f32.mrf.mxu1  ;;  %v1945_v24 = vadd.f32 %v1944_v42, %v6999_v9 }
 0x21d   : > { %v2209_v25 = vadd.f32 %v2208_v40, %v2120_v44  ;;  %v5782_v40 = vor.u32 %v6200_v38, %v5781_v41 }
 0x21e   : > { %v2034_v29 = vadd.f32 %v2033_v15, %v1945_v24  ;;  %2259 = vmatmul.bf16.vlgmr.msra.gmra.mxu0 %v6682_v51  ;;  %2348 = vmatmul.bf16.vlgmr.msra.gmra.mxu1 %v6684_v52 }
 0x21f   : > { %v3379_v23 = vmax.f32 %v2209_v25, 0.0  ;;  %2437 = vmatmul.bf16.vlgmr.msra.gmra.mxu2 %v6693_v2  ;;  %2875 = vmatpush.bf16.msrb.mxu3 %v5782_v40 }
 0x220   : > { %2526 = vmatmul.bf16.vlgmr.msra.gmra.mxu3 %v6695_v3 }
 0x221   : > { %v7076_v32 = vpack.c.bf16 %v3379_v23, %v3375_v57 }
 0x222   : > { %v2122_v35 = vpop.f32.mrf.mxu2 }
 0x223   : > { %8124 = vst [vmem:[#allocation40_spill] sm:$0xff] %v7076_v32  ;;  %v2211_v13 = vpop.f32.mrf.mxu3  ;;  %v2123_v26 = vadd.f32 %v2122_v35, %v2034_v29  ;;  %v1946_v44 = vpop.f32.mrf.mxu0 }
 0x224   : > { %v2035_v42 = vpop.f32.mrf.mxu1  ;;  %v1947_v15 = vadd.f32 %v1946_v44, %v6999_v9 }
 0x225   : > { %v2212_v24 = vadd.f32 %v2211_v13, %v2123_v26 }
 0x226   : > { %v2036_v25 = vadd.f32 %v2035_v42, %v1947_v15 }
 0x227   : > { %v3383_v53 = vmax.f32 %v2212_v24, 0.0 }
 0x22a   : > { %v2124_v30 = vpop.f32.mrf.mxu2 }
 0x22b   : > { %v2213_v28 = vpop.f32.mrf.mxu3  ;;  %v2125_v57 = vadd.f32 %v2124_v30, %v2036_v25  ;;  %v1949_v23 = vpop.f32.mrf.mxu0 }
 0x22c   : > { %v2038_v32 = vpop.f32.mrf.mxu1  ;;  %v1950_v56 = vadd.f32 %v1949_v23, %v6999_v9 }
 0x22d   : > { %v2214_v29 = vadd.f32 %v2213_v28, %v2125_v57 }
 0x22e   : > { %v2039_v41 = vadd.f32 %v2038_v32, %v1950_v56  ;;  %2264 = vmatmul.bf16.gmra.mxu0 %v6703_v16  ;;  %2353 = vmatmul.bf16.gmra.mxu1 %v6705_v17 }
 0x22f   : > { %v3387_v38 = vmax.f32 %v2214_v29, 0.0  ;;  %2442 = vmatmul.bf16.gmra.mxu2 %v6714_v33 }
 0x230   : > { %2531 = vmatmul.bf16.gmra.mxu3 %v6716_v34 }
 0x231   : > { %v7084_v35 = vpack.c.bf16 %v3387_v38, %v3383_v53  ;;  %v5637_v53 = vld [vmem:[#allocation3 + $0x2a8] sm:$0xf]  ;;  %v6164_v38 = vld [vmem:[#allocation3 + $0x2b4] sm:$0xf0] }
 0x232   : > { %v2127_v50 = vpop.f32.mrf.mxu2 }
 0x233   : > { %8125 = vst [vmem:[#allocation41_spill] sm:$0xff] %v7084_v35  ;;  %v2216_v13 = vpop.f32.mrf.mxu3  ;;  %v2128_v40 = vadd.f32 %v2127_v50, %v2039_v41  ;;  %v1951_v26 = vpop.f32.mrf.mxu0  ;;  %v8126_v41 = vld [vmem:[#allocation9_spill] sm:$0xff]  ;;  %v5638_v50 = vor.u32 %v6164_v38, %v5637_v53  ;;  %v5509_v38 = vld [vmem:[#allocation3 + $0x1a8] sm:$0xf]  ;;  %v6132_v35 = vld [vmem:[#allocation3 + $0x1b4] sm:$0xf0] }
 0x234   : > { %v2040_v44 = vpop.f32.mrf.mxu1  ;;  %v1952_v42 = vadd.f32 %v1951_v26, %v6999_v9  ;;  %v5765_v26 = vld [vmem:[#allocation3 + $0x3a8] sm:$0xf] }
 0x235   : > { %v2217_v32 = vadd.f32 %v2216_v13, %v2128_v40  ;;  %v5381_v13 = vld [vmem:[#allocation3 + $0xa8] sm:$0xf]  ;;  %v6100_v40 = vld [vmem:[#allocation3 + $0xb4] sm:$0xf0]  ;;  %2787 = vmatpush.bf16.msrb.mxu2 %v5638_v50 }
 0x236   : > { %v2041_v15 = vadd.f32 %v2040_v44, %v1952_v42  ;;  %v5382_v44 = vor.u32 %v6100_v40, %v5381_v13  ;;  %v6196_v42 = vld [vmem:[#allocation3 + $0x3b4] sm:$0xf0] }
 0x237   : > { %v3391_v56 = vmax.f32 %v2217_v32, 0.0 }
 0x238   : > { %2609 = vmatpush.bf16.msrb.mxu0 %v5382_v44  ;;  %v8129_v44 = vld [vmem:[#allocation11_spill] sm:$0xff] }
 0x23a   : > { %v2129_v25 = vpop.f32.mrf.mxu2 }
 0x23b   : > { %v2218_v6 = vpop.f32.mrf.mxu3  ;;  %v2130_v47 = vadd.f32 %v2129_v25, %v2041_v15  ;;  %v1954_v24 = vpop.f32.mrf.mxu0 }
 0x23c   : > { %v2043_v30 = vpop.f32.mrf.mxu1  ;;  %v1955_v28 = vadd.f32 %v1954_v24, %v6999_v9 }
 0x23d   : > { %v2219_v57 = vadd.f32 %v2218_v6, %v2130_v47  ;;  %v5766_v47 = vor.u32 %v6196_v42, %v5765_v26  ;;  %v8128_v42 = vld [vmem:[#allocation10_spill] sm:$0xff] }
 0x23e   : > { %v2044_v23 = vadd.f32 %v2043_v30, %v1955_v28  ;;  %2269 = vmatmul.bf16.gmra.mxu0 %v6724_v63  ;;  %2358 = vmatmul.bf16.gmra.mxu1 %v6726_v0 }
 0x23f   : > { %v3395_v29 = vmax.f32 %v2219_v57, 0.0  ;;  %2447 = vmatmul.bf16.gmra.mxu2 %v6735_v18  ;;  %2876 = vmatpush.bf16.msrb.mxu3 %v5766_v47  ;;  %v8130_v47 = vld [vmem:[#allocation12_spill] sm:$0xff] }
 0x240   : > { %2536 = vmatmul.bf16.gmra.mxu3 %v8126_v41  ;;  %v5510_v41 = vor.u32 %v6132_v35, %v5509_v38 }
 0x241   : > { %v7092_v15 = vpack.c.bf16 %v3395_v29, %v3391_v56 }
 0x242   : > { %v2132_v25 = vpop.f32.mrf.mxu2  ;;  %2698 = vmatpush.bf16.msrb.mxu1 %v5510_v41 }
 0x243   : > { %8127 = vst [vmem:[#allocation42_spill] sm:$0xff] %v7092_v15  ;;  %v2221_v6 = vpop.f32.mrf.mxu3  ;;  %v2133_v32 = vadd.f32 %v2132_v25, %v2044_v23  ;;  %v1956_v24 = vpop.f32.mrf.mxu0 }
 0x244   : > { %v2045_v30 = vpop.f32.mrf.mxu1  ;;  %v1957_v28 = vadd.f32 %v1956_v24, %v6999_v9 }
 0x245   : > { %v2222_v57 = vadd.f32 %v2221_v6, %v2133_v32  ;;  %v8131_v32 = vld [vmem:[#allocation13_spill] sm:$0xff] }
 0x246   : > { %v2046_v53 = vadd.f32 %v2045_v30, %v1957_v28 }
 0x247   : > { %v3399_v25 = vmax.f32 %v2222_v57, 0.0 }
 0x24a   : > { %v2134_v13 = vpop.f32.mrf.mxu2 }
 0x24b   : > { %v2223_v40 = vpop.f32.mrf.mxu3  ;;  %v2135_v56 = vadd.f32 %v2134_v13, %v2046_v53  ;;  %v1959_v29 = vpop.f32.mrf.mxu0 }
 0x24c   : > { %v2048_v15 = vpop.f32.mrf.mxu1  ;;  %v1960_v50 = vadd.f32 %v1959_v29, %v6999_v9 }
 0x24d   : > { %v2224_v23 = vadd.f32 %v2223_v40, %v2135_v56 }
 0x24e   : > { %v2049_v26 = vadd.f32 %v2048_v15, %v1960_v50  ;;  %2274 = vmatmul.bf16.gmra.mxu0 %v8128_v42  ;;  %2363 = vmatmul.bf16.gmra.mxu1 %v8129_v44 }
 0x24f   : > { %v3403_v6 = vmax.f32 %v2224_v23, 0.0  ;;  %2452 = vmatmul.bf16.gmra.mxu2 %v8130_v47 }
 0x250   : > { %2541 = vmatmul.bf16.gmra.mxu3 %v8131_v32 }
 0x251   : > { %v7100_v35 = vpack.c.bf16 %v3403_v6, %v3399_v25  ;;  %v8133_v25 = vld [vmem:[#allocation14_spill] sm:$0xff]  ;;  %v8134_v6 = vld [vmem:[#allocation15_spill] sm:$0xff] }
 0x252   : > { %v2137_v41 = vpop.f32.mrf.mxu2 }
 0x253   : > { %8132 = vst [vmem:[#allocation43_spill] sm:$0xff] %v7100_v35  ;;  %v2226_v24 = vpop.f32.mrf.mxu3  ;;  %v2138_v30 = vadd.f32 %v2137_v41, %v2049_v26  ;;  %v1961_v28 = vpop.f32.mrf.mxu0  ;;  %v8135_v35 = vld [vmem:[#allocation16_spill] sm:$0xff] }
 0x254   : > { %v2050_v53 = vpop.f32.mrf.mxu1  ;;  %v1962_v38 = vadd.f32 %v1961_v28, %v6999_v9  ;;  %v8136_v28 = vld [vmem:[#allocation17_spill] sm:$0xff] }
 0x255   : > { %v2227_v15 = vadd.f32 %v2226_v24, %v2138_v30  ;;  %v5621_v24 = vld [vmem:[#allocation3 + $0x288] sm:$0xf]  ;;  %v6160_v30 = vld [vmem:[#allocation3 + $0x294] sm:$0xf0] }
 0x256   : > { %v2051_v13 = vadd.f32 %v2050_v53, %v1962_v38  ;;  %v5622_v53 = vor.u32 %v6160_v30, %v5621_v24  ;;  %v5365_v38 = vld [vmem:[#allocation3 + $0x88] sm:$0xf] }
 0x257   : > { %v3407_v26 = vmax.f32 %v2227_v15, 0.0  ;;  %v5493_v30 = vld [vmem:[#allocation3 + $0x188] sm:$0xf] }
 0x258   : > { %2788 = vmatpush.bf16.msrb.mxu2 %v5622_v53 }
 0x25a   : > { %v2139_v40 = vpop.f32.mrf.mxu2 }
 0x25b   : > { %v2228_v56 = vpop.f32.mrf.mxu3  ;;  %v2140_v29 = vadd.f32 %v2139_v40, %v2051_v13  ;;  %v1964_v57 = vpop.f32.mrf.mxu0  ;;  %v6096_v13 = vld [vmem:[#allocation3 + $0x94] sm:$0xf0]  ;;  %v5749_v40 = vld [vmem:[#allocation3 + $0x388] sm:$0xf] }
 0x25c   : > { %v2053_v50 = vpop.f32.mrf.mxu1  ;;  %v1965_v23 = vadd.f32 %v1964_v57, %v6999_v9  ;;  %v5366_v44 = vor.u32 %v6096_v13, %v5365_v38  ;;  %v6192_v57 = vld [vmem:[#allocation3 + $0x394] sm:$0xf0] }
 0x25d   : > { %v2229_v47 = vadd.f32 %v2228_v56, %v2140_v29 }
 0x25e   : > { %v2054_v32 = vadd.f32 %v2053_v50, %v1965_v23  ;;  %2279 = vmatmul.bf16.gmra.mxu0 %v8133_v25  ;;  %2368 = vmatmul.bf16.gmra.mxu1 %v8134_v6  ;;  %v5750_v23 = vor.u32 %v6192_v57, %v5749_v40  ;;  %v6128_v25 = vld [vmem:[#allocation3 + $0x194] sm:$0xf0]  ;;  %v8138_v57 = vld [vmem:[#allocation18_spill] sm:$0xff] }
 0x25f   : > { %v3411_v41 = vmax.f32 %v2229_v47, 0.0  ;;  %2457 = vmatmul.bf16.gmra.mxu2 %v8135_v35  ;;  %2610 = vmatpush.bf16.msrb.mxu0 %v5366_v44  ;;  %v5494_v42 = vor.u32 %v6128_v25, %v5493_v30  ;;  %v8139_v44 = vld [vmem:[#allocation19_spill] sm:$0xff] }
 0x260   : > { %2546 = vmatmul.bf16.gmra.mxu3 %v8136_v28 }
 0x261   : > { %v7108_v56 = vpack.c.bf16 %v3411_v41, %v3407_v26  ;;  %2877 = vmatpush.bf16.msrb.mxu3 %v5750_v23  ;;  %2699 = vmatpush.bf16.msrb.mxu1 %v5494_v42 }
 0x262   : > { %v2142_v29 = vpop.f32.mrf.mxu2 }
 0x263   : > { %8137 = vst [vmem:[#allocation44_spill] sm:$0xff] %v7108_v56  ;;  %v2231_v50 = vpop.f32.mrf.mxu3  ;;  %v2143_v15 = vadd.f32 %v2142_v29, %v2054_v32  ;;  %v1966_v47 = vpop.f32.mrf.mxu0 }
 0x264   : > { %v2055_v6 = vpop.f32.mrf.mxu1  ;;  %v1967_v28 = vadd.f32 %v1966_v47, %v6999_v9 }
 0x265   : > { %v2232_v35 = vadd.f32 %v2231_v50, %v2143_v15 }
 0x266   : > { %v2056_v24 = vadd.f32 %v2055_v6, %v1967_v28  ;;  %v8140_v6 = vld [vmem:[#allocation20_spill] sm:$0xff]  ;;  %v8141_v28 = vld [vmem:[#allocation21_spill] sm:$0xff] }
 0x267   : > { %v3415_v29 = vmax.f32 %v2232_v35, 0.0 }
 0x26a   : > { %v2144_v38 = vpop.f32.mrf.mxu2 }
 0x26b   : > { %v2233_v13 = vpop.f32.mrf.mxu3  ;;  %v2145_v26 = vadd.f32 %v2144_v38, %v2056_v24  ;;  %v1969_v41 = vpop.f32.mrf.mxu0 }
 0x26c   : > { %v2058_v56 = vpop.f32.mrf.mxu1  ;;  %v1970_v53 = vadd.f32 %v1969_v41, %v6999_v9 }
 0x26d   : > { %v2234_v32 = vadd.f32 %v2233_v13, %v2145_v26 }
 0x26e   : > { %v2059_v40 = vadd.f32 %v2058_v56, %v1970_v53  ;;  %2284 = vmatmul.bf16.gmra.mxu0 %v8138_v57  ;;  %2373 = vmatmul.bf16.gmra.mxu1 %v8139_v44 }
 0x26f   : > { %v3419_v50 = vmax.f32 %v2234_v32, 0.0  ;;  %2462 = vmatmul.bf16.gmra.mxu2 %v8140_v6 }
 0x270   : > { %2551 = vmatmul.bf16.gmra.mxu3 %v8141_v28 }
 0x271   : > { %v7116_v25 = vpack.c.bf16 %v3419_v50, %v3415_v29  ;;  %v8143_v29 = vld [vmem:[#allocation22_spill] sm:$0xff]  ;;  %v8144_v50 = vld [vmem:[#allocation23_spill] sm:$0xff] }
 0x272   : > { %v2147_v42 = vpop.f32.mrf.mxu2 }
 0x273   : > { %8142 = vst [vmem:[#allocation45_spill] sm:$0xff] %v7116_v25  ;;  %v2236_v23 = vpop.f32.mrf.mxu3  ;;  %v2148_v15 = vadd.f32 %v2147_v42, %v2059_v40  ;;  %v1971_v47 = vpop.f32.mrf.mxu0  ;;  %v8145_v25 = vld [vmem:[#allocation24_spill] sm:$0xff] }
 0x274   : > { %v2060_v24 = vpop.f32.mrf.mxu1  ;;  %v1972_v30 = vadd.f32 %v1971_v47, %v6999_v9  ;;  %v8146_v47 = vld [vmem:[#allocation25_spill] sm:$0xff] }
 0x275   : > { %v2237_v56 = vadd.f32 %v2236_v23, %v2148_v15  ;;  %v5605_v23 = vld [vmem:[#allocation3 + $0x268] sm:$0xf]  ;;  %v6156_v15 = vld [vmem:[#allocation3 + $0x274] sm:$0xf0] }
 0x276   : > { %v2061_v38 = vadd.f32 %v2060_v24, %v1972_v30  ;;  %v5606_v24 = vor.u32 %v6156_v15, %v5605_v23  ;;  %v5349_v30 = vld [vmem:[#allocation3 + $0x68] sm:$0xf] }
 0x277   : > { %v3423_v40 = vmax.f32 %v2237_v56, 0.0  ;;  %v5477_v15 = vld [vmem:[#allocation3 + $0x168] sm:$0xf] }
 0x278   : > { %2789 = vmatpush.bf16.msrb.mxu2 %v5606_v24 }
 0x27a   : > { %v2149_v13 = vpop.f32.mrf.mxu2 }
 0x27b   : > { %v2238_v26 = vpop.f32.mrf.mxu3  ;;  %v2150_v41 = vadd.f32 %v2149_v13, %v2061_v38  ;;  %v1974_v35 = vpop.f32.mrf.mxu0  ;;  %v6092_v38 = vld [vmem:[#allocation3 + $0x74] sm:$0xf0]  ;;  %v5733_v13 = vld [vmem:[#allocation3 + $0x368] sm:$0xf] }
 0x27c   : > { %v2063_v53 = vpop.f32.mrf.mxu1  ;;  %v1975_v32 = vadd.f32 %v1974_v35, %v6999_v9  ;;  %v5350_v44 = vor.u32 %v6092_v38, %v5349_v30  ;;  %v6188_v35 = vld [vmem:[#allocation3 + $0x374] sm:$0xf0] }
 0x27d   : > { %v2239_v6 = vadd.f32 %v2238_v26, %v2150_v41 }
 0x27e   : > { %v2064_v28 = vadd.f32 %v2063_v53, %v1975_v32  ;;  %2289 = vmatmul.bf16.gmra.mxu0 %v8143_v29  ;;  %2378 = vmatmul.bf16.gmra.mxu1 %v8144_v50  ;;  %v5734_v32 = vor.u32 %v6188_v35, %v5733_v13  ;;  %v6124_v29 = vld [vmem:[#allocation3 + $0x174] sm:$0xf0] }
 0x27f   : > { %v3427_v42 = vmax.f32 %v2239_v6, 0.0  ;;  %2467 = vmatmul.bf16.gmra.mxu2 %v8145_v25  ;;  %2611 = vmatpush.bf16.msrb.mxu0 %v5350_v44  ;;  %v5478_v57 = vor.u32 %v6124_v29, %v5477_v15 }
 0x280   : > { %2556 = vmatmul.bf16.gmra.mxu3 %v8146_v47 }
 0x281   : > { %v7124_v26 = vpack.c.bf16 %v3427_v42, %v3423_v40  ;;  %2878 = vmatpush.bf16.msrb.mxu3 %v5734_v32  ;;  %2700 = vmatpush.bf16.msrb.mxu1 %v5478_v57 }
 0x282   : > { %v2152_v41 = vpop.f32.mrf.mxu2 }
 0x283   : > { %8147 = vst [vmem:[#allocation46_spill] sm:$0xff] %v7124_v26  ;;  %v2241_v53 = vpop.f32.mrf.mxu3  ;;  %v2153_v56 = vadd.f32 %v2152_v41, %v2064_v28  ;;  %v1976_v6 = vpop.f32.mrf.mxu0 }
 0x284   : > { %v2065_v50 = vpop.f32.mrf.mxu1  ;;  %v1977_v47 = vadd.f32 %v1976_v6, %v6999_v9 }
 0x285   : > { %v2242_v25 = vadd.f32 %v2241_v53, %v2153_v56 }
 0x286   : > { %v2066_v23 = vadd.f32 %v2065_v50, %v1977_v47  ;;  %v8148_v50 = vld [vmem:[#allocation26_spill] sm:$0xff] }
 0x287   : > { %v3431_v44 = vmax.f32 %v2242_v25, 0.0 }
 0x28a   : > { %v2154_v30 = vpop.f32.mrf.mxu2 }
 0x28b   : > { %v2243_v38 = vpop.f32.mrf.mxu3  ;;  %v2155_v40 = vadd.f32 %v2154_v30, %v2066_v23  ;;  %v1979_v42 = vpop.f32.mrf.mxu0  ;;  %v8150_v23 = vld [vmem:[#allocation32_spill] sm:$0xff] }
 0x28c   : > { %v2068_v26 = vpop.f32.mrf.mxu1  ;;  %v1980_v24 = vadd.f32 %v1979_v42, %v6999_v9  ;;  %v7136_v15 = vperm.slane %v8150_v23, 1  ;;  %v6088_v23 = vld [vmem:[#allocation3 + $0x54] sm:$0xf0] }
 0x28d   : > { %v2244_v28 = vadd.f32 %v2243_v38, %v2155_v40 }
 0x28e   : > { %v2069_v13 = vadd.f32 %v2068_v26, %v1980_v24  ;;  %2294 = vmatmul.bf16.gmra.mxu0 %v6829_v60  ;;  %2383 = vmatmul.bf16.gmra.mxu1 %v6831_v61 }
 0x28f   : > { %v3435_v35 = vmax.f32 %v2244_v28, 0.0  ;;  %2472 = vmatmul.bf16.gmra.mxu2 %v6839_v22 }
 0x290   : > { %2561 = vmatmul.bf16.gmra.mxu3 %v8148_v50 }
 0x291   : > { %v7132_v29 = vpack.c.bf16 %v3435_v35, %v3431_v44  ;;  %v8151_v35 = vld [vmem:[#allocation27_spill] sm:$0xff] }
 0x292   : > { %v2157_v57 = vpop.f32.mrf.mxu2 }
 0x293   : > { %8149 = vst [vmem:[#allocation47_spill] sm:$0xff] %v7132_v29  ;;  %v2246_v47 = vpop.f32.mrf.mxu3  ;;  %v2158_v41 = vadd.f32 %v2157_v57, %v2069_v13  ;;  %v1981_v53 = vpop.f32.mrf.mxu0  ;;  %v8152_v13 = vld [vmem:[#allocation28_spill] sm:$0xff] }
 0x294   : > { %v2070_v32 = vpop.f32.mrf.mxu1  ;;  %v1982_v56 = vadd.f32 %v1981_v53, %v6999_v9  ;;  %v5589_v53 = vld [vmem:[#allocation3 + $0x248] sm:$0xf] }
 0x295   : > { %v2247_v26 = vadd.f32 %v2246_v47, %v2158_v41  ;;  %v8153_v47 = vld [vmem:[#allocation29_spill] sm:$0xff]  ;;  %v8154_v41 = vld [vmem:[#allocation30_spill] sm:$0xff] }
 0x296   : > { %v2071_v6 = vadd.f32 %v2070_v32, %v1982_v56  ;;  %v6152_v32 = vld [vmem:[#allocation3 + $0x254] sm:$0xf0] }
 0x297   : > { %v3439_v57 = vmax.f32 %v2247_v26, 0.0  ;;  %v5590_v56 = vor.u32 %v6152_v32, %v5589_v53  ;;  %v5461_v32 = vld [vmem:[#allocation3 + $0x148] sm:$0xf] }
 0x299   : > { %2790 = vmatpush.bf16.msrb.mxu2 %v5590_v56 }
 0x29a   : > { %v2159_v25 = vpop.f32.mrf.mxu2 }
 0x29b   : > { %v2248_v30 = vpop.f32.mrf.mxu3  ;;  %v2160_v38 = vadd.f32 %v2159_v25, %v2071_v6  ;;  %v2260_v40 = vpop.f32.mrf.mxu0  ;;  %v5333_v6 = vld [vmem:[#allocation3 + $0x48] sm:$0xf] }
 0x29c   : > { %v2349_v42 = vpop.f32.mrf.mxu1  ;;  %v2261_v24 = vadd.f32 %v2260_v40, %v7136_v15  ;;  %v5717_v25 = vld [vmem:[#allocation3 + $0x348] sm:$0xf]  ;;  %v5334_v29 = vor.u32 %v6088_v23, %v5333_v6  ;;  %v6184_v40 = vld [vmem:[#allocation3 + $0x354] sm:$0xf0] }
 0x29d   : > { %v2249_v28 = vadd.f32 %v2248_v30, %v2160_v38 }
 0x29e   : > { %v2350_v44 = vadd.f32 %v2349_v42, %v2261_v24  ;;  %2299 = vmatmul.bf16.gmra.mxu0 %v8151_v35  ;;  %2388 = vmatmul.bf16.gmra.mxu1 %v8152_v13  ;;  %v5718_v24 = vor.u32 %v6184_v40, %v5717_v25  ;;  %v6120_v35 = vld [vmem:[#allocation3 + $0x154] sm:$0xf0] }
 0x29f   : > { %v3443_v9 = vmax.f32 %v2249_v28, 0.0  ;;  %2477 = vmatmul.bf16.gmra.mxu2 %v8153_v47  ;;  %2612 = vmatpush.bf16.msrb.mxu0 %v5334_v29  ;;  %v5462_v50 = vor.u32 %v6120_v35, %v5461_v32 }
 0x2a0   : > { %2566 = vmatmul.bf16.gmra.mxu3 %v8154_v41 }
 0x2a1   : > { %v7143_v30 = vpack.c.bf16 %v3443_v9, %v3439_v57  ;;  %2879 = vmatpush.bf16.msrb.mxu3 %v5718_v24  ;;  %2701 = vmatpush.bf16.msrb.mxu1 %v5462_v50 }
 0x2a2   : > { %v2438_v38 = vpop.f32.mrf.mxu2 }
 0x2a3   : > { %8155 = vst [vmem:[#allocation32_spill] sm:$0xff] %v7143_v30  ;;  %v2527_v42 = vpop.f32.mrf.mxu3  ;;  %v2439_v26 = vadd.f32 %v2438_v38, %v2350_v44  ;;  %v2262_v28 = vpop.f32.mrf.mxu0 }
 0x2a4   : > { %v2351_v13 = vpop.f32.mrf.mxu1  ;;  %v2263_v41 = vadd.f32 %v2262_v28, %v7136_v15 }
 0x2a5   : > { %v2528_v47 = vadd.f32 %v2527_v42, %v2439_v26 }
 0x2a6   : > { %v2352_v53 = vadd.f32 %v2351_v13, %v2263_v41 }
 0x2a7   : > { %v3320_v29 = vmax.f32 %v2528_v47, 0.0 }
 0x2aa   : > { %v2440_v6 = vpop.f32.mrf.mxu2 }
 0x2ab   : > { %v2529_v23 = vpop.f32.mrf.mxu3  ;;  %v2441_v57 = vadd.f32 %v2440_v6, %v2352_v53  ;;  %v2265_v9 = vpop.f32.mrf.mxu0 }
 0x2ac   : > { %v2354_v30 = vpop.f32.mrf.mxu1  ;;  %v2266_v56 = vadd.f32 %v2265_v9, %v7136_v15 }
 0x2ad   : > { %v2530_v44 = vadd.f32 %v2529_v23, %v2441_v57 }
 0x2ae   : > { %v2355_v25 = vadd.f32 %v2354_v30, %v2266_v56  ;;  %2304 = vmatmul.bf16.gmra.mxu0 %v6869_v20  ;;  %2393 = vmatmul.bf16.gmra.mxu1 %v6871_v21 }
 0x2af   : > { %v3324_v40 = vmax.f32 %v2530_v44, 0.0  ;;  %2482 = vmatmul.bf16.gmra.mxu2 %v6879_v62 }
 0x2b0   : > { %2571 = vmatmul.bf16.gmra.mxu3 %v6881_v58 }
 0x2b1   : > { %v7151_v35 = vpack.c.bf16 %v3324_v40, %v3320_v29  ;;  %v5573_v29 = vld [vmem:[#allocation3 + $0x228] sm:$0xf]  ;;  %v6148_v40 = vld [vmem:[#allocation3 + $0x234] sm:$0xf0] }
 0x2b2   : > { %v2443_v50 = vpop.f32.mrf.mxu2 }
 0x2b3   : > { %8156 = vst [vmem:[#allocation48_spill] sm:$0xff] %v7151_v35  ;;  %v2532_v13 = vpop.f32.mrf.mxu3  ;;  %v2444_v41 = vadd.f32 %v2443_v50, %v2355_v25  ;;  %v2267_v38 = vpop.f32.mrf.mxu0  ;;  %v8157_v25 = vld [vmem:[#allocation31_spill] sm:$0xff]  ;;  %v5574_v50 = vor.u32 %v6148_v40, %v5573_v29  ;;  %v5445_v40 = vld [vmem:[#allocation3 + $0x128] sm:$0xf]  ;;  %v6116_v35 = vld [vmem:[#allocation3 + $0x134] sm:$0xf0] }
 0x2b4   : > { %v2356_v42 = vpop.f32.mrf.mxu1  ;;  %v2268_v24 = vadd.f32 %v2267_v38, %v7136_v15  ;;  %v5701_v38 = vld [vmem:[#allocation3 + $0x328] sm:$0xf] }
 0x2b5   : > { %v2533_v30 = vadd.f32 %v2532_v13, %v2444_v41  ;;  %v5317_v13 = vld [vmem:[#allocation3 + $0x28] sm:$0xf]  ;;  %v6084_v41 = vld [vmem:[#allocation3 + $0x34] sm:$0xf0]  ;;  %2791 = vmatpush.bf16.msrb.mxu2 %v5574_v50 }
 0x2b6   : > { %v2357_v26 = vadd.f32 %v2356_v42, %v2268_v24  ;;  %v5318_v42 = vor.u32 %v6084_v41, %v5317_v13  ;;  %v6180_v24 = vld [vmem:[#allocation3 + $0x334] sm:$0xf0] }
 0x2b7   : > { %v3328_v56 = vmax.f32 %v2533_v30, 0.0 }
 0x2b8   : > { %2613 = vmatpush.bf16.msrb.mxu0 %v5318_v42 }
 0x2ba   : > { %v2445_v28 = vpop.f32.mrf.mxu2 }
 0x2bb   : > { %v2534_v53 = vpop.f32.mrf.mxu3  ;;  %v2446_v32 = vadd.f32 %v2445_v28, %v2357_v26  ;;  %v2270_v47 = vpop.f32.mrf.mxu0 }
 0x2bc   : > { %v2359_v6 = vpop.f32.mrf.mxu1  ;;  %v2271_v23 = vadd.f32 %v2270_v47, %v7136_v15 }
 0x2bd   : > { %v2535_v57 = vadd.f32 %v2534_v53, %v2446_v32  ;;  %v5702_v32 = vor.u32 %v6180_v24, %v5701_v38 }
 0x2be   : > { %v2360_v9 = vadd.f32 %v2359_v6, %v2271_v23  ;;  %2309 = vmatmul.bf16.gmra.mxu0 %v6889_v11  ;;  %2398 = vmatmul.bf16.gmra.mxu1 %v6891_v45 }
 0x2bf   : > { %v3332_v44 = vmax.f32 %v2535_v57, 0.0  ;;  %2487 = vmatmul.bf16.gmra.mxu2 %v6899_v19  ;;  %2880 = vmatpush.bf16.msrb.mxu3 %v5702_v32 }
 0x2c0   : > { %2576 = vmatmul.bf16.gmra.mxu3 %v8157_v25  ;;  %v5446_v25 = vor.u32 %v6116_v35, %v5445_v40 }
 0x2c1   : > { %v7159_v26 = vpack.c.bf16 %v3332_v44, %v3328_v56 }
 0x2c2   : > { %v2448_v28 = vpop.f32.mrf.mxu2  ;;  %2702 = vmatpush.bf16.msrb.mxu1 %v5446_v25 }
 0x2c3   : > { %8158 = vst [vmem:[#allocation49_spill] sm:$0xff] %v7159_v26  ;;  %v2537_v53 = vpop.f32.mrf.mxu3  ;;  %v2449_v30 = vadd.f32 %v2448_v28, %v2360_v9  ;;  %v2272_v47 = vpop.f32.mrf.mxu0 }
 0x2c4   : > { %v2361_v6 = vpop.f32.mrf.mxu1  ;;  %v2273_v23 = vadd.f32 %v2272_v47, %v7136_v15 }
 0x2c5   : > { %v2538_v57 = vadd.f32 %v2537_v53, %v2449_v30 }
 0x2c6   : > { %v2362_v29 = vadd.f32 %v2361_v6, %v2273_v23 }
 0x2c7   : > { %v3336_v42 = vmax.f32 %v2538_v57, 0.0 }
 0x2ca   : > { %v2450_v13 = vpop.f32.mrf.mxu2 }
 0x2cb   : > { %v2539_v41 = vpop.f32.mrf.mxu3  ;;  %v2451_v56 = vadd.f32 %v2450_v13, %v2362_v29  ;;  %v2275_v44 = vpop.f32.mrf.mxu0 }
 0x2cc   : > { %v2364_v26 = vpop.f32.mrf.mxu1  ;;  %v2276_v50 = vadd.f32 %v2275_v44, %v7136_v15 }
 0x2cd   : > { %v2540_v9 = vadd.f32 %v2539_v41, %v2451_v56 }
 0x2ce   : > { %v2365_v38 = vadd.f32 %v2364_v26, %v2276_v50  ;;  %2314 = vmatmul.bf16.gmra.mxu0 %v6909_v54  ;;  %2403 = vmatmul.bf16.gmra.mxu1 %v6911_v59 }
 0x2cf   : > { %v3340_v24 = vmax.f32 %v2540_v9, 0.0  ;;  %2492 = vmatmul.bf16.gmra.mxu2 %v6919_v31 }
 0x2d0   : > { %2581 = vmatmul.bf16.gmra.mxu3 %v6921_v43 }
 0x2d1   : > { %v7167_v35 = vpack.c.bf16 %v3340_v24, %v3336_v42  ;;  %v6144_v42 = vld [vmem:[#allocation3 + $0x214] sm:$0xf0] }
 0x2d2   : > { %v2453_v25 = vpop.f32.mrf.mxu2 }
 0x2d3   : > { %8159 = vst [vmem:[#allocation50_spill] sm:$0xff] %v7167_v35  ;;  %v2542_v28 = vpop.f32.mrf.mxu3  ;;  %v2454_v53 = vadd.f32 %v2453_v25, %v2365_v38  ;;  %v2277_v32 = vpop.f32.mrf.mxu0  ;;  %v5557_v38 = vld [vmem:[#allocation3 + $0x208] sm:$0xf] }
 0x2d4   : > { %v2366_v30 = vpop.f32.mrf.mxu1  ;;  %v2278_v47 = vadd.f32 %v2277_v32, %v7136_v15  ;;  %v5558_v24 = vor.u32 %v6144_v42, %v5557_v38  ;;  %v5301_v25 = vld [vmem:[#allocation3 + $0x8] sm:$0xf]  ;;  %v6112_v42 = vld [vmem:[#allocation3 + $0x114] sm:$0xf0] }
 0x2d5   : > { %v2543_v26 = vadd.f32 %v2542_v28, %v2454_v53  ;;  %v6080_v28 = vld [vmem:[#allocation3 + $0x14] sm:$0xf0]  ;;  %v5685_v53 = vld [vmem:[#allocation3 + $0x308] sm:$0xf] }
 0x2d6   : > { %v2367_v6 = vadd.f32 %v2366_v30, %v2278_v47  ;;  %v5302_v32 = vor.u32 %v6080_v28, %v5301_v25  ;;  %v6176_v30 = vld [vmem:[#allocation3 + $0x314] sm:$0xf0]  ;;  %2792 = vmatpush.bf16.msrb.mxu2 %v5558_v24  ;;  %v5429_v38 = vld [vmem:[#allocation3 + $0x108] sm:$0xf] }
 0x2d7   : > { %v3344_v50 = vmax.f32 %v2543_v26, 0.0  ;;  %v5430_v35 = vor.u32 %v6112_v42, %v5429_v38 }
 0x2d8   : > { %2614 = vmatpush.bf16.msrb.mxu0 %v5302_v32 }
 0x2d9   : > { %2703 = vmatpush.bf16.msrb.mxu1 %v5430_v35 }
 0x2da   : > { %v2455_v23 = vpop.f32.mrf.mxu2 }
 0x2db   : > { %v2544_v29 = vpop.f32.mrf.mxu3  ;;  %v2456_v40 = vadd.f32 %v2455_v23, %v2367_v6  ;;  %v2280_v57 = vpop.f32.mrf.mxu0 }
 0x2dc   : > { %v2369_v13 = vpop.f32.mrf.mxu1  ;;  %v2281_v41 = vadd.f32 %v2280_v57, %v7136_v15 }
 0x2dd   : > { %v2545_v56 = vadd.f32 %v2544_v29, %v2456_v40  ;;  %v5686_v29 = vor.u32 %v6176_v30, %v5685_v53 }
 0x2de   : > { %v2370_v44 = vadd.f32 %v2369_v13, %v2281_v41  ;;  %2319 = vmatmul.bf16.gmra.mxu0 %v6929_v46  ;;  %2408 = vmatmul.bf16.gmra.mxu1 %v6931_v5 }
 0x2df   : > { %v3348_v9 = vmax.f32 %v2545_v56, 0.0  ;;  %2497 = vmatmul.bf16.gmra.mxu2 %v6939_v36  ;;  %2881 = vmatpush.bf16.msrb.mxu3 %v5686_v29 }
 0x2e0   : > { %2586 = vmatmul.bf16.gmra.mxu3 %v6941_v12 }
 0x2e1   : > { %v7175_v47 = vpack.c.bf16 %v3348_v9, %v3344_v50 }
 0x2e2   : > { %v2458_v6 = vpop.f32.mrf.mxu2 }
 0x2e3   : > { %8160 = vst [vmem:[#allocation51_spill] sm:$0xff] %v7175_v47  ;;  %v2547_v23 = vpop.f32.mrf.mxu3  ;;  %v2459_v26 = vadd.f32 %v2458_v6, %v2370_v44  ;;  %v2282_v40 = vpop.f32.mrf.mxu0 }
 0x2e4   : > { %v2371_v57 = vpop.f32.mrf.mxu1  ;;  %v2283_v13 = vadd.f32 %v2282_v40, %v7136_v15 }
 0x2e5   : > { %v2548_v41 = vadd.f32 %v2547_v23, %v2459_v26 }
 0x2e6   : > { %v2372_v56 = vadd.f32 %v2371_v57, %v2283_v13 }
 0x2e7   : > { %v3352_v32 = vmax.f32 %v2548_v41, 0.0 }
 0x2ea   : > { %v2460_v25 = vpop.f32.mrf.mxu2 }
 0x2eb   : > { %v2549_v28 = vpop.f32.mrf.mxu3  ;;  %v2461_v50 = vadd.f32 %v2460_v25, %v2372_v56  ;;  %v2285_v9 = vpop.f32.mrf.mxu0 }
 0x2ec   : > { %v2374_v47 = vpop.f32.mrf.mxu1  ;;  %v2286_v24 = vadd.f32 %v2285_v9, %v7136_v15 }
 0x2ed   : > { %v2550_v44 = vadd.f32 %v2549_v28, %v2461_v50 }
 0x2ee   : > { %v2375_v53 = vadd.f32 %v2374_v47, %v2286_v24  ;;  %2324 = vmatmul.bf16.gmra.mxu0 %v6949_v4  ;;  %2413 = vmatmul.bf16.gmra.mxu1 %v6951_v27 }
 0x2ef   : > { %v3356_v30 = vmax.f32 %v2550_v44, 0.0  ;;  %2502 = vmatmul.bf16.gmra.mxu2 %v6959_v8 }
 0x2f0   : > { %2591 = vmatmul.bf16.gmra.mxu3 %v6961_v37 }
 0x2f1   : > { %v7183_v6 = vpack.c.bf16 %v3356_v30, %v3352_v32  ;;  %v5671_v32 = vld [vmem:[#allocation3 + $0x2f8] sm:$0xf0] }
 0x2f2   : > { %v2463_v35 = vpop.f32.mrf.mxu2 }
 0x2f3   : > { %8161 = vst [vmem:[#allocation52_spill] sm:$0xff] %v7183_v6  ;;  %v2552_v23 = vpop.f32.mrf.mxu3  ;;  %v2464_v29 = vadd.f32 %v2463_v35, %v2375_v53  ;;  %v2287_v26 = vpop.f32.mrf.mxu0  ;;  %v6170_v53 = vld [vmem:[#allocation3 + $0x2ec] sm:$0xf] }
 0x2f4   : > { %v2376_v40 = vpop.f32.mrf.mxu1  ;;  %v2288_v57 = vadd.f32 %v2287_v26, %v7136_v15  ;;  %v5674_v30 = vor.u32 %v6170_v53, %v5671_v32  ;;  %v6106_v35 = vld [vmem:[#allocation3 + $0xec] sm:$0xf]  ;;  %v5543_v32 = vld [vmem:[#allocation3 + $0x1f8] sm:$0xf0] }
 0x2f5   : > { %v2553_v47 = vadd.f32 %v2552_v23, %v2464_v29  ;;  %v5415_v23 = vld [vmem:[#allocation3 + $0xf8] sm:$0xf0]  ;;  %v6202_v29 = vld [vmem:[#allocation3 + $0x3ec] sm:$0xf] }
 0x2f6   : > { %v2377_v13 = vadd.f32 %v2376_v40, %v2288_v57  ;;  %v5418_v26 = vor.u32 %v6106_v35, %v5415_v23  ;;  %v5799_v40 = vld [vmem:[#allocation3 + $0x3f8] sm:$0xf0]  ;;  %3141 = vmatpush.bf16.msra.mxu2 %v5674_v30  ;;  %v6138_v53 = vld [vmem:[#allocation3 + $0x1ec] sm:$0xf] }
 0x2f7   : > { %v3360_v24 = vmax.f32 %v2553_v47, 0.0  ;;  %v5546_v6 = vor.u32 %v6138_v53, %v5543_v32 }
 0x2f8   : > { %2963 = vmatpush.bf16.msra.mxu0 %v5418_v26 }
 0x2f9   : > { %3052 = vmatpush.bf16.msra.mxu1 %v5546_v6 }
 0x2fa   : > { %v2465_v56 = vpop.f32.mrf.mxu2 }
 0x2fb   : > { %v2554_v38 = vpop.f32.mrf.mxu3  ;;  %v2466_v42 = vadd.f32 %v2465_v56, %v2377_v13  ;;  %v2290_v41 = vpop.f32.mrf.mxu0 }
 0x2fc   : > { %v2379_v25 = vpop.f32.mrf.mxu1  ;;  %v2291_v28 = vadd.f32 %v2290_v41, %v7136_v15 }
 0x2fd   : > { %v2555_v50 = vadd.f32 %v2554_v38, %v2466_v42  ;;  %v5802_v38 = vor.u32 %v6202_v29, %v5799_v40 }
 0x2fe   : > { %v2380_v9 = vadd.f32 %v2379_v25, %v2291_v28  ;;  %2329 = vmatmul.bf16.gmra.mxu0 %v6969_v7  ;;  %2418 = vmatmul.bf16.gmra.mxu1 %v6971_v14 }
 0x2ff   : > { %v3364_v44 = vmax.f32 %v2555_v50, 0.0  ;;  %2507 = vmatmul.bf16.gmra.mxu2 %v6979_v10  ;;  %3230 = vmatpush.bf16.msra.mxu3 %v5802_v38 }
 0x300   : > { %2596 = vmatmul.bf16.gmra.mxu3 %v6981_v55 }
 0x301   : > { %v7191_v57 = vpack.c.bf16 %v3364_v44, %v3360_v24 }
 0x302   : > { %v2468_v13 = vpop.f32.mrf.mxu2 }
 0x303   : > { %8162 = vst [vmem:[#allocation53_spill] sm:$0xff] %v7191_v57  ;;  %v2557_v56 = vpop.f32.mrf.mxu3  ;;  %v2469_v47 = vadd.f32 %v2468_v13, %v2380_v9  ;;  %v2292_v42 = vpop.f32.mrf.mxu0 }
 0x304   : > { %v2381_v41 = vpop.f32.mrf.mxu1  ;;  %v2293_v25 = vadd.f32 %v2292_v42, %v7136_v15 }
 0x305   : > { %v2558_v28 = vadd.f32 %v2557_v56, %v2469_v47 }
 0x306   : > { %v2382_v50 = vadd.f32 %v2381_v41, %v2293_v25 }
 0x307   : > { %v3368_v26 = vmax.f32 %v2558_v28, 0.0 }
 0x30a   : > { %v2470_v35 = vpop.f32.mrf.mxu2 }
 0x30b   : > { %v2559_v23 = vpop.f32.mrf.mxu3  ;;  %v2471_v24 = vadd.f32 %v2470_v35, %v2382_v50  ;;  %v2295_v44 = vpop.f32.mrf.mxu0 }
 0x30c   : > { %v2384_v57 = vpop.f32.mrf.mxu1  ;;  %v2296_v30 = vadd.f32 %v2295_v44, %v7136_v15 }
 0x30d   : > { %v2560_v9 = vadd.f32 %v2559_v23, %v2471_v24 }
 0x30e   : > { %v2385_v29 = vadd.f32 %v2384_v57, %v2296_v30  ;;  %2334 = vmatmul.bf16.gmra.mxu0 %v6994_v39  ;;  %2423 = vmatmul.bf16.gmra.mxu1 %v6996_v1 }
 0x30f   : > { %v3372_v40 = vmax.f32 %v2560_v9, 0.0  ;;  %2512 = vmatmul.bf16.gmra.mxu2 %v7008_v48 }
 0x310   : > { %2601 = vmatmul.bf16.gmra.mxu3 %v7010_v49 }
 0x311   : > { %v7199_v13 = vpack.c.bf16 %v3372_v40, %v3368_v26  ;;  %v5655_v26 = vld [vmem:[#allocation3 + $0x2d8] sm:$0xf0] }
 0x312   : > { %v2473_v6 = vpop.f32.mrf.mxu2 }
 0x313   : > { %8163 = vst [vmem:[#allocation54_spill] sm:$0xff] %v7199_v13  ;;  %v2562_v56 = vpop.f32.mrf.mxu3  ;;  %v2474_v38 = vadd.f32 %v2473_v6, %v2385_v29  ;;  %v2297_v47 = vpop.f32.mrf.mxu0  ;;  %v6166_v29 = vld [vmem:[#allocation3 + $0x2cc] sm:$0xf] }
 0x314   : > { %v2386_v42 = vpop.f32.mrf.mxu1  ;;  %v2298_v41 = vadd.f32 %v2297_v47, %v7136_v15  ;;  %v5658_v40 = vor.u32 %v6166_v29, %v5655_v26  ;;  %v6102_v6 = vld [vmem:[#allocation3 + $0xcc] sm:$0xf]  ;;  %v5527_v26 = vld [vmem:[#allocation3 + $0x1d8] sm:$0xf0] }
 0x315   : > { %v2563_v57 = vadd.f32 %v2562_v56, %v2474_v38  ;;  %v5399_v56 = vld [vmem:[#allocation3 + $0xd8] sm:$0xf0]  ;;  %v6198_v38 = vld [vmem:[#allocation3 + $0x3cc] sm:$0xf] }
 0x316   : > { %v2387_v25 = vadd.f32 %v2386_v42, %v2298_v41  ;;  %v5402_v47 = vor.u32 %v6102_v6, %v5399_v56  ;;  %v5783_v42 = vld [vmem:[#allocation3 + $0x3d8] sm:$0xf0]  ;;  %3142 = vmatpush.bf16.msra.mxu2 %v5658_v40  ;;  %v6134_v29 = vld [vmem:[#allocation3 + $0x1cc] sm:$0xf] }
 0x317   : > { %v3376_v30 = vmax.f32 %v2563_v57, 0.0  ;;  %v5530_v13 = vor.u32 %v6134_v29, %v5527_v26 }
 0x318   : > { %2964 = vmatpush.bf16.msra.mxu0 %v5402_v47 }
 0x319   : > { %3053 = vmatpush.bf16.msra.mxu1 %v5530_v13 }
 0x31a   : > { %v2475_v50 = vpop.f32.mrf.mxu2 }
 0x31b   : > { %v2564_v53 = vpop.f32.mrf.mxu3  ;;  %v2476_v32 = vadd.f32 %v2475_v50, %v2387_v25  ;;  %v2300_v28 = vpop.f32.mrf.mxu0 }
 0x31c   : > { %v2389_v35 = vpop.f32.mrf.mxu1  ;;  %v2301_v23 = vadd.f32 %v2300_v28, %v7136_v15 }
 0x31d   : > { %v2565_v24 = vadd.f32 %v2564_v53, %v2476_v32  ;;  %v5786_v53 = vor.u32 %v6198_v38, %v5783_v42 }
 0x31e   : > { %v2390_v44 = vadd.f32 %v2389_v35, %v2301_v23  ;;  %2615 = vmatmul.bf16.vlgmr.msrb.gmra.mxu0 %v6682_v51  ;;  %2704 = vmatmul.bf16.vlgmr.msrb.gmra.mxu1 %v6684_v52 }
 0x31f   : > { %v3380_v9 = vmax.f32 %v2565_v24, 0.0  ;;  %2793 = vmatmul.bf16.vlgmr.msrb.gmra.mxu2 %v6693_v2  ;;  %3231 = vmatpush.bf16.msra.mxu3 %v5786_v53 }
 0x320   : > { %2882 = vmatmul.bf16.vlgmr.msrb.gmra.mxu3 %v6695_v3 }
 0x321   : > { %v7207_v41 = vpack.c.bf16 %v3380_v9, %v3376_v30 }
 0x322   : > { %v2478_v25 = vpop.f32.mrf.mxu2 }
 0x323   : > { %8164 = vst [vmem:[#allocation55_spill] sm:$0xff] %v7207_v41  ;;  %v2567_v50 = vpop.f32.mrf.mxu3  ;;  %v2479_v57 = vadd.f32 %v2478_v25, %v2390_v44  ;;  %v2302_v32 = vpop.f32.mrf.mxu0 }
 0x324   : > { %v2391_v28 = vpop.f32.mrf.mxu1  ;;  %v2303_v35 = vadd.f32 %v2302_v32, %v7136_v15 }
 0x325   : > { %v2568_v23 = vadd.f32 %v2567_v50, %v2479_v57 }
 0x326   : > { %v2392_v24 = vadd.f32 %v2391_v28, %v2303_v35 }
 0x327   : > { %v3384_v47 = vmax.f32 %v2568_v23, 0.0 }
 0x32a   : > { %v2480_v6 = vpop.f32.mrf.mxu2 }
 0x32b   : > { %v2569_v56 = vpop.f32.mrf.mxu3  ;;  %v2481_v30 = vadd.f32 %v2480_v6, %v2392_v24  ;;  %v2305_v9 = vpop.f32.mrf.mxu0 }
 0x32c   : > { %v2394_v41 = vpop.f32.mrf.mxu1  ;;  %v2306_v40 = vadd.f32 %v2305_v9, %v7136_v15 }
 0x32d   : > { %v2570_v44 = vadd.f32 %v2569_v56, %v2481_v30 }
 0x32e   : > { %v2395_v38 = vadd.f32 %v2394_v41, %v2306_v40  ;;  %2620 = vmatmul.bf16.gmra.mxu0 %v6703_v16  ;;  %2709 = vmatmul.bf16.gmra.mxu1 %v6705_v17 }
 0x32f   : > { %v3388_v42 = vmax.f32 %v2570_v44, 0.0  ;;  %2798 = vmatmul.bf16.gmra.mxu2 %v6714_v33 }
 0x330   : > { %2887 = vmatmul.bf16.gmra.mxu3 %v6716_v34 }
 0x331   : > { %v7215_v25 = vpack.c.bf16 %v3388_v42, %v3384_v47  ;;  %v6162_v47 = vld [vmem:[#allocation3 + $0x2ac] sm:$0xf]  ;;  %v5639_v42 = vld [vmem:[#allocation3 + $0x2b8] sm:$0xf0] }
 0x332   : > { %v2483_v13 = vpop.f32.mrf.mxu2 }
 0x333   : > { %8165 = vst [vmem:[#allocation56_spill] sm:$0xff] %v7215_v25  ;;  %v2572_v50 = vpop.f32.mrf.mxu3  ;;  %v2484_v53 = vadd.f32 %v2483_v13, %v2395_v38  ;;  %v2307_v57 = vpop.f32.mrf.mxu0  ;;  %v8166_v38 = vld [vmem:[#allocation9_spill] sm:$0xff]  ;;  %v5642_v13 = vor.u32 %v6162_v47, %v5639_v42  ;;  %v6130_v42 = vld [vmem:[#allocation3 + $0x1ac] sm:$0xf]  ;;  %v5511_v25 = vld [vmem:[#allocation3 + $0x1b8] sm:$0xf0] }
 0x334   : > { %v2396_v32 = vpop.f32.mrf.mxu1  ;;  %v2308_v28 = vadd.f32 %v2307_v57, %v7136_v15  ;;  %v6194_v57 = vld [vmem:[#allocation3 + $0x3ac] sm:$0xf] }
 0x335   : > { %v2573_v41 = vadd.f32 %v2572_v50, %v2484_v53  ;;  %v6098_v50 = vld [vmem:[#allocation3 + $0xac] sm:$0xf]  ;;  %v5383_v53 = vld [vmem:[#allocation3 + $0xb8] sm:$0xf0]  ;;  %3143 = vmatpush.bf16.msra.mxu2 %v5642_v13 }
 0x336   : > { %v2397_v35 = vadd.f32 %v2396_v32, %v2308_v28  ;;  %v5386_v32 = vor.u32 %v6098_v50, %v5383_v53  ;;  %v5767_v28 = vld [vmem:[#allocation3 + $0x3b8] sm:$0xf0] }
 0x337   : > { %v3392_v40 = vmax.f32 %v2573_v41, 0.0 }
 0x338   : > { %2965 = vmatpush.bf16.msra.mxu0 %v5386_v32  ;;  %v8169_v32 = vld [vmem:[#allocation11_spill] sm:$0xff] }
 0x33a   : > { %v2485_v24 = vpop.f32.mrf.mxu2 }
 0x33b   : > { %v2574_v29 = vpop.f32.mrf.mxu3  ;;  %v2486_v26 = vadd.f32 %v2485_v24, %v2397_v35  ;;  %v2310_v23 = vpop.f32.mrf.mxu0 }
 0x33c   : > { %v2399_v6 = vpop.f32.mrf.mxu1  ;;  %v2311_v56 = vadd.f32 %v2310_v23, %v7136_v15 }
 0x33d   : > { %v2575_v30 = vadd.f32 %v2574_v29, %v2486_v26  ;;  %v5770_v26 = vor.u32 %v6194_v57, %v5767_v28  ;;  %v8168_v28 = vld [vmem:[#allocation10_spill] sm:$0xff] }
 0x33e   : > { %v2400_v9 = vadd.f32 %v2399_v6, %v2311_v56  ;;  %2625 = vmatmul.bf16.gmra.mxu0 %v6724_v63  ;;  %2714 = vmatmul.bf16.gmra.mxu1 %v6726_v0 }
 0x33f   : > { %v3396_v44 = vmax.f32 %v2575_v30, 0.0  ;;  %2803 = vmatmul.bf16.gmra.mxu2 %v6735_v18  ;;  %3232 = vmatpush.bf16.msra.mxu3 %v5770_v26  ;;  %v8170_v26 = vld [vmem:[#allocation12_spill] sm:$0xff] }
 0x340   : > { %2892 = vmatmul.bf16.gmra.mxu3 %v8166_v38  ;;  %v5514_v38 = vor.u32 %v6130_v42, %v5511_v25 }
 0x341   : > { %v7223_v35 = vpack.c.bf16 %v3396_v44, %v3392_v40 }
 0x342   : > { %v2488_v24 = vpop.f32.mrf.mxu2  ;;  %3054 = vmatpush.bf16.msra.mxu1 %v5514_v38 }
 0x343   : > { %8167 = vst [vmem:[#allocation57_spill] sm:$0xff] %v7223_v35  ;;  %v2577_v29 = vpop.f32.mrf.mxu3  ;;  %v2489_v41 = vadd.f32 %v2488_v24, %v2400_v9  ;;  %v2312_v23 = vpop.f32.mrf.mxu0 }
 0x344   : > { %v2401_v6 = vpop.f32.mrf.mxu1  ;;  %v2313_v56 = vadd.f32 %v2312_v23, %v7136_v15 }
 0x345   : > { %v2578_v30 = vadd.f32 %v2577_v29, %v2489_v41  ;;  %v8171_v41 = vld [vmem:[#allocation13_spill] sm:$0xff] }
 0x346   : > { %v2402_v47 = vadd.f32 %v2401_v6, %v2313_v56 }
 0x347   : > { %v3400_v24 = vmax.f32 %v2578_v30, 0.0 }
 0x34a   : > { %v2490_v50 = vpop.f32.mrf.mxu2 }
 0x34b   : > { %v2579_v53 = vpop.f32.mrf.mxu3  ;;  %v2491_v40 = vadd.f32 %v2490_v50, %v2402_v47  ;;  %v2315_v44 = vpop.f32.mrf.mxu0 }
 0x34c   : > { %v2404_v35 = vpop.f32.mrf.mxu1  ;;  %v2316_v13 = vadd.f32 %v2315_v44, %v7136_v15 }
 0x34d   : > { %v2580_v9 = vadd.f32 %v2579_v53, %v2491_v40 }
 0x34e   : > { %v2405_v57 = vadd.f32 %v2404_v35, %v2316_v13  ;;  %2630 = vmatmul.bf16.gmra.mxu0 %v8168_v28  ;;  %2719 = vmatmul.bf16.gmra.mxu1 %v8169_v32 }
 0x34f   : > { %v3404_v29 = vmax.f32 %v2580_v9, 0.0  ;;  %2808 = vmatmul.bf16.gmra.mxu2 %v8170_v26 }
 0x350   : > { %2897 = vmatmul.bf16.gmra.mxu3 %v8171_v41 }
 0x351   : > { %v7231_v25 = vpack.c.bf16 %v3404_v29, %v3400_v24  ;;  %v8173_v24 = vld [vmem:[#allocation14_spill] sm:$0xff]  ;;  %v8174_v29 = vld [vmem:[#allocation15_spill] sm:$0xff] }
 0x352   : > { %v2493_v38 = vpop.f32.mrf.mxu2 }
 0x353   : > { %8172 = vst [vmem:[#allocation58_spill] sm:$0xff] %v7231_v25  ;;  %v2582_v23 = vpop.f32.mrf.mxu3  ;;  %v2494_v6 = vadd.f32 %v2493_v38, %v2405_v57  ;;  %v2317_v56 = vpop.f32.mrf.mxu0  ;;  %v8175_v25 = vld [vmem:[#allocation16_spill] sm:$0xff] }
 0x354   : > { %v2406_v47 = vpop.f32.mrf.mxu1  ;;  %v2318_v42 = vadd.f32 %v2317_v56, %v7136_v15  ;;  %v8176_v56 = vld [vmem:[#allocation17_spill] sm:$0xff] }
 0x355   : > { %v2583_v35 = vadd.f32 %v2582_v23, %v2494_v6  ;;  %v6158_v23 = vld [vmem:[#allocation3 + $0x28c] sm:$0xf]  ;;  %v5623_v6 = vld [vmem:[#allocation3 + $0x298] sm:$0xf0] }
 0x356   : > { %v2407_v50 = vadd.f32 %v2406_v47, %v2318_v42  ;;  %v5626_v47 = vor.u32 %v6158_v23, %v5623_v6  ;;  %v6094_v42 = vld [vmem:[#allocation3 + $0x8c] sm:$0xf] }
 0x357   : > { %v3408_v57 = vmax.f32 %v2583_v35, 0.0  ;;  %v6126_v6 = vld [vmem:[#allocation3 + $0x18c] sm:$0xf] }
 0x358   : > { %3144 = vmatpush.bf16.msra.mxu2 %v5626_v47 }
 0x35a   : > { %v2495_v53 = vpop.f32.mrf.mxu2 }
 0x35b   : > { %v2584_v40 = vpop.f32.mrf.mxu3  ;;  %v2496_v44 = vadd.f32 %v2495_v53, %v2407_v50  ;;  %v2320_v30 = vpop.f32.mrf.mxu0  ;;  %v5367_v50 = vld [vmem:[#allocation3 + $0x98] sm:$0xf0]  ;;  %v6190_v53 = vld [vmem:[#allocation3 + $0x38c] sm:$0xf] }
 0x35c   : > { %v2409_v13 = vpop.f32.mrf.mxu1  ;;  %v2321_v9 = vadd.f32 %v2320_v30, %v7136_v15  ;;  %v5370_v32 = vor.u32 %v6094_v42, %v5367_v50  ;;  %v5751_v30 = vld [vmem:[#allocation3 + $0x398] sm:$0xf0] }
 0x35d   : > { %v2585_v26 = vadd.f32 %v2584_v40, %v2496_v44 }
 0x35e   : > { %v2410_v41 = vadd.f32 %v2409_v13, %v2321_v9  ;;  %2635 = vmatmul.bf16.gmra.mxu0 %v8173_v24  ;;  %2724 = vmatmul.bf16.gmra.mxu1 %v8174_v29  ;;  %v5754_v9 = vor.u32 %v6190_v53, %v5751_v30  ;;  %v5495_v24 = vld [vmem:[#allocation3 + $0x198] sm:$0xf0]  ;;  %v8178_v30 = vld [vmem:[#allocation18_spill] sm:$0xff] }
 0x35f   : > { %v3412_v38 = vmax.f32 %v2585_v26, 0.0  ;;  %2813 = vmatmul.bf16.gmra.mxu2 %v8175_v25  ;;  %2966 = vmatpush.bf16.msra.mxu0 %v5370_v32  ;;  %v5498_v28 = vor.u32 %v6126_v6, %v5495_v24  ;;  %v8179_v32 = vld [vmem:[#allocation19_spill] sm:$0xff] }
 0x360   : > { %2902 = vmatmul.bf16.gmra.mxu3 %v8176_v56 }
 0x361   : > { %v7239_v40 = vpack.c.bf16 %v3412_v38, %v3408_v57  ;;  %3233 = vmatpush.bf16.msra.mxu3 %v5754_v9  ;;  %3055 = vmatpush.bf16.msra.mxu1 %v5498_v28 }
 0x362   : > { %v2498_v44 = vpop.f32.mrf.mxu2 }
 0x363   : > { %8177 = vst [vmem:[#allocation59_spill] sm:$0xff] %v7239_v40  ;;  %v2587_v13 = vpop.f32.mrf.mxu3  ;;  %v2499_v35 = vadd.f32 %v2498_v44, %v2410_v41  ;;  %v2322_v26 = vpop.f32.mrf.mxu0 }
 0x364   : > { %v2411_v29 = vpop.f32.mrf.mxu1  ;;  %v2323_v56 = vadd.f32 %v2322_v26, %v7136_v15 }
 0x365   : > { %v2588_v25 = vadd.f32 %v2587_v13, %v2499_v35 }
 0x366   : > { %v2412_v23 = vadd.f32 %v2411_v29, %v2323_v56  ;;  %v8180_v29 = vld [vmem:[#allocation20_spill] sm:$0xff]  ;;  %v8181_v56 = vld [vmem:[#allocation21_spill] sm:$0xff] }
 0x367   : > { %v3416_v44 = vmax.f32 %v2588_v25, 0.0 }
 0x36a   : > { %v2500_v42 = vpop.f32.mrf.mxu2 }
 0x36b   : > { %v2589_v50 = vpop.f32.mrf.mxu3  ;;  %v2501_v57 = vadd.f32 %v2500_v42, %v2412_v23  ;;  %v2325_v38 = vpop.f32.mrf.mxu0 }
 0x36c   : > { %v2414_v40 = vpop.f32.mrf.mxu1  ;;  %v2326_v47 = vadd.f32 %v2325_v38, %v7136_v15 }
 0x36d   : > { %v2590_v41 = vadd.f32 %v2589_v50, %v2501_v57 }
 0x36e   : > { %v2415_v53 = vadd.f32 %v2414_v40, %v2326_v47  ;;  %2640 = vmatmul.bf16.gmra.mxu0 %v8178_v30  ;;  %2729 = vmatmul.bf16.gmra.mxu1 %v8179_v32 }
 0x36f   : > { %v3420_v13 = vmax.f32 %v2590_v41, 0.0  ;;  %2818 = vmatmul.bf16.gmra.mxu2 %v8180_v29 }
 0x370   : > { %2907 = vmatmul.bf16.gmra.mxu3 %v8181_v56 }
 0x371   : > { %v7247_v24 = vpack.c.bf16 %v3420_v13, %v3416_v44  ;;  %v8183_v44 = vld [vmem:[#allocation22_spill] sm:$0xff]  ;;  %v8184_v13 = vld [vmem:[#allocation23_spill] sm:$0xff] }
 0x372   : > { %v2503_v28 = vpop.f32.mrf.mxu2 }
 0x373   : > { %8182 = vst [vmem:[#allocation60_spill] sm:$0xff] %v7247_v24  ;;  %v2592_v9 = vpop.f32.mrf.mxu3  ;;  %v2504_v35 = vadd.f32 %v2503_v28, %v2415_v53  ;;  %v2327_v26 = vpop.f32.mrf.mxu0  ;;  %v8185_v24 = vld [vmem:[#allocation24_spill] sm:$0xff] }
 0x374   : > { %v2416_v23 = vpop.f32.mrf.mxu1  ;;  %v2328_v6 = vadd.f32 %v2327_v26, %v7136_v15  ;;  %v8186_v26 = vld [vmem:[#allocation25_spill] sm:$0xff] }
 0x375   : > { %v2593_v40 = vadd.f32 %v2592_v9, %v2504_v35  ;;  %v6154_v9 = vld [vmem:[#allocation3 + $0x26c] sm:$0xf]  ;;  %v5607_v35 = vld [vmem:[#allocation3 + $0x278] sm:$0xf0] }
 0x376   : > { %v2417_v42 = vadd.f32 %v2416_v23, %v2328_v6  ;;  %v5610_v23 = vor.u32 %v6154_v9, %v5607_v35  ;;  %v6090_v6 = vld [vmem:[#allocation3 + $0x6c] sm:$0xf] }
 0x377   : > { %v3424_v53 = vmax.f32 %v2593_v40, 0.0  ;;  %v6122_v35 = vld [vmem:[#allocation3 + $0x16c] sm:$0xf] }
 0x378   : > { %3145 = vmatpush.bf16.msra.mxu2 %v5610_v23 }
 0x37a   : > { %v2505_v50 = vpop.f32.mrf.mxu2 }
 0x37b   : > { %v2594_v57 = vpop.f32.mrf.mxu3  ;;  %v2506_v38 = vadd.f32 %v2505_v50, %v2417_v42  ;;  %v2330_v25 = vpop.f32.mrf.mxu0  ;;  %v5351_v42 = vld [vmem:[#allocation3 + $0x78] sm:$0xf0]  ;;  %v6186_v50 = vld [vmem:[#allocation3 + $0x36c] sm:$0xf] }
 0x37c   : > { %v2419_v47 = vpop.f32.mrf.mxu1  ;;  %v2331_v41 = vadd.f32 %v2330_v25, %v7136_v15  ;;  %v5354_v32 = vor.u32 %v6090_v6, %v5351_v42  ;;  %v5735_v25 = vld [vmem:[#allocation3 + $0x378] sm:$0xf0] }
 0x37d   : > { %v2595_v29 = vadd.f32 %v2594_v57, %v2506_v38 }
 0x37e   : > { %v2420_v56 = vadd.f32 %v2419_v47, %v2331_v41  ;;  %2645 = vmatmul.bf16.gmra.mxu0 %v8183_v44  ;;  %2734 = vmatmul.bf16.gmra.mxu1 %v8184_v13  ;;  %v5738_v41 = vor.u32 %v6186_v50, %v5735_v25  ;;  %v5479_v44 = vld [vmem:[#allocation3 + $0x178] sm:$0xf0] }
 0x37f   : > { %v3428_v28 = vmax.f32 %v2595_v29, 0.0  ;;  %2823 = vmatmul.bf16.gmra.mxu2 %v8185_v24  ;;  %2967 = vmatpush.bf16.msra.mxu0 %v5354_v32  ;;  %v5482_v30 = vor.u32 %v6122_v35, %v5479_v44 }
 0x380   : > { %2912 = vmatmul.bf16.gmra.mxu3 %v8186_v26 }
 0x381   : > { %v7255_v57 = vpack.c.bf16 %v3428_v28, %v3424_v53  ;;  %3234 = vmatpush.bf16.msra.mxu3 %v5738_v41  ;;  %3056 = vmatpush.bf16.msra.mxu1 %v5482_v30 }
 0x382   : > { %v2508_v38 = vpop.f32.mrf.mxu2 }
 0x383   : > { %8187 = vst [vmem:[#allocation61_spill] sm:$0xff] %v7255_v57  ;;  %v2597_v47 = vpop.f32.mrf.mxu3  ;;  %v2509_v40 = vadd.f32 %v2508_v38, %v2420_v56  ;;  %v2332_v29 = vpop.f32.mrf.mxu0 }
 0x384   : > { %v2421_v13 = vpop.f32.mrf.mxu1  ;;  %v2333_v26 = vadd.f32 %v2332_v29, %v7136_v15 }
 0x385   : > { %v2598_v24 = vadd.f32 %v2597_v47, %v2509_v40 }
 0x386   : > { %v2422_v9 = vadd.f32 %v2421_v13, %v2333_v26  ;;  %v8188_v13 = vld [vmem:[#allocation26_spill] sm:$0xff] }
 0x387   : > { %v3432_v32 = vmax.f32 %v2598_v24, 0.0  ;;  %v7269_v24 = vld [vmem:[%s7981_s4] sm:$0xf] }
 0x388   : > { %8190 = vst [vmem:[#allocation63_spill] sm:$0xff] %v7269_v24 }
 0x38a   : > { %v2510_v6 = vpop.f32.mrf.mxu2 }
 0x38b   : > { %v2599_v42 = vpop.f32.mrf.mxu3  ;;  %v2511_v53 = vadd.f32 %v2510_v6, %v2422_v9  ;;  %v2335_v28 = vpop.f32.mrf.mxu0  ;;  %v7272_v9 = vperm.slane %v7269_v24, 2 }
 0x38c   : > { %v2424_v57 = vpop.f32.mrf.mxu1  ;;  %v2336_v23 = vadd.f32 %v2335_v28, %v7136_v15 }
 0x38d   : > { %v2600_v56 = vadd.f32 %v2599_v42, %v2511_v53 }
 0x38e   : > { %v2425_v50 = vadd.f32 %v2424_v57, %v2336_v23  ;;  %2650 = vmatmul.bf16.gmra.mxu0 %v6829_v60  ;;  %2739 = vmatmul.bf16.gmra.mxu1 %v6831_v61 }
 0x38f   : > { %v3436_v25 = vmax.f32 %v2600_v56, 0.0  ;;  %2828 = vmatmul.bf16.gmra.mxu2 %v6839_v22 }
 0x390   : > { %2917 = vmatmul.bf16.gmra.mxu3 %v8188_v13 }
 0x391   : > { %v7263_v44 = vpack.c.bf16 %v3436_v25, %v3432_v32  ;;  %v8192_v32 = vld [vmem:[#allocation28_spill] sm:$0xff] }
 0x392   : > { %v2513_v30 = vpop.f32.mrf.mxu2 }
 0x393   : > { %8189 = vst [vmem:[#allocation62_spill] sm:$0xff] %v7263_v44  ;;  %v2602_v26 = vpop.f32.mrf.mxu3  ;;  %v2514_v38 = vadd.f32 %v2513_v30, %v2425_v50  ;;  %v2337_v47 = vpop.f32.mrf.mxu0  ;;  %v6182_v44 = vld [vmem:[#allocation3 + $0x34c] sm:$0xf] }
 0x394   : > { %v2426_v41 = vpop.f32.mrf.mxu1  ;;  %v2338_v40 = vadd.f32 %v2337_v47, %v7136_v15  ;;  %v8191_v15 = vld [vmem:[#allocation27_spill] sm:$0xff]  ;;  %v6150_v47 = vld [vmem:[#allocation3 + $0x24c] sm:$0xf] }
 0x395   : > { %v2603_v57 = vadd.f32 %v2602_v26, %v2514_v38  ;;  %v8193_v26 = vld [vmem:[#allocation29_spill] sm:$0xff]  ;;  %v8194_v38 = vld [vmem:[#allocation30_spill] sm:$0xff] }
 0x396   : > { %v2427_v29 = vadd.f32 %v2426_v41, %v2338_v40  ;;  %v5591_v41 = vld [vmem:[#allocation3 + $0x258] sm:$0xf0] }
 0x397   : > { %v3440_v25 = vmax.f32 %v2603_v57, 0.0  ;;  %v5594_v40 = vor.u32 %v6150_v47, %v5591_v41  ;;  %v6118_v41 = vld [vmem:[#allocation3 + $0x14c] sm:$0xf] }
 0x399   : > { %3146 = vmatpush.bf16.msra.mxu2 %v5594_v40 }
 0x39a   : > { %v2515_v35 = vpop.f32.mrf.mxu2 }
 0x39b   : > { %v2604_v6 = vpop.f32.mrf.mxu3  ;;  %v2516_v42 = vadd.f32 %v2515_v35, %v2427_v29  ;;  %v2616_v53 = vpop.f32.mrf.mxu0  ;;  %v6086_v29 = vld [vmem:[#allocation3 + $0x4c] sm:$0xf]  ;;  %v5335_v35 = vld [vmem:[#allocation3 + $0x58] sm:$0xf0] }
 0x39c   : > { %v2705_v28 = vpop.f32.mrf.mxu1  ;;  %v2617_v23 = vadd.f32 %v2616_v53, %v7272_v9  ;;  %v5338_v24 = vor.u32 %v6086_v29, %v5335_v35  ;;  %v5719_v53 = vld [vmem:[#allocation3 + $0x358] sm:$0xf0] }
 0x39d   : > { %v2605_v56 = vadd.f32 %v2604_v6, %v2516_v42 }
 0x39e   : > { %v2706_v50 = vadd.f32 %v2705_v28, %v2617_v23  ;;  %2655 = vmatmul.bf16.gmra.mxu0 %v8191_v15  ;;  %2744 = vmatmul.bf16.gmra.mxu1 %v8192_v32  ;;  %v5722_v23 = vor.u32 %v6182_v44, %v5719_v53  ;;  %v5463_v15 = vld [vmem:[#allocation3 + $0x158] sm:$0xf0] }
 0x39f   : > { %v3444_v30 = vmax.f32 %v2605_v56, 0.0  ;;  %2833 = vmatmul.bf16.gmra.mxu2 %v8193_v26  ;;  %2968 = vmatpush.bf16.msra.mxu0 %v5338_v24  ;;  %v5466_v13 = vor.u32 %v6118_v41, %v5463_v15 }
 0x3a0   : > { %2922 = vmatmul.bf16.gmra.mxu3 %v8194_v38 }
 0x3a1   : > { %v7279_v6 = vpack.c.bf16 %v3444_v30, %v3440_v25  ;;  %3235 = vmatpush.bf16.msra.mxu3 %v5722_v23  ;;  %3057 = vmatpush.bf16.msra.mxu1 %v5466_v13 }
 0x3a2   : > { %v2794_v42 = vpop.f32.mrf.mxu2 }
 0x3a3   : > { %8195 = vst [vmem:[#allocation64_spill] sm:$0xff] %v7279_v6  ;;  %v2883_v28 = vpop.f32.mrf.mxu3  ;;  %v2795_v57 = vadd.f32 %v2794_v42, %v2706_v50  ;;  %v2618_v56 = vpop.f32.mrf.mxu0 }
 0x3a4   : > { %v2707_v32 = vpop.f32.mrf.mxu1  ;;  %v2619_v38 = vadd.f32 %v2618_v56, %v7272_v9 }
 0x3a5   : > { %v2884_v26 = vadd.f32 %v2883_v28, %v2795_v57 }
 0x3a6   : > { %v2708_v47 = vadd.f32 %v2707_v32, %v2619_v38 }
 0x3a7   : > { %v3321_v24 = vmax.f32 %v2884_v26, 0.0 }
 0x3aa   : > { %v2796_v29 = vpop.f32.mrf.mxu2 }
 0x3ab   : > { %v2885_v35 = vpop.f32.mrf.mxu3  ;;  %v2797_v25 = vadd.f32 %v2796_v29, %v2708_v47  ;;  %v2621_v30 = vpop.f32.mrf.mxu0 }
 0x3ac   : > { %v2710_v6 = vpop.f32.mrf.mxu1  ;;  %v2622_v44 = vadd.f32 %v2621_v30, %v7272_v9 }
 0x3ad   : > { %v2886_v50 = vadd.f32 %v2885_v35, %v2797_v25 }
 0x3ae   : > { %v2711_v40 = vadd.f32 %v2710_v6, %v2622_v44  ;;  %2660 = vmatmul.bf16.gmra.mxu0 %v6869_v20  ;;  %2749 = vmatmul.bf16.gmra.mxu1 %v6871_v21 }
 0x3af   : > { %v3325_v53 = vmax.f32 %v2886_v50, 0.0  ;;  %2838 = vmatmul.bf16.gmra.mxu2 %v6879_v62 }
 0x3b0   : > { %2927 = vmatmul.bf16.gmra.mxu3 %v6881_v58 }
 0x3b1   : > { %v7287_v15 = vpack.c.bf16 %v3325_v53, %v3321_v24  ;;  %v6146_v24 = vld [vmem:[#allocation3 + $0x22c] sm:$0xf]  ;;  %v5575_v53 = vld [vmem:[#allocation3 + $0x238] sm:$0xf0] }
 0x3b2   : > { %v2799_v13 = vpop.f32.mrf.mxu2 }
 0x3b3   : > { %8196 = vst [vmem:[#allocation65_spill] sm:$0xff] %v7287_v15  ;;  %v2888_v32 = vpop.f32.mrf.mxu3  ;;  %v2800_v38 = vadd.f32 %v2799_v13, %v2711_v40  ;;  %v2623_v42 = vpop.f32.mrf.mxu0  ;;  %v8197_v40 = vld [vmem:[#allocation31_spill] sm:$0xff]  ;;  %v5578_v13 = vor.u32 %v6146_v24, %v5575_v53  ;;  %v6114_v53 = vld [vmem:[#allocation3 + $0x12c] sm:$0xf]  ;;  %v5447_v15 = vld [vmem:[#allocation3 + $0x138] sm:$0xf0] }
 0x3b4   : > { %v2712_v28 = vpop.f32.mrf.mxu1  ;;  %v2624_v23 = vadd.f32 %v2623_v42, %v7272_v9  ;;  %v6178_v42 = vld [vmem:[#allocation3 + $0x32c] sm:$0xf] }
 0x3b5   : > { %v2889_v6 = vadd.f32 %v2888_v32, %v2800_v38  ;;  %v6082_v32 = vld [vmem:[#allocation3 + $0x2c] sm:$0xf]  ;;  %v5319_v38 = vld [vmem:[#allocation3 + $0x38] sm:$0xf0]  ;;  %3147 = vmatpush.bf16.msra.mxu2 %v5578_v13 }
 0x3b6   : > { %v2713_v57 = vadd.f32 %v2712_v28, %v2624_v23  ;;  %v5322_v28 = vor.u32 %v6082_v32, %v5319_v38  ;;  %v5703_v23 = vld [vmem:[#allocation3 + $0x338] sm:$0xf0] }
 0x3b7   : > { %v3329_v44 = vmax.f32 %v2889_v6, 0.0 }
 0x3b8   : > { %2969 = vmatpush.bf16.msra.mxu0 %v5322_v28 }
 0x3ba   : > { %v2801_v56 = vpop.f32.mrf.mxu2 }
 0x3bb   : > { %v2890_v47 = vpop.f32.mrf.mxu3  ;;  %v2802_v41 = vadd.f32 %v2801_v56, %v2713_v57  ;;  %v2626_v26 = vpop.f32.mrf.mxu0 }
 0x3bc   : > { %v2715_v29 = vpop.f32.mrf.mxu1  ;;  %v2627_v35 = vadd.f32 %v2626_v26, %v7272_v9 }
 0x3bd   : > { %v2891_v25 = vadd.f32 %v2890_v47, %v2802_v41  ;;  %v5706_v41 = vor.u32 %v6178_v42, %v5703_v23 }
 0x3be   : > { %v2716_v30 = vadd.f32 %v2715_v29, %v2627_v35  ;;  %2665 = vmatmul.bf16.gmra.mxu0 %v6889_v11  ;;  %2754 = vmatmul.bf16.gmra.mxu1 %v6891_v45 }
 0x3bf   : > { %v3333_v50 = vmax.f32 %v2891_v25, 0.0  ;;  %2843 = vmatmul.bf16.gmra.mxu2 %v6899_v19  ;;  %3236 = vmatpush.bf16.msra.mxu3 %v5706_v41 }
 0x3c0   : > { %2932 = vmatmul.bf16.gmra.mxu3 %v8197_v40  ;;  %v5450_v40 = vor.u32 %v6114_v53, %v5447_v15 }
 0x3c1   : > { %v7295_v57 = vpack.c.bf16 %v3333_v50, %v3329_v44 }
 0x3c2   : > { %v2804_v56 = vpop.f32.mrf.mxu2  ;;  %3058 = vmatpush.bf16.msra.mxu1 %v5450_v40 }
 0x3c3   : > { %8198 = vst [vmem:[#allocation66_spill] sm:$0xff] %v7295_v57  ;;  %v2893_v47 = vpop.f32.mrf.mxu3  ;;  %v2805_v6 = vadd.f32 %v2804_v56, %v2716_v30  ;;  %v2628_v26 = vpop.f32.mrf.mxu0 }
 0x3c4   : > { %v2717_v29 = vpop.f32.mrf.mxu1  ;;  %v2629_v35 = vadd.f32 %v2628_v26, %v7272_v9 }
 0x3c5   : > { %v2894_v25 = vadd.f32 %v2893_v47, %v2805_v6 }
 0x3c6   : > { %v2718_v24 = vadd.f32 %v2717_v29, %v2629_v35 }
 0x3c7   : > { %v3337_v28 = vmax.f32 %v2894_v25, 0.0 }
 0x3ca   : > { %v2806_v32 = vpop.f32.mrf.mxu2 }
 0x3cb   : > { %v2895_v38 = vpop.f32.mrf.mxu3  ;;  %v2807_v44 = vadd.f32 %v2806_v32, %v2718_v24  ;;  %v2631_v50 = vpop.f32.mrf.mxu0 }
 0x3cc   : > { %v2720_v57 = vpop.f32.mrf.mxu1  ;;  %v2632_v13 = vadd.f32 %v2631_v50, %v7272_v9 }
 0x3cd   : > { %v2896_v30 = vadd.f32 %v2895_v38, %v2807_v44 }
 0x3ce   : > { %v2721_v42 = vadd.f32 %v2720_v57, %v2632_v13  ;;  %2670 = vmatmul.bf16.gmra.mxu0 %v6909_v54  ;;  %2759 = vmatmul.bf16.gmra.mxu1 %v6911_v59 }
 0x3cf   : > { %v3341_v23 = vmax.f32 %v2896_v30, 0.0  ;;  %2848 = vmatmul.bf16.gmra.mxu2 %v6919_v31 }
 0x3d0   : > { %2937 = vmatmul.bf16.gmra.mxu3 %v6921_v43 }
 0x3d1   : > { %v7303_v15 = vpack.c.bf16 %v3341_v23, %v3337_v28  ;;  %v5559_v28 = vld [vmem:[#allocation3 + $0x218] sm:$0xf0] }
 0x3d2   : > { %v2809_v40 = vpop.f32.mrf.mxu2 }
 0x3d3   : > { %8199 = vst [vmem:[#allocation67_spill] sm:$0xff] %v7303_v15  ;;  %v2898_v56 = vpop.f32.mrf.mxu3  ;;  %v2810_v47 = vadd.f32 %v2809_v40, %v2721_v42  ;;  %v2633_v41 = vpop.f32.mrf.mxu0  ;;  %v6142_v42 = vld [vmem:[#allocation3 + $0x20c] sm:$0xf] }
 0x3d4   : > { %v2722_v6 = vpop.f32.mrf.mxu1  ;;  %v2634_v26 = vadd.f32 %v2633_v41, %v7272_v9  ;;  %v5562_v23 = vor.u32 %v6142_v42, %v5559_v28  ;;  %v6078_v40 = vld [vmem:[#allocation3 + $0xc] sm:$0xf]  ;;  %v5431_v28 = vld [vmem:[#allocation3 + $0x118] sm:$0xf0] }
 0x3d5   : > { %v2899_v57 = vadd.f32 %v2898_v56, %v2810_v47  ;;  %v5303_v56 = vld [vmem:[#allocation3 + $0x18] sm:$0xf0]  ;;  %v6174_v47 = vld [vmem:[#allocation3 + $0x30c] sm:$0xf] }
 0x3d6   : > { %v2723_v29 = vadd.f32 %v2722_v6, %v2634_v26  ;;  %v5306_v41 = vor.u32 %v6078_v40, %v5303_v56  ;;  %v5687_v6 = vld [vmem:[#allocation3 + $0x318] sm:$0xf0]  ;;  %3148 = vmatpush.bf16.msra.mxu2 %v5562_v23  ;;  %v6110_v42 = vld [vmem:[#allocation3 + $0x10c] sm:$0xf] }
 0x3d7   : > { %v3345_v13 = vmax.f32 %v2899_v57, 0.0  ;;  %v5434_v15 = vor.u32 %v6110_v42, %v5431_v28 }
 0x3d8   : > { %2970 = vmatpush.bf16.msra.mxu0 %v5306_v41 }
 0x3d9   : > { %3059 = vmatpush.bf16.msra.mxu1 %v5434_v15 }
 0x3da   : > { %v2811_v35 = vpop.f32.mrf.mxu2 }
 0x3db   : > { %v2900_v24 = vpop.f32.mrf.mxu3  ;;  %v2812_v53 = vadd.f32 %v2811_v35, %v2723_v29  ;;  %v2636_v25 = vpop.f32.mrf.mxu0 }
 0x3dc   : > { %v2725_v32 = vpop.f32.mrf.mxu1  ;;  %v2637_v38 = vadd.f32 %v2636_v25, %v7272_v9 }
 0x3dd   : > { %v2901_v44 = vadd.f32 %v2900_v24, %v2812_v53  ;;  %v5690_v24 = vor.u32 %v6174_v47, %v5687_v6 }
 0x3de   : > { %v2726_v50 = vadd.f32 %v2725_v32, %v2637_v38  ;;  %2675 = vmatmul.bf16.gmra.mxu0 %v6929_v46  ;;  %2764 = vmatmul.bf16.gmra.mxu1 %v6931_v5 }
 0x3df   : > { %v3349_v30 = vmax.f32 %v2901_v44, 0.0  ;;  %2853 = vmatmul.bf16.gmra.mxu2 %v6939_v36  ;;  %3237 = vmatpush.bf16.msra.mxu3 %v5690_v24 }
 0x3e0   : > { %2942 = vmatmul.bf16.gmra.mxu3 %v6941_v12 }
 0x3e1   : > { %v7311_v26 = vpack.c.bf16 %v3349_v30, %v3345_v13 }
 0x3e2   : > { %v2814_v29 = vpop.f32.mrf.mxu2 }
 0x3e3   : > { %8200 = vst [vmem:[#allocation68_spill] sm:$0xff] %v7311_v26  ;;  %v2903_v35 = vpop.f32.mrf.mxu3  ;;  %v2815_v57 = vadd.f32 %v2814_v29, %v2726_v50  ;;  %v2638_v53 = vpop.f32.mrf.mxu0 }
 0x3e4   : > { %v2727_v25 = vpop.f32.mrf.mxu1  ;;  %v2639_v32 = vadd.f32 %v2638_v53, %v7272_v9 }
 0x3e5   : > { %v2904_v38 = vadd.f32 %v2903_v35, %v2815_v57 }
 0x3e6   : > { %v2728_v44 = vadd.f32 %v2727_v25, %v2639_v32 }
 0x3e7   : > { %v3353_v41 = vmax.f32 %v2904_v38, 0.0 }
 0x3ea   : > { %v2816_v40 = vpop.f32.mrf.mxu2 }
 0x3eb   : > { %v2905_v56 = vpop.f32.mrf.mxu3  ;;  %v2817_v13 = vadd.f32 %v2816_v40, %v2728_v44  ;;  %v2641_v30 = vpop.f32.mrf.mxu0 }
 0x3ec   : > { %v2730_v26 = vpop.f32.mrf.mxu1  ;;  %v2642_v23 = vadd.f32 %v2641_v30, %v7272_v9 }
 0x3ed   : > { %v2906_v50 = vadd.f32 %v2905_v56, %v2817_v13 }
 0x3ee   : > { %v2731_v47 = vadd.f32 %v2730_v26, %v2642_v23  ;;  %2680 = vmatmul.bf16.gmra.mxu0 %v6949_v4  ;;  %2769 = vmatmul.bf16.gmra.mxu1 %v6951_v27 }
 0x3ef   : > { %v3357_v6 = vmax.f32 %v2906_v50, 0.0  ;;  %2858 = vmatmul.bf16.gmra.mxu2 %v6959_v8 }
 0x3f0   : > { %2947 = vmatmul.bf16.gmra.mxu3 %v6961_v37 }
 0x3f1   : > { %v7319_v29 = vpack.c.bf16 %v3357_v6, %v3353_v41  ;;  %v6252_v41 = vld [vmem:[#allocation5 + $0x174] sm:$0xf0] }
 0x3f2   : > { %v2819_v15 = vpop.f32.mrf.mxu2 }
 0x3f3   : > { %8201 = vst [vmem:[#allocation69_spill] sm:$0xff] %v7319_v29  ;;  %v2908_v35 = vpop.f32.mrf.mxu3  ;;  %v2820_v24 = vadd.f32 %v2819_v15, %v2731_v47  ;;  %v2643_v57 = vpop.f32.mrf.mxu0  ;;  %v5989_v47 = vld [vmem:[#allocation5 + $0x170] sm:$0xf] }
 0x3f4   : > { %v2732_v53 = vpop.f32.mrf.mxu1  ;;  %v2644_v25 = vadd.f32 %v2643_v57, %v7272_v9  ;;  %v5990_v6 = vor.u32 %v6252_v41, %v5989_v47  ;;  %v5861_v15 = vld [vmem:[#allocation5 + $0x70] sm:$0xf]  ;;  %v6236_v41 = vld [vmem:[#allocation5 + $0xf4] sm:$0xf0] }
 0x3f5   : > { %v2909_v26 = vadd.f32 %v2908_v35, %v2820_v24  ;;  %v6220_v35 = vld [vmem:[#allocation5 + $0x74] sm:$0xf0]  ;;  %v6053_v24 = vld [vmem:[#allocation5 + $0x1f0] sm:$0xf] }
 0x3f6   : > { %v2733_v32 = vadd.f32 %v2732_v53, %v2644_v25  ;;  %v5862_v57 = vor.u32 %v6220_v35, %v5861_v15  ;;  %v6268_v53 = vld [vmem:[#allocation5 + $0x1f4] sm:$0xf0]  ;;  %4079 = vmatpush.bf16.msrb.mxu2 %v5990_v6  ;;  %v5925_v47 = vld [vmem:[#allocation5 + $0xf0] sm:$0xf] }
 0x3f7   : > { %v3361_v23 = vmax.f32 %v2909_v26, 0.0  ;;  %v5926_v29 = vor.u32 %v6236_v41, %v5925_v47 }
 0x3f8   : > { %3901 = vmatpush.bf16.msrb.mxu0 %v5862_v57 }
 0x3f9   : > { %3990 = vmatpush.bf16.msrb.mxu1 %v5926_v29 }
 0x3fa   : > { %v2821_v44 = vpop.f32.mrf.mxu2 }
 0x3fb   : > { %v2910_v42 = vpop.f32.mrf.mxu3  ;;  %v2822_v28 = vadd.f32 %v2821_v44, %v2733_v32  ;;  %v2646_v38 = vpop.f32.mrf.mxu0 }
 0x3fc   : > { %v2735_v40 = vpop.f32.mrf.mxu1  ;;  %v2647_v56 = vadd.f32 %v2646_v38, %v7272_v9 }
 0x3fd   : > { %v2911_v13 = vadd.f32 %v2910_v42, %v2822_v28  ;;  %v6054_v42 = vor.u32 %v6268_v53, %v6053_v24 }
 0x3fe   : > { %v2736_v30 = vadd.f32 %v2735_v40, %v2647_v56  ;;  %2685 = vmatmul.bf16.gmra.mxu0 %v6969_v7  ;;  %2774 = vmatmul.bf16.gmra.mxu1 %v6971_v14 }
 0x3ff   : > { %v3365_v50 = vmax.f32 %v2911_v13, 0.0  ;;  %2863 = vmatmul.bf16.gmra.mxu2 %v6979_v10  ;;  %4168 = vmatpush.bf16.msrb.mxu3 %v6054_v42 }
 0x400   : > { %2952 = vmatmul.bf16.gmra.mxu3 %v6981_v55 }
 0x401   : > { %v7327_v25 = vpack.c.bf16 %v3365_v50, %v3361_v23 }
 0x402   : > { %v2824_v32 = vpop.f32.mrf.mxu2 }
 0x403   : > { %8202 = vst [vmem:[#allocation70_spill] sm:$0xff] %v7327_v25  ;;  %v2913_v44 = vpop.f32.mrf.mxu3  ;;  %v2825_v26 = vadd.f32 %v2824_v32, %v2736_v30  ;;  %v2648_v28 = vpop.f32.mrf.mxu0 }
 0x404   : > { %v2737_v38 = vpop.f32.mrf.mxu1  ;;  %v2649_v40 = vadd.f32 %v2648_v28, %v7272_v9 }
 0x405   : > { %v2914_v56 = vadd.f32 %v2913_v44, %v2825_v26 }
 0x406   : > { %v2738_v13 = vadd.f32 %v2737_v38, %v2649_v40 }
 0x407   : > { %v3369_v57 = vmax.f32 %v2914_v56, 0.0 }
 0x40a   : > { %v2826_v15 = vpop.f32.mrf.mxu2 }
 0x40b   : > { %v2915_v35 = vpop.f32.mrf.mxu3  ;;  %v2827_v23 = vadd.f32 %v2826_v15, %v2738_v13  ;;  %v2651_v50 = vpop.f32.mrf.mxu0 }
 0x40c   : > { %v2740_v25 = vpop.f32.mrf.mxu1  ;;  %v2652_v6 = vadd.f32 %v2651_v50, %v7272_v9 }
 0x40d   : > { %v2916_v30 = vadd.f32 %v2915_v35, %v2827_v23 }
 0x40e   : > { %v2741_v24 = vadd.f32 %v2740_v25, %v2652_v6  ;;  %2690 = vmatmul.bf16.gmra.mxu0 %v6994_v39  ;;  %2779 = vmatmul.bf16.gmra.mxu1 %v6996_v1 }
 0x40f   : > { %v3373_v53 = vmax.f32 %v2916_v30, 0.0  ;;  %2868 = vmatmul.bf16.gmra.mxu2 %v7008_v48 }
 0x410   : > { %2957 = vmatmul.bf16.gmra.mxu3 %v7010_v49 }
 0x411   : > { %v7335_v32 = vpack.c.bf16 %v3373_v53, %v3369_v57  ;;  %v6250_v57 = vld [vmem:[#allocation5 + $0x164] sm:$0xf0] }
 0x412   : > { %v2829_v29 = vpop.f32.mrf.mxu2 }
 0x413   : > { %8203 = vst [vmem:[#allocation71_spill] sm:$0xff] %v7335_v32  ;;  %v2918_v44 = vpop.f32.mrf.mxu3  ;;  %v2830_v42 = vadd.f32 %v2829_v29, %v2741_v24  ;;  %v2653_v26 = vpop.f32.mrf.mxu0  ;;  %v5981_v24 = vld [vmem:[#allocation5 + $0x160] sm:$0xf] }
 0x414   : > { %v2742_v28 = vpop.f32.mrf.mxu1  ;;  %v2654_v38 = vadd.f32 %v2653_v26, %v7272_v9  ;;  %v5982_v53 = vor.u32 %v6250_v57, %v5981_v24  ;;  %v5853_v29 = vld [vmem:[#allocation5 + $0x60] sm:$0xf] }
 0x415   : > { %v2919_v25 = vadd.f32 %v2918_v44, %v2830_v42  ;;  %v6218_v44 = vld [vmem:[#allocation5 + $0x64] sm:$0xf0]  ;;  %v6045_v42 = vld [vmem:[#allocation5 + $0x1e0] sm:$0xf] }
 0x416   : > { %v2743_v40 = vadd.f32 %v2742_v28, %v2654_v38  ;;  %v5854_v26 = vor.u32 %v6218_v44, %v5853_v29  ;;  %v6266_v28 = vld [vmem:[#allocation5 + $0x1e4] sm:$0xf0]  ;;  %4080 = vmatpush.bf16.msrb.mxu2 %v5982_v53 }
 0x417   : > { %v3377_v6 = vmax.f32 %v2919_v25, 0.0 }
 0x418   : > { %3902 = vmatpush.bf16.msrb.mxu0 %v5854_v26 }
 0x41a   : > { %v2831_v13 = vpop.f32.mrf.mxu2 }
 0x41b   : > { %v2920_v47 = vpop.f32.mrf.mxu3  ;;  %v2832_v41 = vadd.f32 %v2831_v13, %v2743_v40  ;;  %v2656_v56 = vpop.f32.mrf.mxu0 }
 0x41c   : > { %v2745_v15 = vpop.f32.mrf.mxu1  ;;  %v2657_v35 = vadd.f32 %v2656_v56, %v7272_v9  ;;  %v5917_v56 = vld [vmem:[#allocation5 + $0xe0] sm:$0xf] }
 0x41d   : > { %v2921_v23 = vadd.f32 %v2920_v47, %v2832_v41 }
 0x41e   : > { %v2746_v50 = vadd.f32 %v2745_v15, %v2657_v35  ;;  %2971 = vmatmul.bf16.vlgmr.msra.gmra.mxu0 %v6682_v51  ;;  %3060 = vmatmul.bf16.vlgmr.msra.gmra.mxu1 %v6684_v52  ;;  %v6046_v52 = vor.u32 %v6266_v28, %v6045_v42  ;;  %v6234_v15 = vld [vmem:[#allocation5 + $0xe4] sm:$0xf0] }
 0x41f   : > { %v3381_v30 = vmax.f32 %v2921_v23, 0.0  ;;  %3149 = vmatmul.bf16.vlgmr.msra.gmra.mxu2 %v6693_v2  ;;  %v5918_v35 = vor.u32 %v6234_v15, %v5917_v56 }
 0x420   : > { %3238 = vmatmul.bf16.vlgmr.msra.gmra.mxu3 %v6695_v3 }
 0x421   : > { %v7343_v38 = vpack.c.bf16 %v3381_v30, %v3377_v6  ;;  %4169 = vmatpush.bf16.msrb.mxu3 %v6046_v52  ;;  %3991 = vmatpush.bf16.msrb.mxu1 %v5918_v35 }
 0x422   : > { %v2834_v40 = vpop.f32.mrf.mxu2 }
 0x423   : > { %v2923_v51 = vpop.f32.mrf.mxu3  ;;  %v2835_v25 = vadd.f32 %v2834_v40, %v2746_v50  ;;  %v2658_v13 = vpop.f32.mrf.mxu0 }
 0x424   : > { %v2747_v47 = vpop.f32.mrf.mxu1  ;;  %v2659_v2 = vadd.f32 %v2658_v13, %v7272_v9 }
 0x425   : > { %v2924_v3 = vadd.f32 %v2923_v51, %v2835_v25 }
 0x426   : > { %v2748_v41 = vadd.f32 %v2747_v47, %v2659_v2 }
 0x427   : > { %v3385_v44 = vmax.f32 %v2924_v3, 0.0 }
 0x42a   : > { %v2836_v23 = vpop.f32.mrf.mxu2 }
 0x42b   : > { %v2925_v24 = vpop.f32.mrf.mxu3  ;;  %v2837_v6 = vadd.f32 %v2836_v23, %v2748_v41  ;;  %v2661_v30 = vpop.f32.mrf.mxu0 }
 0x42c   : > { %v2750_v57 = vpop.f32.mrf.mxu1  ;;  %v2662_v53 = vadd.f32 %v2661_v30, %v7272_v9  ;;  %v6248_v30 = vld [vmem:[#allocation5 + $0x154] sm:$0xf0] }
 0x42d   : > { %v2926_v50 = vadd.f32 %v2925_v24, %v2837_v6  ;;  %v8205_v24 = vld [vmem:[#allocation9_spill] sm:$0xff]  ;;  %v5973_v6 = vld [vmem:[#allocation5 + $0x150] sm:$0xf] }
 0x42e   : > { %v2751_v29 = vadd.f32 %v2750_v57, %v2662_v53  ;;  %2976 = vmatmul.bf16.gmra.mxu0 %v6703_v16  ;;  %3065 = vmatmul.bf16.gmra.mxu1 %v6705_v17  ;;  %v5974_v57 = vor.u32 %v6248_v30, %v5973_v6  ;;  %v5845_v53 = vld [vmem:[#allocation5 + $0x50] sm:$0xf] }
 0x42f   : > { %v3389_v42 = vmax.f32 %v2926_v50, 0.0  ;;  %3154 = vmatmul.bf16.gmra.mxu2 %v6714_v33  ;;  %v6216_v50 = vld [vmem:[#allocation5 + $0x54] sm:$0xf0]  ;;  %v8208_v6 = vld [vmem:[#allocation11_spill] sm:$0xff] }
 0x430   : > { %3243 = vmatmul.bf16.gmra.mxu3 %v6716_v34  ;;  %4081 = vmatpush.bf16.msrb.mxu2 %v5974_v57 }
 0x431   : > { %v7351_v26 = vpack.c.bf16 %v3389_v42, %v3385_v44  ;;  %v5846_v44 = vor.u32 %v6216_v50, %v5845_v53  ;;  %v6264_v42 = vld [vmem:[#allocation5 + $0x1d4] sm:$0xf0]  ;;  %v8210_v50 = vld [vmem:[#allocation13_spill] sm:$0xff] }
 0x432   : > { %v2839_v28 = vpop.f32.mrf.mxu2  ;;  %v8209_v53 = vld [vmem:[#allocation12_spill] sm:$0xff] }
 0x433   : > { %8204 = vst [vmem:[#allocation72_spill] sm:$0xff] %v7351_v26  ;;  %v2928_v40 = vpop.f32.mrf.mxu3  ;;  %v2840_v51 = vadd.f32 %v2839_v28, %v2751_v29  ;;  %v2663_v52 = vpop.f32.mrf.mxu0  ;;  %v6037_v29 = vld [vmem:[#allocation5 + $0x1d0] sm:$0xf]  ;;  %3903 = vmatpush.bf16.msrb.mxu0 %v5846_v44 }
 0x434   : > { %v2752_v25 = vpop.f32.mrf.mxu1  ;;  %v2664_v13 = vadd.f32 %v2663_v52, %v7272_v9 }
 0x435   : > { %v2929_v47 = vadd.f32 %v2928_v40, %v2840_v51 }
 0x436   : > { %v2753_v2 = vadd.f32 %v2752_v25, %v2664_v13 }
 0x437   : > { %v3393_v35 = vmax.f32 %v2929_v47, 0.0 }
 0x43a   : > { %v2841_v16 = vpop.f32.mrf.mxu2 }
 0x43b   : > { %v2930_v41 = vpop.f32.mrf.mxu3  ;;  %v2842_v17 = vadd.f32 %v2841_v16, %v2753_v2  ;;  %v2666_v3 = vpop.f32.mrf.mxu0  ;;  %v5909_v2 = vld [vmem:[#allocation5 + $0xd0] sm:$0xf]  ;;  %v6232_v16 = vld [vmem:[#allocation5 + $0xd4] sm:$0xf0] }
 0x43c   : > { %v2755_v56 = vpop.f32.mrf.mxu1  ;;  %v2667_v33 = vadd.f32 %v2666_v3, %v7272_v9 }
 0x43d   : > { %v2931_v15 = vadd.f32 %v2930_v41, %v2842_v17  ;;  %v5910_v41 = vor.u32 %v6232_v16, %v5909_v2 }
 0x43e   : > { %v2756_v34 = vadd.f32 %v2755_v56, %v2667_v33  ;;  %2981 = vmatmul.bf16.gmra.mxu0 %v6724_v63  ;;  %3070 = vmatmul.bf16.gmra.mxu1 %v6726_v0  ;;  %v6038_v0 = vor.u32 %v6264_v42, %v6037_v29 }
 0x43f   : > { %v3397_v23 = vmax.f32 %v2931_v15, 0.0  ;;  %3159 = vmatmul.bf16.gmra.mxu2 %v6735_v18  ;;  %3992 = vmatpush.bf16.msrb.mxu1 %v5910_v41 }
 0x440   : > { %3248 = vmatmul.bf16.gmra.mxu3 %v8205_v24  ;;  %v8207_v24 = vld [vmem:[#allocation10_spill] sm:$0xff] }
 0x441   : > { %v7359_v28 = vpack.c.bf16 %v3397_v23, %v3393_v35  ;;  %4170 = vmatpush.bf16.msrb.mxu3 %v6038_v0 }
 0x442   : > { %v2844_v40 = vpop.f32.mrf.mxu2 }
 0x443   : > { %8206 = vst [vmem:[#allocation9_spill] sm:$0xff] %v7359_v28  ;;  %v2933_v63 = vpop.f32.mrf.mxu3  ;;  %v2845_v51 = vadd.f32 %v2844_v40, %v2756_v34  ;;  %v2668_v52 = vpop.f32.mrf.mxu0 }
 0x444   : > { %v2757_v25 = vpop.f32.mrf.mxu1  ;;  %v2669_v18 = vadd.f32 %v2668_v52, %v7272_v9 }
 0x445   : > { %v2934_v13 = vadd.f32 %v2933_v63, %v2845_v51 }
 0x446   : > { %v2758_v47 = vadd.f32 %v2757_v25, %v2669_v18 }
 0x447   : > { %v3401_v30 = vmax.f32 %v2934_v13, 0.0 }
 0x44a   : > { %v2846_v17 = vpop.f32.mrf.mxu2 }
 0x44b   : > { %v2935_v3 = vpop.f32.mrf.mxu3  ;;  %v2847_v56 = vadd.f32 %v2846_v17, %v2758_v47  ;;  %v2671_v33 = vpop.f32.mrf.mxu0 }
 0x44c   : > { %v2760_v15 = vpop.f32.mrf.mxu1  ;;  %v2672_v35 = vadd.f32 %v2671_v33, %v7272_v9  ;;  %v8213_v33 = vld [vmem:[#allocation15_spill] sm:$0xff] }
 0x44d   : > { %v2936_v34 = vadd.f32 %v2935_v3, %v2847_v56  ;;  %v8212_v56 = vld [vmem:[#allocation14_spill] sm:$0xff] }
 0x44e   : > { %v2761_v23 = vadd.f32 %v2760_v15, %v2672_v35  ;;  %2986 = vmatmul.bf16.gmra.mxu0 %v8207_v24  ;;  %3075 = vmatmul.bf16.gmra.mxu1 %v8208_v6  ;;  %v5965_v24 = vld [vmem:[#allocation5 + $0x140] sm:$0xf]  ;;  %v6246_v6 = vld [vmem:[#allocation5 + $0x144] sm:$0xf0] }
 0x44f   : > { %v3405_v57 = vmax.f32 %v2936_v34, 0.0  ;;  %3164 = vmatmul.bf16.gmra.mxu2 %v8209_v53  ;;  %v8214_v34 = vld [vmem:[#allocation16_spill] sm:$0xff]  ;;  %v6214_v53 = vld [vmem:[#allocation5 + $0x44] sm:$0xf0] }
 0x450   : > { %3253 = vmatmul.bf16.gmra.mxu3 %v8210_v50  ;;  %v6029_v50 = vld [vmem:[#allocation5 + $0x1c0] sm:$0xf] }
 0x451   : > { %v7367_v29 = vpack.c.bf16 %v3405_v57, %v3401_v30  ;;  %v5966_v30 = vor.u32 %v6246_v6, %v5965_v24  ;;  %v5837_v57 = vld [vmem:[#allocation5 + $0x40] sm:$0xf]  ;;  %v8217_v6 = vld [vmem:[#allocation18_spill] sm:$0xff] }
 0x452   : > { %v2849_v44 = vpop.f32.mrf.mxu2 }
 0x453   : > { %8211 = vst [vmem:[#allocation10_spill] sm:$0xff] %v7367_v29  ;;  %v2938_v42 = vpop.f32.mrf.mxu3  ;;  %v2850_v40 = vadd.f32 %v2849_v44, %v2761_v23  ;;  %v2673_v63 = vpop.f32.mrf.mxu0  ;;  %v8215_v23 = vld [vmem:[#allocation17_spill] sm:$0xff]  ;;  %v5838_v44 = vor.u32 %v6214_v53, %v5837_v57  ;;  %4082 = vmatpush.bf16.msrb.mxu2 %v5966_v30  ;;  %v8218_v30 = vld [vmem:[#allocation19_spill] sm:$0xff] }
 0x454   : > { %v2762_v0 = vpop.f32.mrf.mxu1  ;;  %v2674_v51 = vadd.f32 %v2673_v63, %v7272_v9 }
 0x455   : > { %v2939_v52 = vadd.f32 %v2938_v42, %v2850_v40  ;;  %v6262_v42 = vld [vmem:[#allocation5 + $0x1c4] sm:$0xf0]  ;;  %3904 = vmatpush.bf16.msrb.mxu0 %v5838_v44  ;;  %v8220_v44 = vld [vmem:[#allocation21_spill] sm:$0xff] }
 0x456   : > { %v2763_v25 = vadd.f32 %v2762_v0, %v2674_v51  ;;  %v6030_v51 = vor.u32 %v6262_v42, %v6029_v50  ;;  %v8219_v50 = vld [vmem:[#allocation20_spill] sm:$0xff] }
 0x457   : > { %v3409_v15 = vmax.f32 %v2939_v52, 0.0 }
 0x458   : > { %4171 = vmatpush.bf16.msrb.mxu3 %v6030_v51 }
 0x45a   : > { %v2851_v18 = vpop.f32.mrf.mxu2 }
 0x45b   : > { %v2940_v47 = vpop.f32.mrf.mxu3  ;;  %v2852_v2 = vadd.f32 %v2851_v18, %v2763_v25  ;;  %v2676_v13 = vpop.f32.mrf.mxu0 }
 0x45c   : > { %v2765_v16 = vpop.f32.mrf.mxu1  ;;  %v2677_v41 = vadd.f32 %v2676_v13, %v7272_v9 }
 0x45d   : > { %v2941_v17 = vadd.f32 %v2940_v47, %v2852_v2 }
 0x45e   : > { %v2766_v3 = vadd.f32 %v2765_v16, %v2677_v41  ;;  %2991 = vmatmul.bf16.gmra.mxu0 %v8212_v56  ;;  %3080 = vmatmul.bf16.gmra.mxu1 %v8213_v33  ;;  %v5901_v16 = vld [vmem:[#allocation5 + $0xc0] sm:$0xf]  ;;  %v6230_v41 = vld [vmem:[#allocation5 + $0xc4] sm:$0xf0] }
 0x45f   : > { %v3413_v35 = vmax.f32 %v2941_v17, 0.0  ;;  %3169 = vmatmul.bf16.gmra.mxu2 %v8214_v34  ;;  %v5902_v17 = vor.u32 %v6230_v41, %v5901_v16 }
 0x460   : > { %3258 = vmatmul.bf16.gmra.mxu3 %v8215_v23 }
 0x461   : > { %v7375_v40 = vpack.c.bf16 %v3413_v35, %v3409_v15  ;;  %3993 = vmatpush.bf16.msrb.mxu1 %v5902_v17 }
 0x462   : > { %v2854_v63 = vpop.f32.mrf.mxu2 }
 0x463   : > { %8216 = vst [vmem:[#allocation11_spill] sm:$0xff] %v7375_v40  ;;  %v2943_v0 = vpop.f32.mrf.mxu3  ;;  %v2855_v52 = vadd.f32 %v2854_v63, %v2766_v3  ;;  %v2678_v25 = vpop.f32.mrf.mxu0 }
 0x464   : > { %v2767_v18 = vpop.f32.mrf.mxu1  ;;  %v2679_v47 = vadd.f32 %v2678_v25, %v7272_v9 }
 0x465   : > { %v2944_v2 = vadd.f32 %v2943_v0, %v2855_v52 }
 0x466   : > { %v2768_v13 = vadd.f32 %v2767_v18, %v2679_v47 }
 0x467   : > { %v3417_v57 = vmax.f32 %v2944_v2, 0.0 }
 0x46a   : > { %v2856_v56 = vpop.f32.mrf.mxu2 }
 0x46b   : > { %v2945_v33 = vpop.f32.mrf.mxu3  ;;  %v2857_v15 = vadd.f32 %v2856_v56, %v2768_v13  ;;  %v2681_v35 = vpop.f32.mrf.mxu0 }
 0x46c   : > { %v2770_v34 = vpop.f32.mrf.mxu1  ;;  %v2682_v23 = vadd.f32 %v2681_v35, %v7272_v9 }
 0x46d   : > { %v2946_v3 = vadd.f32 %v2945_v33, %v2857_v15 }
 0x46e   : > { %v2771_v24 = vadd.f32 %v2770_v34, %v2682_v23  ;;  %2996 = vmatmul.bf16.gmra.mxu0 %v8217_v6  ;;  %3085 = vmatmul.bf16.gmra.mxu1 %v8218_v30  ;;  %v8222_v34 = vld [vmem:[#allocation22_spill] sm:$0xff]  ;;  %v8223_v23 = vld [vmem:[#allocation23_spill] sm:$0xff]  ;;  %v8224_v6 = vld [vmem:[#allocation24_spill] sm:$0xff] }
 0x46f   : > { %v3421_v53 = vmax.f32 %v2946_v3, 0.0  ;;  %3174 = vmatmul.bf16.gmra.mxu2 %v8219_v50  ;;  %v8225_v30 = vld [vmem:[#allocation25_spill] sm:$0xff] }
 0x470   : > { %3263 = vmatmul.bf16.gmra.mxu3 %v8220_v44  ;;  %v5829_v44 = vld [vmem:[#allocation5 + $0x30] sm:$0xf] }
 0x471   : > { %v7383_v42 = vpack.c.bf16 %v3421_v53, %v3417_v57  ;;  %v5957_v57 = vld [vmem:[#allocation5 + $0x130] sm:$0xf]  ;;  %v6244_v53 = vld [vmem:[#allocation5 + $0x134] sm:$0xf0] }
 0x472   : > { %v2859_v63 = vpop.f32.mrf.mxu2  ;;  %v5958_v50 = vor.u32 %v6244_v53, %v5957_v57 }
 0x473   : > { %8221 = vst [vmem:[#allocation12_spill] sm:$0xff] %v7383_v42  ;;  %v2948_v0 = vpop.f32.mrf.mxu3  ;;  %v2860_v51 = vadd.f32 %v2859_v63, %v2771_v24  ;;  %v2683_v52 = vpop.f32.mrf.mxu0  ;;  %v6212_v63 = vld [vmem:[#allocation5 + $0x34] sm:$0xf0] }
 0x474   : > { %v2772_v25 = vpop.f32.mrf.mxu1  ;;  %v2684_v18 = vadd.f32 %v2683_v52, %v7272_v9  ;;  %v6260_v52 = vld [vmem:[#allocation5 + $0x1b4] sm:$0xf0]  ;;  %4083 = vmatpush.bf16.msrb.mxu2 %v5958_v50 }
 0x475   : > { %v2949_v47 = vadd.f32 %v2948_v0, %v2860_v51  ;;  %v6021_v0 = vld [vmem:[#allocation5 + $0x1b0] sm:$0xf]  ;;  %v5830_v51 = vor.u32 %v6212_v63, %v5829_v44 }
 0x476   : > { %v2773_v13 = vadd.f32 %v2772_v25, %v2684_v18 }
 0x477   : > { %v3425_v3 = vmax.f32 %v2949_v47, 0.0  ;;  %3905 = vmatpush.bf16.msrb.mxu0 %v5830_v51 }
 0x47a   : > { %v2861_v16 = vpop.f32.mrf.mxu2 }
 0x47b   : > { %v2950_v41 = vpop.f32.mrf.mxu3  ;;  %v2862_v17 = vadd.f32 %v2861_v16, %v2773_v13  ;;  %v2686_v2 = vpop.f32.mrf.mxu0  ;;  %v6022_v16 = vor.u32 %v6260_v52, %v6021_v0  ;;  %v8226_v0 = vld [vmem:[#allocation26_spill] sm:$0xff] }
 0x47c   : > { %v2775_v56 = vpop.f32.mrf.mxu1  ;;  %v2687_v33 = vadd.f32 %v2686_v2, %v7272_v9 }
 0x47d   : > { %v2951_v15 = vadd.f32 %v2950_v41, %v2862_v17  ;;  %4172 = vmatpush.bf16.msrb.mxu3 %v6022_v16 }
 0x47e   : > { %v2776_v35 = vadd.f32 %v2775_v56, %v2687_v33  ;;  %3001 = vmatmul.bf16.gmra.mxu0 %v8222_v34  ;;  %3090 = vmatmul.bf16.gmra.mxu1 %v8223_v23  ;;  %v6228_v34 = vld [vmem:[#allocation5 + $0xb4] sm:$0xf0] }
 0x47f   : > { %v3429_v24 = vmax.f32 %v2951_v15, 0.0  ;;  %3179 = vmatmul.bf16.gmra.mxu2 %v8224_v6  ;;  %v5893_v15 = vld [vmem:[#allocation5 + $0xb0] sm:$0xf] }
 0x480   : > { %3268 = vmatmul.bf16.gmra.mxu3 %v8225_v30  ;;  %v5894_v23 = vor.u32 %v6228_v34, %v5893_v15 }
 0x481   : > { %v7391_v25 = vpack.c.bf16 %v3429_v24, %v3425_v3 }
 0x482   : > { %v2864_v18 = vpop.f32.mrf.mxu2  ;;  %3994 = vmatpush.bf16.msrb.mxu1 %v5894_v23 }
 0x483   : > { %v2953_v13 = vpop.f32.mrf.mxu3  ;;  %v2865_v47 = vadd.f32 %v2864_v18, %v2776_v35  ;;  %v2688_v41 = vpop.f32.mrf.mxu0 }
 0x484   : > { %v2777_v17 = vpop.f32.mrf.mxu1  ;;  %v2689_v2 = vadd.f32 %v2688_v41, %v7272_v9 }
 0x485   : > { %v2954_v56 = vadd.f32 %v2953_v13, %v2865_v47 }
 0x486   : > { %v2778_v33 = vadd.f32 %v2777_v17, %v2689_v2 }
 0x487   : > { %v3433_v44 = vmax.f32 %v2954_v56, 0.0 }
 0x48a   : > { %v2866_v6 = vpop.f32.mrf.mxu2 }
 0x48b   : > { %v2955_v30 = vpop.f32.mrf.mxu3  ;;  %v2867_v3 = vadd.f32 %v2866_v6, %v2778_v33  ;;  %v2691_v24 = vpop.f32.mrf.mxu0 }
 0x48c   : > { %v2780_v57 = vpop.f32.mrf.mxu1  ;;  %v2692_v53 = vadd.f32 %v2691_v24, %v7272_v9  ;;  %v8230_v24 = vld [vmem:[#allocation28_spill] sm:$0xff] }
 0x48d   : > { %v2956_v35 = vadd.f32 %v2955_v30, %v2867_v3  ;;  %v8229_v3 = vld [vmem:[#allocation27_spill] sm:$0xff] }
 0x48e   : > { %v2781_v50 = vadd.f32 %v2780_v57, %v2692_v53  ;;  %3006 = vmatmul.bf16.gmra.mxu0 %v6829_v60  ;;  %3095 = vmatmul.bf16.gmra.mxu1 %v6831_v61  ;;  %v8228_v60 = vld [vmem:[#allocation63_spill] sm:$0xff]  ;;  %v8231_v53 = vld [vmem:[#allocation29_spill] sm:$0xff] }
 0x48f   : > { %v3437_v63 = vmax.f32 %v2956_v35, 0.0  ;;  %3184 = vmatmul.bf16.gmra.mxu2 %v6839_v22  ;;  %v7403_v33 = vperm.slane %v8228_v60, 3  ;;  %v8232_v35 = vld [vmem:[#allocation30_spill] sm:$0xff] }
 0x490   : > { %3273 = vmatmul.bf16.gmra.mxu3 %v8226_v0  ;;  %v5821_v0 = vld [vmem:[#allocation5 + $0x20] sm:$0xf] }
 0x491   : > { %v7399_v51 = vpack.c.bf16 %v3437_v63, %v3433_v44  ;;  %v6242_v44 = vld [vmem:[#allocation5 + $0x124] sm:$0xf0] }
 0x492   : > { %v2869_v52 = vpop.f32.mrf.mxu2 }
 0x493   : > { %8227 = vst [vmem:[#allocation13_spill] sm:$0xff] %v7399_v51  ;;  %v2958_v18 = vpop.f32.mrf.mxu3  ;;  %v2870_v13 = vadd.f32 %v2869_v52, %v2781_v50  ;;  %v2693_v16 = vpop.f32.mrf.mxu0  ;;  %v5949_v50 = vld [vmem:[#allocation5 + $0x120] sm:$0xf]  ;;  %v6210_v52 = vld [vmem:[#allocation5 + $0x24] sm:$0xf0] }
 0x494   : > { %v2782_v47 = vpop.f32.mrf.mxu1  ;;  %v2694_v41 = vadd.f32 %v2693_v16, %v7272_v9  ;;  %v5950_v63 = vor.u32 %v6242_v44, %v5949_v50  ;;  %v6258_v16 = vld [vmem:[#allocation5 + $0x1a4] sm:$0xf0] }
 0x495   : > { %v2959_v17 = vadd.f32 %v2958_v18, %v2870_v13  ;;  %v6013_v18 = vld [vmem:[#allocation5 + $0x1a0] sm:$0xf]  ;;  %v5822_v13 = vor.u32 %v6210_v52, %v5821_v0 }
 0x496   : > { %v2783_v2 = vadd.f32 %v2782_v47, %v2694_v41  ;;  %4084 = vmatpush.bf16.msrb.mxu2 %v5950_v63  ;;  %v6014_v60 = vor.u32 %v6258_v16, %v6013_v18 }
 0x497   : > { %v3441_v57 = vmax.f32 %v2959_v17, 0.0  ;;  %3906 = vmatpush.bf16.msrb.mxu0 %v5822_v13 }
 0x498   : > { %4173 = vmatpush.bf16.msrb.mxu3 %v6014_v60 }
 0x49a   : > { %v2871_v61 = vpop.f32.mrf.mxu2 }
 0x49b   : > { %v2960_v56 = vpop.f32.mrf.mxu3  ;;  %v2872_v15 = vadd.f32 %v2871_v61, %v2783_v2  ;;  %v2972_v22 = vpop.f32.mrf.mxu0 }
 0x49c   : > { %v3061_v34 = vpop.f32.mrf.mxu1  ;;  %v2973_v23 = vadd.f32 %v2972_v22, %v7403_v33 }
 0x49d   : > { %v2961_v6 = vadd.f32 %v2960_v56, %v2872_v15 }
 0x49e   : > { %v3062_v30 = vadd.f32 %v3061_v34, %v2973_v23  ;;  %3011 = vmatmul.bf16.gmra.mxu0 %v8229_v3  ;;  %3100 = vmatmul.bf16.gmra.mxu1 %v8230_v24  ;;  %v5885_v23 = vld [vmem:[#allocation5 + $0xa0] sm:$0xf] }
 0x49f   : > { %v3445_v9 = vmax.f32 %v2961_v6, 0.0  ;;  %3189 = vmatmul.bf16.gmra.mxu2 %v8231_v53  ;;  %v6226_v6 = vld [vmem:[#allocation5 + $0xa4] sm:$0xf0] }
 0x4a0   : > { %3278 = vmatmul.bf16.gmra.mxu3 %v8232_v35  ;;  %v5886_v3 = vor.u32 %v6226_v6, %v5885_v23 }
 0x4a1   : > { %v7410_v47 = vpack.c.bf16 %v3445_v9, %v3441_v57 }
 0x4a2   : > { %v3150_v41 = vpop.f32.mrf.mxu2  ;;  %3995 = vmatpush.bf16.msrb.mxu1 %v5886_v3  ;;  %v8234_v3 = vld [vmem:[#allocation31_spill] sm:$0xff] }
 0x4a3   : > { %8233 = vst [vmem:[#allocation14_spill] sm:$0xff] %v7410_v47  ;;  %v3239_v2 = vpop.f32.mrf.mxu3  ;;  %v3151_v17 = vadd.f32 %v3150_v41, %v3062_v30  ;;  %v2974_v61 = vpop.f32.mrf.mxu0 }
 0x4a4   : > { %v3063_v56 = vpop.f32.mrf.mxu1  ;;  %v2975_v15 = vadd.f32 %v2974_v61, %v7403_v33 }
 0x4a5   : > { %v3240_v22 = vadd.f32 %v3239_v2, %v3151_v17 }
 0x4a6   : > { %v3064_v34 = vadd.f32 %v3063_v56, %v2975_v15 }
 0x4a7   : > { %v3322_v63 = vmax.f32 %v3240_v22, 0.0 }
 0x4aa   : > { %v3152_v24 = vpop.f32.mrf.mxu2 }
 0x4ab   : > { %v3241_v53 = vpop.f32.mrf.mxu3  ;;  %v3153_v57 = vadd.f32 %v3152_v24, %v3064_v34  ;;  %v2977_v9 = vpop.f32.mrf.mxu0  ;;  %v5941_v24 = vld [vmem:[#allocation5 + $0x110] sm:$0xf] }
 0x4ac   : > { %v3066_v35 = vpop.f32.mrf.mxu1  ;;  %v2978_v50 = vadd.f32 %v2977_v9, %v7403_v33  ;;  %v5813_v9 = vld [vmem:[#allocation5 + $0x10] sm:$0xf] }
 0x4ad   : > { %v3242_v30 = vadd.f32 %v3241_v53, %v3153_v57  ;;  %v6240_v53 = vld [vmem:[#allocation5 + $0x114] sm:$0xf0] }
 0x4ae   : > { %v3067_v44 = vadd.f32 %v3066_v35, %v2978_v50  ;;  %3016 = vmatmul.bf16.gmra.mxu0 %v6869_v20  ;;  %3105 = vmatmul.bf16.gmra.mxu1 %v6871_v21  ;;  %v5942_v57 = vor.u32 %v6240_v53, %v5941_v24  ;;  %v6208_v35 = vld [vmem:[#allocation5 + $0x14] sm:$0xf0]  ;;  %v6005_v50 = vld [vmem:[#allocation5 + $0x190] sm:$0xf] }
 0x4af   : > { %v3326_v0 = vmax.f32 %v3242_v30, 0.0  ;;  %3194 = vmatmul.bf16.gmra.mxu2 %v6879_v62  ;;  %v5814_v30 = vor.u32 %v6208_v35, %v5813_v9 }
 0x4b0   : > { %3283 = vmatmul.bf16.gmra.mxu3 %v6881_v58  ;;  %4085 = vmatpush.bf16.msrb.mxu2 %v5942_v57 }
 0x4b1   : > { %v7418_v52 = vpack.c.bf16 %v3326_v0, %v3322_v63  ;;  %3907 = vmatpush.bf16.msrb.mxu0 %v5814_v30 }
 0x4b2   : > { %v3155_v18 = vpop.f32.mrf.mxu2 }
 0x4b3   : > { %v3244_v13 = vpop.f32.mrf.mxu3  ;;  %v3156_v16 = vadd.f32 %v3155_v18, %v3067_v44  ;;  %v2979_v41 = vpop.f32.mrf.mxu0  ;;  %v6256_v44 = vld [vmem:[#allocation5 + $0x194] sm:$0xf0] }
 0x4b4   : > { %v3068_v2 = vpop.f32.mrf.mxu1  ;;  %v2980_v60 = vadd.f32 %v2979_v41, %v7403_v33 }
 0x4b5   : > { %v3245_v17 = vadd.f32 %v3244_v13, %v3156_v16 }
 0x4b6   : > { %v3069_v61 = vadd.f32 %v3068_v2, %v2980_v60  ;;  %v5877_v60 = vld [vmem:[#allocation5 + $0x90] sm:$0xf] }
 0x4b7   : > { %v3330_v23 = vmax.f32 %v3245_v17, 0.0  ;;  %v6224_v17 = vld [vmem:[#allocation5 + $0x94] sm:$0xf0] }
 0x4ba   : > { %v3157_v20 = vpop.f32.mrf.mxu2 }
 0x4bb   : > { %v3246_v56 = vpop.f32.mrf.mxu3  ;;  %v3158_v21 = vadd.f32 %v3157_v20, %v3069_v61  ;;  %v2982_v15 = vpop.f32.mrf.mxu0  ;;  %v5878_v61 = vor.u32 %v6224_v17, %v5877_v60  ;;  %v5805_v60 = vld [vmem:[#allocation5] sm:$0xf]  ;;  %v6206_v17 = vld [vmem:[#allocation5 + $0x4] sm:$0xf0] }
 0x4bc   : > { %v3071_v22 = vpop.f32.mrf.mxu1  ;;  %v2983_v62 = vadd.f32 %v2982_v15, %v7403_v33 }
 0x4bd   : > { %v3247_v34 = vadd.f32 %v3246_v56, %v3158_v21  ;;  %3996 = vmatpush.bf16.msrb.mxu1 %v5878_v61  ;;  %v5997_v61 = vld [vmem:[#allocation5 + $0x180] sm:$0xf] }
 0x4be   : > { %v3072_v58 = vadd.f32 %v3071_v22, %v2983_v62  ;;  %3021 = vmatmul.bf16.gmra.mxu0 %v6889_v11  ;;  %3110 = vmatmul.bf16.gmra.mxu1 %v6891_v45  ;;  %v6006_v45 = vor.u32 %v6256_v44, %v6005_v50 }
 0x4bf   : > { %v3334_v6 = vmax.f32 %v3247_v34, 0.0  ;;  %3199 = vmatmul.bf16.gmra.mxu2 %v6899_v19 }
 0x4c0   : > { %3288 = vmatmul.bf16.gmra.mxu3 %v8234_v3 }
 0x4c1   : > { %v7426_v63 = vpack.c.bf16 %v3334_v6, %v3330_v23  ;;  %4174 = vmatpush.bf16.msrb.mxu3 %v6006_v45 }
 0x4c2   : > { %v3160_v0 = vpop.f32.mrf.mxu2 }
 0x4c3   : > { %v3249_v11 = vpop.f32.mrf.mxu3  ;;  %v3161_v18 = vadd.f32 %v3160_v0, %v3072_v58  ;;  %v2984_v13 = vpop.f32.mrf.mxu0 }
 0x4c4   : > { %v3073_v16 = vpop.f32.mrf.mxu1  ;;  %v2985_v19 = vadd.f32 %v2984_v13, %v7403_v33 }
 0x4c5   : > { %v3250_v41 = vadd.f32 %v3249_v11, %v3161_v18 }
 0x4c6   : > { %v3074_v2 = vadd.f32 %v3073_v16, %v2985_v19  ;;  %v5933_v19 = vld [vmem:[#allocation5 + $0x100] sm:$0xf] }
 0x4c7   : > { %v3338_v23 = vmax.f32 %v3250_v41, 0.0  ;;  %v6238_v41 = vld [vmem:[#allocation5 + $0x104] sm:$0xf0] }
 0x4ca   : > { %v3162_v20 = vpop.f32.mrf.mxu2 }
 0x4cb   : > { %v3251_v56 = vpop.f32.mrf.mxu3  ;;  %v3163_v21 = vadd.f32 %v3162_v20, %v3074_v2  ;;  %v2987_v15 = vpop.f32.mrf.mxu0  ;;  %v5934_v2 = vor.u32 %v6238_v41, %v5933_v19  ;;  %v5806_v20 = vor.u32 %v6206_v17, %v5805_v60 }
 0x4cc   : > { %v3076_v22 = vpop.f32.mrf.mxu1  ;;  %v2988_v62 = vadd.f32 %v2987_v15, %v7403_v33 }
 0x4cd   : > { %v3252_v34 = vadd.f32 %v3251_v56, %v3163_v21  ;;  %v6254_v56 = vld [vmem:[#allocation5 + $0x184] sm:$0xf0]  ;;  %4086 = vmatpush.bf16.msrb.mxu2 %v5934_v2  ;;  %3908 = vmatpush.bf16.msrb.mxu0 %v5806_v20 }
 0x4ce   : > { %v3077_v58 = vadd.f32 %v3076_v22, %v2988_v62  ;;  %3026 = vmatmul.bf16.gmra.mxu0 %v6909_v54  ;;  %3115 = vmatmul.bf16.gmra.mxu1 %v6911_v59 }
 0x4cf   : > { %v3342_v6 = vmax.f32 %v3252_v34, 0.0  ;;  %3204 = vmatmul.bf16.gmra.mxu2 %v6919_v31 }
 0x4d0   : > { %3293 = vmatmul.bf16.gmra.mxu3 %v6921_v43 }
 0x4d1   : > { %v7434_v3 = vpack.c.bf16 %v3342_v6, %v3338_v23  ;;  %v5869_v23 = vld [vmem:[#allocation5 + $0x80] sm:$0xf]  ;;  %v6222_v6 = vld [vmem:[#allocation5 + $0x84] sm:$0xf0] }
 0x4d2   : > { %v3165_v24 = vpop.f32.mrf.mxu2 }
 0x4d3   : > { %v3254_v53 = vpop.f32.mrf.mxu3  ;;  %v3166_v57 = vadd.f32 %v3165_v24, %v3077_v58  ;;  %v2989_v9 = vpop.f32.mrf.mxu0  ;;  %v5870_v24 = vor.u32 %v6222_v6, %v5869_v23 }
 0x4d4   : > { %v3078_v35 = vpop.f32.mrf.mxu1  ;;  %v2990_v50 = vadd.f32 %v2989_v9, %v7403_v33 }
 0x4d5   : > { %v3255_v30 = vadd.f32 %v3254_v53, %v3166_v57  ;;  %3997 = vmatpush.bf16.msrb.mxu1 %v5870_v24 }
 0x4d6   : > { %v3079_v44 = vadd.f32 %v3078_v35, %v2990_v50 }
 0x4d7   : > { %v3346_v13 = vmax.f32 %v3255_v30, 0.0 }
 0x4da   : > { %v3167_v54 = vpop.f32.mrf.mxu2 }
 0x4db   : > { %v3256_v0 = vpop.f32.mrf.mxu3  ;;  %v3168_v59 = vadd.f32 %v3167_v54, %v3079_v44  ;;  %v2992_v11 = vpop.f32.mrf.mxu0 }
 0x4dc   : > { %v3081_v45 = vpop.f32.mrf.mxu1  ;;  %v2993_v31 = vadd.f32 %v2992_v11, %v7403_v33 }
 0x4dd   : > { %v3257_v18 = vadd.f32 %v3256_v0, %v3168_v59 }
 0x4de   : > { %v3082_v43 = vadd.f32 %v3081_v45, %v2993_v31  ;;  %3031 = vmatmul.bf16.gmra.mxu0 %v6929_v46  ;;  %3120 = vmatmul.bf16.gmra.mxu1 %v6931_v5  ;;  %v5998_v5 = vor.u32 %v6254_v56, %v5997_v61 }
 0x4df   : > { %v3350_v16 = vmax.f32 %v3257_v18, 0.0  ;;  %3209 = vmatmul.bf16.gmra.mxu2 %v6939_v36 }
 0x4e0   : > { %3298 = vmatmul.bf16.gmra.mxu3 %v6941_v12 }
 0x4e1   : > { %v7442_v21 = vpack.c.bf16 %v3350_v16, %v3346_v13  ;;  %4175 = vmatpush.bf16.msrb.mxu3 %v5998_v5 }
 0x4e2   : > { %v3170_v15 = vpop.f32.mrf.mxu2 }
 0x4e3   : > { %v3259_v46 = vpop.f32.mrf.mxu3  ;;  %v3171_v22 = vadd.f32 %v3170_v15, %v3082_v43  ;;  %v2994_v62 = vpop.f32.mrf.mxu0  ;;  %v6251_v15 = vld [vmem:[#allocation5 + $0x174] sm:$0xf] }
 0x4e4   : > { %v3083_v34 = vpop.f32.mrf.mxu1  ;;  %v2995_v36 = vadd.f32 %v2994_v62, %v7403_v33  ;;  %v5863_v62 = vld [vmem:[#allocation5 + $0x78] sm:$0xf0] }
 0x4e5   : > { %v3260_v12 = vadd.f32 %v3259_v46, %v3171_v22  ;;  %v5991_v46 = vld [vmem:[#allocation5 + $0x178] sm:$0xf0]  ;;  %v6219_v22 = vld [vmem:[#allocation5 + $0x74] sm:$0xf] }
 0x4e6   : > { %v3084_v58 = vadd.f32 %v3083_v34, %v2995_v36  ;;  %v5994_v5 = vor.u32 %v6251_v15, %v5991_v46  ;;  %v6267_v34 = vld [vmem:[#allocation5 + $0x1f4] sm:$0xf]  ;;  %v5866_v36 = vor.u32 %v6219_v22, %v5863_v62  ;;  %v8236_v15 = vld [vmem:[#allocation33_spill] sm:$0xff]  ;;  %v8237_v46 = vld [vmem:[#allocation48_spill] sm:$0xff] }
 0x4e7   : > { %v3354_v0 = vmax.f32 %v3260_v12, 0.0  ;;  %v6055_v12 = vld [vmem:[#allocation5 + $0x1f8] sm:$0xf0]  ;;  %v8238_v62 = vld [vmem:[#allocation65_spill] sm:$0xff] }
 0x4e8   : > { %4435 = vmatpush.bf16.msra.mxu2 %v5994_v5  ;;  %4257 = vmatpush.bf16.msra.mxu0 %v5866_v36  ;;  %v5983_v36 = vld [vmem:[#allocation5 + $0x168] sm:$0xf0] }
 0x4ea   : > { %v3172_v53 = vpop.f32.mrf.mxu2 }
 0x4eb   : > { %v3261_v57 = vpop.f32.mrf.mxu3  ;;  %v3173_v9 = vadd.f32 %v3172_v53, %v3084_v58  ;;  %v2997_v35 = vpop.f32.mrf.mxu0 }
 0x4ec   : > { %v3086_v50 = vpop.f32.mrf.mxu1  ;;  %v2998_v30 = vadd.f32 %v2997_v35, %v7403_v33  ;;  %v5927_v35 = vld [vmem:[#allocation5 + $0xf8] sm:$0xf0] }
 0x4ed   : > { %v3262_v44 = vadd.f32 %v3261_v57, %v3173_v9  ;;  %v6235_v9 = vld [vmem:[#allocation5 + $0xf4] sm:$0xf] }
 0x4ee   : > { %v3087_v54 = vadd.f32 %v3086_v50, %v2998_v30  ;;  %3036 = vmatmul.bf16.gmra.mxu0 %v6949_v4  ;;  %3125 = vmatmul.bf16.gmra.mxu1 %v6951_v27  ;;  %v5930_v50 = vor.u32 %v6235_v9, %v5927_v35 }
 0x4ef   : > { %v3358_v59 = vmax.f32 %v3262_v44, 0.0  ;;  %3214 = vmatmul.bf16.gmra.mxu2 %v6959_v8 }
 0x4f0   : > { %3303 = vmatmul.bf16.gmra.mxu3 %v6961_v37  ;;  %4346 = vmatpush.bf16.msra.mxu1 %v5930_v50 }
 0x4f1   : > { %v7450_v11 = vpack.c.bf16 %v3358_v59, %v3354_v0 }
 0x4f2   : > { %v3175_v45 = vpop.f32.mrf.mxu2 }
 0x4f3   : > { %v3264_v31 = vpop.f32.mrf.mxu3  ;;  %v3176_v18 = vadd.f32 %v3175_v45, %v3087_v54  ;;  %v2999_v43 = vpop.f32.mrf.mxu0 }
 0x4f4   : > { %v3088_v13 = vpop.f32.mrf.mxu1  ;;  %v3000_v16 = vadd.f32 %v2999_v43, %v7403_v33 }
 0x4f5   : > { %v3265_v19 = vadd.f32 %v3264_v31, %v3176_v18 }
 0x4f6   : > { %v3089_v41 = vadd.f32 %v3088_v13, %v3000_v16 }
 0x4f7   : > { %v3362_v20 = vmax.f32 %v3265_v19, 0.0 }
 0x4fa   : > { %v3177_v4 = vpop.f32.mrf.mxu2 }
 0x4fb   : > { %v3266_v2 = vpop.f32.mrf.mxu3  ;;  %v3178_v27 = vadd.f32 %v3177_v4, %v3089_v41  ;;  %v3002_v60 = vpop.f32.mrf.mxu0 }
 0x4fc   : > { %v3091_v17 = vpop.f32.mrf.mxu1  ;;  %v3003_v8 = vadd.f32 %v3002_v60, %v7403_v33 }
 0x4fd   : > { %v3267_v61 = vadd.f32 %v3266_v2, %v3178_v27 }
 0x4fe   : > { %v3092_v37 = vadd.f32 %v3091_v17, %v3003_v8  ;;  %3041 = vmatmul.bf16.gmra.mxu0 %v6969_v7  ;;  %3130 = vmatmul.bf16.gmra.mxu1 %v6971_v14  ;;  %v6058_v14 = vor.u32 %v6267_v34, %v6055_v12  ;;  %v6249_v34 = vld [vmem:[#allocation5 + $0x164] sm:$0xf] }
 0x4ff   : > { %v3366_v56 = vmax.f32 %v3267_v61, 0.0  ;;  %3219 = vmatmul.bf16.gmra.mxu2 %v6979_v10  ;;  %v5986_v12 = vor.u32 %v6249_v34, %v5983_v36 }
 0x500   : > { %3308 = vmatmul.bf16.gmra.mxu3 %v6981_v55 }
 0x501   : > { %v7458_v58 = vpack.c.bf16 %v3366_v56, %v3362_v20  ;;  %4524 = vmatpush.bf16.msra.mxu3 %v6058_v14  ;;  %v6265_v14 = vld [vmem:[#allocation5 + $0x1e4] sm:$0xf]  ;;  %4436 = vmatpush.bf16.msra.mxu2 %v5986_v12 }
 0x502   : > { %v3180_v23 = vpop.f32.mrf.mxu2 }
 0x503   : > { %v3269_v7 = vpop.f32.mrf.mxu3  ;;  %v3181_v6 = vadd.f32 %v3180_v23, %v3092_v37  ;;  %v3004_v24 = vpop.f32.mrf.mxu0  ;;  %v6217_v23 = vld [vmem:[#allocation5 + $0x64] sm:$0xf] }
 0x504   : > { %v3093_v53 = vpop.f32.mrf.mxu1  ;;  %v3005_v10 = vadd.f32 %v3004_v24, %v7403_v33  ;;  %v6047_v24 = vld [vmem:[#allocation5 + $0x1e8] sm:$0xf0] }
 0x505   : > { %v3270_v55 = vadd.f32 %v3269_v7, %v3181_v6  ;;  %v5855_v7 = vld [vmem:[#allocation5 + $0x68] sm:$0xf0] }
 0x506   : > { %v3094_v57 = vadd.f32 %v3093_v53, %v3005_v10  ;;  %v5858_v6 = vor.u32 %v6217_v23, %v5855_v7 }
 0x507   : > { %v3370_v43 = vmax.f32 %v3270_v55, 0.0 }
 0x508   : > { %4258 = vmatpush.bf16.msra.mxu0 %v5858_v6 }
 0x50a   : > { %v3182_v30 = vpop.f32.mrf.mxu2 }
 0x50b   : > { %v3271_v44 = vpop.f32.mrf.mxu3  ;;  %v3183_v54 = vadd.f32 %v3182_v30, %v3094_v57  ;;  %v3007_v0 = vpop.f32.mrf.mxu0  ;;  %v6050_v57 = vor.u32 %v6265_v14, %v6047_v24 }
 0x50c   : > { %v3096_v59 = vpop.f32.mrf.mxu1  ;;  %v3008_v45 = vadd.f32 %v3007_v0, %v7403_v33  ;;  %v6233_v0 = vld [vmem:[#allocation5 + $0xe4] sm:$0xf] }
 0x50d   : > { %v3272_v31 = vadd.f32 %v3271_v44, %v3183_v54  ;;  %4525 = vmatpush.bf16.msra.mxu3 %v6050_v57 }
 0x50e   : > { %v3097_v18 = vadd.f32 %v3096_v59, %v3008_v45  ;;  %3046 = vmatmul.bf16.gmra.mxu0 %v6994_v39  ;;  %3135 = vmatmul.bf16.gmra.mxu1 %v6996_v1  ;;  %v5919_v59 = vld [vmem:[#allocation5 + $0xe8] sm:$0xf0] }
 0x50f   : > { %v3374_v13 = vmax.f32 %v3272_v31, 0.0  ;;  %3224 = vmatmul.bf16.gmra.mxu2 %v7008_v48  ;;  %v5922_v45 = vor.u32 %v6233_v0, %v5919_v59  ;;  %v5847_v0 = vld [vmem:[#allocation5 + $0x58] sm:$0xf0]  ;;  %v6263_v59 = vld [vmem:[#allocation5 + $0x1d4] sm:$0xf] }
 0x510   : > { %3313 = vmatmul.bf16.gmra.mxu3 %v7010_v49 }
 0x511   : > { %v7466_v16 = vpack.c.bf16 %v3374_v13, %v3370_v43  ;;  %4347 = vmatpush.bf16.msra.mxu1 %v5922_v45 }
 0x512   : > { %v3185_v19 = vpop.f32.mrf.mxu2 }
 0x513   : > { %8235 = vst [vmem:[#allocation15_spill] sm:$0xff] %v7466_v16  ;;  %v3274_v41 = vpop.f32.mrf.mxu3  ;;  %v3186_v4 = vadd.f32 %v3185_v19, %v3097_v18  ;;  %v3009_v2 = vpop.f32.mrf.mxu0 }
 0x514   : > { %v3098_v27 = vpop.f32.mrf.mxu1  ;;  %v3010_v60 = vadd.f32 %v3009_v2, %v7403_v33 }
 0x515   : > { %v3275_v17 = vadd.f32 %v3274_v41, %v3186_v4 }
 0x516   : > { %v3099_v8 = vadd.f32 %v3098_v27, %v3010_v60  ;;  %v8240_v27 = vld [vmem:[#allocation34_spill] sm:$0xff]  ;;  %v8241_v60 = vld [vmem:[#allocation49_spill] sm:$0xff] }
 0x517   : > { %v3378_v5 = vmax.f32 %v3275_v17, 0.0 }
 0x51a   : > { %v3187_v39 = vpop.f32.mrf.mxu2 }
 0x51b   : > { %v3276_v61 = vpop.f32.mrf.mxu3  ;;  %v3188_v1 = vadd.f32 %v3187_v39, %v3099_v8  ;;  %v3012_v37 = vpop.f32.mrf.mxu0  ;;  %v8242_v39 = vld [vmem:[#allocation66_spill] sm:$0xff] }
 0x51c   : > { %v3101_v20 = vpop.f32.mrf.mxu1  ;;  %v3013_v48 = vadd.f32 %v3012_v37, %v7403_v33 }
 0x51d   : > { %v3277_v56 = vadd.f32 %v3276_v61, %v3188_v1 }
 0x51e   : > { %v3102_v49 = vadd.f32 %v3101_v20, %v3013_v48  ;;  %3909 = vmatmul.bf16.vlgmr.msrb.gmra.mxu0 %v8236_v15  ;;  %3998 = vmatmul.bf16.vlgmr.msrb.gmra.mxu1 %v8237_v46 }
 0x51f   : > { %v3382_v22 = vmax.f32 %v3277_v56, 0.0  ;;  %4087 = vmatmul.bf16.vlgmr.msrb.gmra.mxu2 %v8238_v62 }
 0x520   : > { %4176 = vmatmul.bf16.vlgmr.msrb.gmra.mxu3 %v7418_v52 }
 0x521   : > { %v7474_v53 = vpack.c.bf16 %v3382_v22, %v3378_v5 }
 0x522   : > { %v3190_v10 = vpop.f32.mrf.mxu2 }
 0x523   : > { %8239 = vst [vmem:[#allocation16_spill] sm:$0xff] %v7474_v53  ;;  %v3279_v55 = vpop.f32.mrf.mxu3  ;;  %v3191_v9 = vadd.f32 %v3190_v10, %v3102_v49  ;;  %v3014_v35 = vpop.f32.mrf.mxu0  ;;  %v8244_v10 = vld [vmem:[#allocation35_spill] sm:$0xff] }
 0x524   : > { %v3103_v50 = vpop.f32.mrf.mxu1  ;;  %v3015_v30 = vadd.f32 %v3014_v35, %v7403_v33  ;;  %v8246_v35 = vld [vmem:[#allocation67_spill] sm:$0xff] }
 0x525   : > { %v3280_v44 = vadd.f32 %v3279_v55, %v3191_v9  ;;  %v8245_v55 = vld [vmem:[#allocation50_spill] sm:$0xff] }
 0x526   : > { %v3104_v54 = vadd.f32 %v3103_v50, %v3015_v30  ;;  %v6247_v50 = vld [vmem:[#allocation5 + $0x154] sm:$0xf]  ;;  %v5975_v30 = vld [vmem:[#allocation5 + $0x158] sm:$0xf0] }
 0x527   : > { %v3386_v17 = vmax.f32 %v3280_v44, 0.0  ;;  %v5978_v44 = vor.u32 %v6247_v50, %v5975_v30 }
 0x529   : > { %4437 = vmatpush.bf16.msra.mxu2 %v5978_v44 }
 0x52a   : > { %v3192_v31 = vpop.f32.mrf.mxu2 }
 0x52b   : > { %v3281_v18 = vpop.f32.mrf.mxu3  ;;  %v3193_v43 = vadd.f32 %v3192_v31, %v3104_v54  ;;  %v3017_v13 = vpop.f32.mrf.mxu0  ;;  %v6215_v54 = vld [vmem:[#allocation5 + $0x54] sm:$0xf]  ;;  %v6039_v31 = vld [vmem:[#allocation5 + $0x1d8] sm:$0xf0] }
 0x52c   : > { %v3106_v19 = vpop.f32.mrf.mxu1  ;;  %v3018_v41 = vadd.f32 %v3017_v13, %v7403_v33  ;;  %v5850_v45 = vor.u32 %v6215_v54, %v5847_v0 }
 0x52d   : > { %v3282_v4 = vadd.f32 %v3281_v18, %v3193_v43 }
 0x52e   : > { %v3107_v2 = vadd.f32 %v3106_v19, %v3018_v41  ;;  %3914 = vmatmul.bf16.gmra.mxu0 %v8240_v27  ;;  %4003 = vmatmul.bf16.gmra.mxu1 %v8241_v60  ;;  %v6042_v19 = vor.u32 %v6263_v59, %v6039_v31 }
 0x52f   : > { %v3390_v8 = vmax.f32 %v3282_v4, 0.0  ;;  %4092 = vmatmul.bf16.gmra.mxu2 %v8242_v39  ;;  %4259 = vmatpush.bf16.msra.mxu0 %v5850_v45 }
 0x530   : > { %4181 = vmatmul.bf16.gmra.mxu3 %v7426_v63 }
 0x531   : > { %v7482_v61 = vpack.c.bf16 %v3390_v8, %v3386_v17  ;;  %4526 = vmatpush.bf16.msra.mxu3 %v6042_v19 }
 0x532   : > { %v3195_v1 = vpop.f32.mrf.mxu2 }
 0x533   : > { %8243 = vst [vmem:[#allocation17_spill] sm:$0xff] %v7482_v61  ;;  %v3284_v37 = vpop.f32.mrf.mxu3  ;;  %v3196_v20 = vadd.f32 %v3195_v1, %v3107_v2  ;;  %v3019_v48 = vpop.f32.mrf.mxu0 }
 0x534   : > { %v3108_v56 = vpop.f32.mrf.mxu1  ;;  %v3020_v49 = vadd.f32 %v3019_v48, %v7403_v33 }
 0x535   : > { %v3285_v5 = vadd.f32 %v3284_v37, %v3196_v20  ;;  %v6231_v37 = vld [vmem:[#allocation5 + $0xd4] sm:$0xf]  ;;  %v5911_v20 = vld [vmem:[#allocation5 + $0xd8] sm:$0xf0] }
 0x536   : > { %v3109_v22 = vadd.f32 %v3108_v56, %v3020_v49  ;;  %v5914_v48 = vor.u32 %v6231_v37, %v5911_v20  ;;  %v8253_v37 = vld [vmem:[#allocation52_spill] sm:$0xff] }
 0x537   : > { %v3394_v57 = vmax.f32 %v3285_v5, 0.0 }
 0x538   : > { %4348 = vmatpush.bf16.msra.mxu1 %v5914_v48 }
 0x53a   : > { %v3197_v34 = vpop.f32.mrf.mxu2 }
 0x53b   : > { %v3286_v36 = vpop.f32.mrf.mxu3  ;;  %v3198_v12 = vadd.f32 %v3197_v34, %v3109_v22  ;;  %v3022_v23 = vpop.f32.mrf.mxu0 }
 0x53c   : > { %v3111_v7 = vpop.f32.mrf.mxu1  ;;  %v3023_v14 = vadd.f32 %v3022_v23, %v7403_v33 }
 0x53d   : > { %v3287_v6 = vadd.f32 %v3286_v36, %v3198_v12 }
 0x53e   : > { %v3112_v24 = vadd.f32 %v3111_v7, %v3023_v14  ;;  %3919 = vmatmul.bf16.gmra.mxu0 %v8244_v10  ;;  %4008 = vmatmul.bf16.gmra.mxu1 %v8245_v55  ;;  %v8248_v7 = vld [vmem:[#allocation36_spill] sm:$0xff]  ;;  %v8249_v14 = vld [vmem:[#allocation51_spill] sm:$0xff] }
 0x53f   : > { %v3398_v9 = vmax.f32 %v3287_v6, 0.0  ;;  %4097 = vmatmul.bf16.gmra.mxu2 %v8246_v35 }
 0x540   : > { %4186 = vmatmul.bf16.gmra.mxu3 %v7434_v3 }
 0x541   : > { %v7490_v18 = vpack.c.bf16 %v3398_v9, %v3394_v57  ;;  %v8250_v57 = vld [vmem:[#allocation68_spill] sm:$0xff] }
 0x542   : > { %v3200_v43 = vpop.f32.mrf.mxu2 }
 0x543   : > { %8247 = vst [vmem:[#allocation18_spill] sm:$0xff] %v7490_v18  ;;  %v3289_v13 = vpop.f32.mrf.mxu3  ;;  %v3201_v41 = vadd.f32 %v3200_v43, %v3112_v24  ;;  %v3024_v4 = vpop.f32.mrf.mxu0 }
 0x544   : > { %v3113_v2 = vpop.f32.mrf.mxu1  ;;  %v3025_v17 = vadd.f32 %v3024_v4, %v7403_v33 }
 0x545   : > { %v3290_v8 = vadd.f32 %v3289_v13, %v3201_v41 }
 0x546   : > { %v3114_v1 = vadd.f32 %v3113_v2, %v3025_v17 }
 0x547   : > { %v3402_v6 = vmax.f32 %v3290_v8, 0.0 }
 0x54a   : > { %v3202_v56 = vpop.f32.mrf.mxu2 }
 0x54b   : > { %v3291_v49 = vpop.f32.mrf.mxu3  ;;  %v3203_v5 = vadd.f32 %v3202_v56, %v3114_v1  ;;  %v3027_v22 = vpop.f32.mrf.mxu0  ;;  %v8252_v1 = vld [vmem:[#allocation37_spill] sm:$0xff] }
 0x54c   : > { %v3116_v34 = vpop.f32.mrf.mxu1  ;;  %v3028_v36 = vadd.f32 %v3027_v22, %v7403_v33  ;;  %v8254_v56 = vld [vmem:[#allocation69_spill] sm:$0xff] }
 0x54d   : > { %v3292_v12 = vadd.f32 %v3291_v49, %v3203_v5  ;;  %v6245_v49 = vld [vmem:[#allocation5 + $0x144] sm:$0xf]  ;;  %v5967_v5 = vld [vmem:[#allocation5 + $0x148] sm:$0xf0] }
 0x54e   : > { %v3117_v23 = vadd.f32 %v3116_v34, %v3028_v36  ;;  %3924 = vmatmul.bf16.gmra.mxu0 %v8248_v7  ;;  %4013 = vmatmul.bf16.gmra.mxu1 %v8249_v14  ;;  %v5970_v22 = vor.u32 %v6245_v49, %v5967_v5  ;;  %v6213_v34 = vld [vmem:[#allocation5 + $0x44] sm:$0xf]  ;;  %v5839_v36 = vld [vmem:[#allocation5 + $0x48] sm:$0xf0] }
 0x54f   : > { %v3406_v24 = vmax.f32 %v3292_v12, 0.0  ;;  %4102 = vmatmul.bf16.gmra.mxu2 %v8250_v57  ;;  %v6261_v12 = vld [vmem:[#allocation5 + $0x1c4] sm:$0xf] }
 0x550   : > { %4191 = vmatmul.bf16.gmra.mxu3 %v7442_v21  ;;  %4438 = vmatpush.bf16.msra.mxu2 %v5970_v22  ;;  %v8256_v22 = vld [vmem:[#allocation38_spill] sm:$0xff] }
 0x551   : > { %v7498_v9 = vpack.c.bf16 %v3406_v24, %v3402_v6  ;;  %v6031_v6 = vld [vmem:[#allocation5 + $0x1c8] sm:$0xf0] }
 0x552   : > { %v3205_v50 = vpop.f32.mrf.mxu2 }
 0x553   : > { %8251 = vst [vmem:[#allocation19_spill] sm:$0xff] %v7498_v9  ;;  %v3294_v30 = vpop.f32.mrf.mxu3  ;;  %v3206_v44 = vadd.f32 %v3205_v50, %v3117_v23  ;;  %v3029_v54 = vpop.f32.mrf.mxu0  ;;  %v5842_v23 = vor.u32 %v6213_v34, %v5839_v36  ;;  %v8257_v34 = vld [vmem:[#allocation53_spill] sm:$0xff] }
 0x554   : > { %v3118_v0 = vpop.f32.mrf.mxu1  ;;  %v3030_v59 = vadd.f32 %v3029_v54, %v7403_v33 }
 0x555   : > { %v3295_v45 = vadd.f32 %v3294_v30, %v3206_v44  ;;  %v6034_v44 = vor.u32 %v6261_v12, %v6031_v6  ;;  %4260 = vmatpush.bf16.msra.mxu0 %v5842_v23  ;;  %v8258_v23 = vld [vmem:[#allocation70_spill] sm:$0xff] }
 0x556   : > { %v3119_v31 = vadd.f32 %v3118_v0, %v3030_v59 }
 0x557   : > { %v3410_v20 = vmax.f32 %v3295_v45, 0.0  ;;  %4527 = vmatpush.bf16.msra.mxu3 %v6034_v44 }
 0x55a   : > { %v3207_v43 = vpop.f32.mrf.mxu2 }
 0x55b   : > { %v3296_v13 = vpop.f32.mrf.mxu3  ;;  %v3208_v19 = vadd.f32 %v3207_v43, %v3119_v31  ;;  %v3032_v41 = vpop.f32.mrf.mxu0 }
 0x55c   : > { %v3121_v4 = vpop.f32.mrf.mxu1  ;;  %v3033_v2 = vadd.f32 %v3032_v41, %v7403_v33 }
 0x55d   : > { %v3297_v17 = vadd.f32 %v3296_v13, %v3208_v19  ;;  %v6229_v13 = vld [vmem:[#allocation5 + $0xc4] sm:$0xf]  ;;  %v5903_v19 = vld [vmem:[#allocation5 + $0xc8] sm:$0xf0] }
 0x55e   : > { %v3122_v8 = vadd.f32 %v3121_v4, %v3033_v2  ;;  %3929 = vmatmul.bf16.gmra.mxu0 %v8252_v1  ;;  %4018 = vmatmul.bf16.gmra.mxu1 %v8253_v37  ;;  %v5906_v41 = vor.u32 %v6229_v13, %v5903_v19 }
 0x55f   : > { %v3414_v48 = vmax.f32 %v3297_v17, 0.0  ;;  %4107 = vmatmul.bf16.gmra.mxu2 %v8254_v56 }
 0x560   : > { %4196 = vmatmul.bf16.gmra.mxu3 %v7450_v11  ;;  %4349 = vmatpush.bf16.msra.mxu1 %v5906_v41 }
 0x561   : > { %v7506_v24 = vpack.c.bf16 %v3414_v48, %v3410_v20 }
 0x562   : > { %v3210_v50 = vpop.f32.mrf.mxu2 }
 0x563   : > { %8255 = vst [vmem:[#allocation20_spill] sm:$0xff] %v7506_v24  ;;  %v3299_v30 = vpop.f32.mrf.mxu3  ;;  %v3211_v54 = vadd.f32 %v3210_v50, %v3122_v8  ;;  %v3034_v0 = vpop.f32.mrf.mxu0 }
 0x564   : > { %v3123_v59 = vpop.f32.mrf.mxu1  ;;  %v3035_v45 = vadd.f32 %v3034_v0, %v7403_v33 }
 0x565   : > { %v3300_v31 = vadd.f32 %v3299_v30, %v3211_v54 }
 0x566   : > { %v3124_v43 = vadd.f32 %v3123_v59, %v3035_v45 }
 0x567   : > { %v3418_v36 = vmax.f32 %v3300_v31, 0.0 }
 0x56a   : > { %v3212_v4 = vpop.f32.mrf.mxu2 }
 0x56b   : > { %v3301_v2 = vpop.f32.mrf.mxu3  ;;  %v3213_v17 = vadd.f32 %v3212_v4, %v3124_v43  ;;  %v3037_v20 = vpop.f32.mrf.mxu0 }
 0x56c   : > { %v3126_v48 = vpop.f32.mrf.mxu1  ;;  %v3038_v49 = vadd.f32 %v3037_v20, %v7403_v33 }
 0x56d   : > { %v3302_v8 = vadd.f32 %v3301_v2, %v3213_v17 }
 0x56e   : > { %v3127_v5 = vadd.f32 %v3126_v48, %v3038_v49  ;;  %3934 = vmatmul.bf16.gmra.mxu0 %v8256_v22  ;;  %4023 = vmatmul.bf16.gmra.mxu1 %v8257_v34  ;;  %v8260_v48 = vld [vmem:[#allocation39_spill] sm:$0xff]  ;;  %v8261_v49 = vld [vmem:[#allocation54_spill] sm:$0xff] }
 0x56f   : > { %v3422_v12 = vmax.f32 %v3302_v8, 0.0  ;;  %4112 = vmatmul.bf16.gmra.mxu2 %v8258_v23 }
 0x570   : > { %4201 = vmatmul.bf16.gmra.mxu3 %v7458_v58 }
 0x571   : > { %v7514_v6 = vpack.c.bf16 %v3422_v12, %v3418_v36  ;;  %v6243_v36 = vld [vmem:[#allocation5 + $0x134] sm:$0xf]  ;;  %v5959_v12 = vld [vmem:[#allocation5 + $0x138] sm:$0xf0] }
 0x572   : > { %v3215_v50 = vpop.f32.mrf.mxu2 }
 0x573   : > { %8259 = vst [vmem:[#allocation21_spill] sm:$0xff] %v7514_v6  ;;  %v3304_v30 = vpop.f32.mrf.mxu3  ;;  %v3216_v44 = vadd.f32 %v3215_v50, %v3127_v5  ;;  %v3039_v54 = vpop.f32.mrf.mxu0  ;;  %v5962_v50 = vor.u32 %v6243_v36, %v5959_v12  ;;  %v6227_v12 = vld [vmem:[#allocation5 + $0xb4] sm:$0xf] }
 0x574   : > { %v3128_v0 = vpop.f32.mrf.mxu1  ;;  %v3040_v59 = vadd.f32 %v3039_v54, %v7403_v33  ;;  %v6259_v54 = vld [vmem:[#allocation5 + $0x1b4] sm:$0xf] }
 0x575   : > { %v3305_v45 = vadd.f32 %v3304_v30, %v3216_v44  ;;  %v6211_v30 = vld [vmem:[#allocation5 + $0x34] sm:$0xf]  ;;  %v5831_v44 = vld [vmem:[#allocation5 + $0x38] sm:$0xf0]  ;;  %4439 = vmatpush.bf16.msra.mxu2 %v5962_v50 }
 0x576   : > { %v3129_v43 = vadd.f32 %v3128_v0, %v3040_v59  ;;  %v5834_v0 = vor.u32 %v6211_v30, %v5831_v44  ;;  %v6023_v59 = vld [vmem:[#allocation5 + $0x1b8] sm:$0xf0] }
 0x577   : > { %v3426_v8 = vmax.f32 %v3305_v45, 0.0 }
 0x578   : > { %4261 = vmatpush.bf16.msra.mxu0 %v5834_v0  ;;  %v8263_v0 = vld [vmem:[#allocation55_spill] sm:$0xff] }
 0x57a   : > { %v3217_v13 = vpop.f32.mrf.mxu2 }
 0x57b   : > { %v3306_v19 = vpop.f32.mrf.mxu3  ;;  %v3218_v41 = vadd.f32 %v3217_v13, %v3129_v43  ;;  %v3042_v31 = vpop.f32.mrf.mxu0 }
 0x57c   : > { %v3131_v4 = vpop.f32.mrf.mxu1  ;;  %v3043_v2 = vadd.f32 %v3042_v31, %v7403_v33 }
 0x57d   : > { %v3307_v17 = vadd.f32 %v3306_v19, %v3218_v41  ;;  %v6026_v41 = vor.u32 %v6259_v54, %v6023_v59  ;;  %v8262_v59 = vld [vmem:[#allocation40_spill] sm:$0xff] }
 0x57e   : > { %v3132_v20 = vadd.f32 %v3131_v4, %v3043_v2  ;;  %3939 = vmatmul.bf16.gmra.mxu0 %v8260_v48  ;;  %4028 = vmatmul.bf16.gmra.mxu1 %v8261_v49 }
 0x57f   : > { %v3430_v5 = vmax.f32 %v3307_v17, 0.0  ;;  %4117 = vmatmul.bf16.gmra.mxu2 %v7335_v32  ;;  %4528 = vmatpush.bf16.msra.mxu3 %v6026_v41 }
 0x580   : > { %4206 = vmatmul.bf16.gmra.mxu3 %v7466_v16  ;;  %v5895_v16 = vld [vmem:[#allocation5 + $0xb8] sm:$0xf0] }
 0x581   : > { %v7522_v43 = vpack.c.bf16 %v3430_v5, %v3426_v8  ;;  %v5898_v32 = vor.u32 %v6227_v12, %v5895_v16 }
 0x582   : > { %v3220_v13 = vpop.f32.mrf.mxu2 }
 0x583   : > { %v3309_v19 = vpop.f32.mrf.mxu3  ;;  %v3221_v45 = vadd.f32 %v3220_v13, %v3132_v20  ;;  %v3044_v31 = vpop.f32.mrf.mxu0  ;;  %4350 = vmatpush.bf16.msra.mxu1 %v5898_v32 }
 0x584   : > { %v3133_v4 = vpop.f32.mrf.mxu1  ;;  %v3045_v2 = vadd.f32 %v3044_v31, %v7403_v33 }
 0x585   : > { %v3310_v17 = vadd.f32 %v3309_v19, %v3221_v45 }
 0x586   : > { %v3134_v36 = vadd.f32 %v3133_v4, %v3045_v2 }
 0x587   : > { %v3434_v13 = vmax.f32 %v3310_v17, 0.0 }
 0x58a   : > { %v3222_v30 = vpop.f32.mrf.mxu2 }
 0x58b   : > { %v3311_v44 = vpop.f32.mrf.mxu3  ;;  %v3223_v8 = vadd.f32 %v3222_v30, %v3134_v36  ;;  %v3047_v5 = vpop.f32.mrf.mxu0  ;;  %v7536_v36 = vld [vmem:[%s7983_s6] sm:$0x3] }
 0x58c   : > { %v3136_v49 = vpop.f32.mrf.mxu1  ;;  %v3048_v50 = vadd.f32 %v3047_v5, %v7403_v33  ;;  %8265 = vst [vmem:[#allocation23_spill] sm:$0xff] %v7536_v36  ;;  %v7539_v12 = vperm.slane %v7536_v36, 0 }
 0x58d   : > { %v3312_v20 = vadd.f32 %v3311_v44, %v3223_v8 }
 0x58e   : > { %v3137_v54 = vadd.f32 %v3136_v49, %v3048_v50  ;;  %3944 = vmatmul.bf16.gmra.mxu0 %v8262_v59  ;;  %4033 = vmatmul.bf16.gmra.mxu1 %v8263_v0 }
 0x58f   : > { %v3438_v19 = vmax.f32 %v3312_v20, 0.0  ;;  %4122 = vmatmul.bf16.gmra.mxu2 %v7343_v38 }
 0x590   : > { %4211 = vmatmul.bf16.gmra.mxu3 %v7474_v53 }
 0x591   : > { %v7530_v16 = vpack.c.bf16 %v3438_v19, %v3434_v13  ;;  %v8267_v19 = vld [vmem:[#allocation56_spill] sm:$0xff] }
 0x592   : > { %v3225_v32 = vpop.f32.mrf.mxu2 }
 0x593   : > { %8264 = vst [vmem:[#allocation22_spill] sm:$0xff] %v7530_v16  ;;  %v3314_v41 = vpop.f32.mrf.mxu3  ;;  %v3226_v45 = vadd.f32 %v3225_v32, %v3137_v54  ;;  %v3049_v31 = vpop.f32.mrf.mxu0 }
 0x594   : > { %v3138_v4 = vpop.f32.mrf.mxu1  ;;  %v3050_v2 = vadd.f32 %v3049_v31, %v7403_v33  ;;  %v8266_v33 = vld [vmem:[#allocation41_spill] sm:$0xff]  ;;  %v5951_v31 = vld [vmem:[#allocation5 + $0x128] sm:$0xf0] }
 0x595   : > { %v3315_v49 = vadd.f32 %v3314_v41, %v3226_v45  ;;  %v6241_v45 = vld [vmem:[#allocation5 + $0x124] sm:$0xf] }
 0x596   : > { %v3139_v17 = vadd.f32 %v3138_v4, %v3050_v2  ;;  %v5954_v4 = vor.u32 %v6241_v45, %v5951_v31  ;;  %v6209_v2 = vld [vmem:[#allocation5 + $0x24] sm:$0xf] }
 0x597   : > { %v3442_v32 = vmax.f32 %v3315_v49, 0.0  ;;  %v6225_v31 = vld [vmem:[#allocation5 + $0xa4] sm:$0xf] }
 0x598   : > { %4440 = vmatpush.bf16.msra.mxu2 %v5954_v4 }
 0x59a   : > { %v3227_v30 = vpop.f32.mrf.mxu2 }
 0x59b   : > { %v3316_v44 = vpop.f32.mrf.mxu3  ;;  %v3228_v8 = vadd.f32 %v3227_v30, %v3139_v17  ;;  %v3910_v5 = vpop.f32.mrf.mxu0  ;;  %v5823_v17 = vld [vmem:[#allocation5 + $0x28] sm:$0xf0]  ;;  %v6257_v30 = vld [vmem:[#allocation5 + $0x1a4] sm:$0xf] }
 0x59c   : > { %v3999_v50 = vpop.f32.mrf.mxu1  ;;  %v3911_v20 = vadd.f32 %v3910_v5, %v7539_v12  ;;  %v5826_v36 = vor.u32 %v6209_v2, %v5823_v17  ;;  %v6015_v5 = vld [vmem:[#allocation5 + $0x1a8] sm:$0xf0] }
 0x59d   : > { %v3317_v54 = vadd.f32 %v3316_v44, %v3228_v8 }
 0x59e   : > { %v4000_v13 = vadd.f32 %v3999_v50, %v3911_v20  ;;  %3949 = vmatmul.bf16.gmra.mxu0 %v8266_v33  ;;  %4038 = vmatmul.bf16.gmra.mxu1 %v8267_v19  ;;  %v6018_v20 = vor.u32 %v6257_v30, %v6015_v5  ;;  %v5887_v33 = vld [vmem:[#allocation5 + $0xa8] sm:$0xf0] }
 0x59f   : > { %v3446_v41 = vmax.f32 %v3317_v54, 0.0  ;;  %4127 = vmatmul.bf16.gmra.mxu2 %v7351_v26  ;;  %4262 = vmatpush.bf16.msra.mxu0 %v5826_v36  ;;  %v5890_v2 = vor.u32 %v6225_v31, %v5887_v33  ;;  %v8269_v5 = vld [vmem:[#allocation42_spill] sm:$0xff] }
 0x5a0   : > { %4216 = vmatmul.bf16.gmra.mxu3 %v7482_v61 }
 0x5a1   : > { %v7546_v44 = vpack.c.bf16 %v3446_v41, %v3442_v32  ;;  %4529 = vmatpush.bf16.msra.mxu3 %v6018_v20  ;;  %4351 = vmatpush.bf16.msra.mxu1 %v5890_v2 }
 0x5a2   : > { %v4088_v8 = vpop.f32.mrf.mxu2 }
 0x5a3   : > { %8268 = vst [vmem:[#allocation24_spill] sm:$0xff] %v7546_v44  ;;  %v4177_v50 = vpop.f32.mrf.mxu3  ;;  %v4089_v49 = vadd.f32 %v4088_v8, %v4000_v13  ;;  %v3912_v54 = vpop.f32.mrf.mxu0  ;;  %v8270_v8 = vld [vmem:[#allocation57_spill] sm:$0xff] }
 0x5a4   : > { %v4001_v19 = vpop.f32.mrf.mxu1  ;;  %v3913_v61 = vadd.f32 %v3912_v54, %v7539_v12 }
 0x5a5   : > { %v7549_v26 = vadd.f32 %v4177_v50, %v4089_v49 }
 0x5a6   : > { %v4002_v45 = vadd.f32 %v4001_v19, %v3913_v61 }
 0x5aa   : > { %v4090_v17 = vpop.f32.mrf.mxu2 }
 0x5ab   : > { %v4179_v32 = vpop.f32.mrf.mxu3  ;;  %v4091_v41 = vadd.f32 %v4090_v17, %v4002_v45  ;;  %v3915_v53 = vpop.f32.mrf.mxu0 }
 0x5ac   : > { %v4004_v4 = vpop.f32.mrf.mxu1  ;;  %v3916_v13 = vadd.f32 %v3915_v53, %v7539_v12 }
 0x5ad   : > { %v7552_v30 = vadd.f32 %v4179_v32, %v4091_v41 }
 0x5ae   : > { %v4005_v36 = vadd.f32 %v4004_v4, %v3916_v13  ;;  %3954 = vmatmul.bf16.gmra.mxu0 %v8269_v5  ;;  %4043 = vmatmul.bf16.gmra.mxu1 %v8270_v8 }
 0x5af   : > { %4132 = vmatmul.bf16.gmra.mxu2 %v7359_v28 }
 0x5b0   : > { %4221 = vmatmul.bf16.gmra.mxu3 %v7490_v18  ;;  %v8273_v18 = vld [vmem:[#allocation43_spill] sm:$0xff] }
 0x5b2   : > { %v4093_v61 = vpop.f32.mrf.mxu2 }
 0x5b3   : > { %v4182_v33 = vpop.f32.mrf.mxu3  ;;  %v4094_v19 = vadd.f32 %v4093_v61, %v4005_v36  ;;  %v3917_v50 = vpop.f32.mrf.mxu0  ;;  %v8274_v36 = vld [vmem:[#allocation58_spill] sm:$0xff]  ;;  %v6239_v61 = vld [vmem:[#allocation5 + $0x114] sm:$0xf] }
 0x5b4   : > { %v4006_v20 = vpop.f32.mrf.mxu1  ;;  %v3918_v49 = vadd.f32 %v3917_v50, %v7539_v12  ;;  %v6207_v50 = vld [vmem:[#allocation5 + $0x14] sm:$0xf] }
 0x5b5   : > { %v7559_v54 = vadd.f32 %v4182_v33, %v4094_v19  ;;  %v5943_v33 = vld [vmem:[#allocation5 + $0x118] sm:$0xf0] }
 0x5b6   : > { %v4007_v53 = vadd.f32 %v4006_v20, %v3918_v49  ;;  %v5946_v19 = vor.u32 %v6239_v61, %v5943_v33  ;;  %v5815_v20 = vld [vmem:[#allocation5 + $0x18] sm:$0xf0]  ;;  %v6255_v49 = vld [vmem:[#allocation5 + $0x194] sm:$0xf] }
 0x5b7   : > { %8271 = vst [vmem:[#allocation25_spill] sm:$0xff] %v7559_v54  ;;  %v6223_v61 = vld [vmem:[#allocation5 + $0x94] sm:$0xf]  ;;  %v5879_v33 = vld [vmem:[#allocation5 + $0x98] sm:$0xf0] }
 0x5b8   : > { %4441 = vmatpush.bf16.msra.mxu2 %v5946_v19 }
 0x5ba   : > { %v4095_v45 = vpop.f32.mrf.mxu2 }
 0x5bb   : > { %v4184_v31 = vpop.f32.mrf.mxu3  ;;  %v4096_v2 = vadd.f32 %v4095_v45, %v4007_v53  ;;  %v3920_v17 = vpop.f32.mrf.mxu0  ;;  %v5818_v53 = vor.u32 %v6207_v50, %v5815_v20  ;;  %v6007_v45 = vld [vmem:[#allocation5 + $0x198] sm:$0xf0]  ;;  %v5882_v50 = vor.u32 %v6223_v61, %v5879_v33 }
 0x5bc   : > { %v4009_v32 = vpop.f32.mrf.mxu1  ;;  %v3921_v41 = vadd.f32 %v3920_v17, %v7539_v12 }
 0x5bd   : > { %v7562_v4 = vadd.f32 %v4184_v31, %v4096_v2  ;;  %v6010_v2 = vor.u32 %v6255_v49, %v6007_v45  ;;  %4263 = vmatpush.bf16.msra.mxu0 %v5818_v53  ;;  %4352 = vmatpush.bf16.msra.mxu1 %v5882_v50  ;;  %v8275_v53 = vld [vmem:[#allocation44_spill] sm:$0xff]  ;;  %v8276_v45 = vld [vmem:[#allocation59_spill] sm:$0xff] }
 0x5be   : > { %v4010_v13 = vadd.f32 %v4009_v32, %v3921_v41  ;;  %3959 = vmatmul.bf16.gmra.mxu0 %v8273_v18  ;;  %4048 = vmatmul.bf16.gmra.mxu1 %v8274_v36 }
 0x5bf   : > { %8272 = vst [vmem:[#allocation26_spill] sm:$0xff] %v7562_v4  ;;  %4137 = vmatmul.bf16.gmra.mxu2 %v7367_v29  ;;  %4530 = vmatpush.bf16.msra.mxu3 %v6010_v2 }
 0x5c0   : > { %4226 = vmatmul.bf16.gmra.mxu3 %v7498_v9 }
 0x5c2   : > { %v4098_v17 = vpop.f32.mrf.mxu2 }
 0x5c3   : > { %v4187_v31 = vpop.f32.mrf.mxu3  ;;  %v4099_v32 = vadd.f32 %v4098_v17, %v4010_v13  ;;  %v3922_v41 = vpop.f32.mrf.mxu0 }
 0x5c4   : > { %v4011_v18 = vpop.f32.mrf.mxu1  ;;  %v3923_v29 = vadd.f32 %v3922_v41, %v7539_v12 }
 0x5c5   : > { %v7569_v9 = vadd.f32 %v4187_v31, %v4099_v32 }
 0x5c6   : > { %v4012_v36 = vadd.f32 %v4011_v18, %v3923_v29 }
 0x5ca   : > { %v4100_v4 = vpop.f32.mrf.mxu2 }
 0x5cb   : > { %v4189_v54 = vpop.f32.mrf.mxu3  ;;  %v4101_v20 = vadd.f32 %v4100_v4, %v4012_v36  ;;  %v3925_v28 = vpop.f32.mrf.mxu0 }
 0x5cc   : > { %v4014_v8 = vpop.f32.mrf.mxu1  ;;  %v3926_v19 = vadd.f32 %v3925_v28, %v7539_v12 }
 0x5cd   : > { %v7572_v13 = vadd.f32 %v4189_v54, %v4101_v20 }
 0x5ce   : > { %v4015_v49 = vadd.f32 %v4014_v8, %v3926_v19  ;;  %3964 = vmatmul.bf16.gmra.mxu0 %v8275_v53  ;;  %4053 = vmatmul.bf16.gmra.mxu1 %v8276_v45  ;;  %v8279_v19 = vld [vmem:[#allocation45_spill] sm:$0xff] }
 0x5cf   : > { %4142 = vmatmul.bf16.gmra.mxu2 %v7375_v40 }
 0x5d0   : > { %4231 = vmatmul.bf16.gmra.mxu3 %v7506_v24 }
 0x5d2   : > { %v4103_v29 = vpop.f32.mrf.mxu2 }
 0x5d3   : > { %v4192_v18 = vpop.f32.mrf.mxu3  ;;  %v4104_v17 = vadd.f32 %v4103_v29, %v4015_v49  ;;  %v3927_v4 = vpop.f32.mrf.mxu0  ;;  %v8280_v49 = vld [vmem:[#allocation60_spill] sm:$0xff]  ;;  %v6237_v29 = vld [vmem:[#allocation5 + $0x104] sm:$0xf] }
 0x5d4   : > { %v4016_v36 = vpop.f32.mrf.mxu1  ;;  %v3928_v31 = vadd.f32 %v3927_v4, %v7539_v12  ;;  %v6205_v4 = vld [vmem:[#allocation5 + $0x4] sm:$0xf] }
 0x5d5   : > { %v7579_v28 = vadd.f32 %v4192_v18, %v4104_v17  ;;  %v5935_v18 = vld [vmem:[#allocation5 + $0x108] sm:$0xf0] }
 0x5d6   : > { %v4017_v54 = vadd.f32 %v4016_v36, %v3928_v31  ;;  %v5938_v17 = vor.u32 %v6237_v29, %v5935_v18  ;;  %v5807_v36 = vld [vmem:[#allocation5 + $0x8] sm:$0xf0]  ;;  %v6253_v31 = vld [vmem:[#allocation5 + $0x184] sm:$0xf] }
 0x5d7   : > { %8277 = vst [vmem:[#allocation63_spill] sm:$0xff] %v7579_v28  ;;  %v6221_v29 = vld [vmem:[#allocation5 + $0x84] sm:$0xf]  ;;  %v5871_v18 = vld [vmem:[#allocation5 + $0x88] sm:$0xf0] }
 0x5d8   : > { %4442 = vmatpush.bf16.msra.mxu2 %v5938_v17 }
 0x5da   : > { %v4105_v2 = vpop.f32.mrf.mxu2 }
 0x5db   : > { %v4194_v8 = vpop.f32.mrf.mxu3  ;;  %v4106_v32 = vadd.f32 %v4105_v2, %v4017_v54  ;;  %v3930_v41 = vpop.f32.mrf.mxu0  ;;  %v5810_v54 = vor.u32 %v6205_v4, %v5807_v36  ;;  %v5999_v2 = vld [vmem:[#allocation5 + $0x188] sm:$0xf0]  ;;  %v5874_v4 = vor.u32 %v6221_v29, %v5871_v18 }
 0x5dc   : > { %v4019_v61 = vpop.f32.mrf.mxu1  ;;  %v3931_v33 = vadd.f32 %v3930_v41, %v7539_v12 }
 0x5dd   : > { %v7582_v50 = vadd.f32 %v4194_v8, %v4106_v32  ;;  %v6002_v32 = vor.u32 %v6253_v31, %v5999_v2  ;;  %4264 = vmatpush.bf16.msra.mxu0 %v5810_v54  ;;  %4353 = vmatpush.bf16.msra.mxu1 %v5874_v4  ;;  %v8281_v54 = vld [vmem:[#allocation46_spill] sm:$0xff]  ;;  %v8282_v2 = vld [vmem:[#allocation61_spill] sm:$0xff] }
 0x5de   : > { %v4020_v20 = vadd.f32 %v4019_v61, %v3931_v33  ;;  %3969 = vmatmul.bf16.gmra.mxu0 %v8279_v19  ;;  %4058 = vmatmul.bf16.gmra.mxu1 %v8280_v49 }
 0x5df   : > { %8278 = vst [vmem:[#allocation27_spill] sm:$0xff] %v7582_v50  ;;  %4147 = vmatmul.bf16.gmra.mxu2 %v7383_v42  ;;  %4531 = vmatpush.bf16.msra.mxu3 %v6002_v32 }
 0x5e0   : > { %4236 = vmatmul.bf16.gmra.mxu3 %v7514_v6 }
 0x5e2   : > { %v4108_v41 = vpop.f32.mrf.mxu2 }
 0x5e3   : > { %v4197_v8 = vpop.f32.mrf.mxu3  ;;  %v4109_v61 = vadd.f32 %v4108_v41, %v4020_v20  ;;  %v3932_v33 = vpop.f32.mrf.mxu0 }
 0x5e4   : > { %v4021_v19 = vpop.f32.mrf.mxu1  ;;  %v3933_v42 = vadd.f32 %v3932_v33, %v7539_v12 }
 0x5e5   : > { %v7589_v6 = vadd.f32 %v4197_v8, %v4109_v61 }
 0x5e6   : > { %v4022_v49 = vadd.f32 %v4021_v19, %v3933_v42 }
 0x5ea   : > { %v4110_v50 = vpop.f32.mrf.mxu2 }
 0x5eb   : > { %v4199_v28 = vpop.f32.mrf.mxu3  ;;  %v4111_v36 = vadd.f32 %v4110_v50, %v4022_v49  ;;  %v3935_v24 = vpop.f32.mrf.mxu0 }
 0x5ec   : > { %v4024_v40 = vpop.f32.mrf.mxu1  ;;  %v3936_v17 = vadd.f32 %v3935_v24, %v7539_v12 }
 0x5ed   : > { %v7592_v20 = vadd.f32 %v4199_v28, %v4111_v36 }
 0x5ee   : > { %v4025_v31 = vadd.f32 %v4024_v40, %v3936_v17  ;;  %3974 = vmatmul.bf16.gmra.mxu0 %v8281_v54  ;;  %4063 = vmatmul.bf16.gmra.mxu1 %v8282_v2  ;;  %v8283_v17 = vld [vmem:[#allocation47_spill] sm:$0xff] }
 0x5ef   : > { %4152 = vmatmul.bf16.gmra.mxu2 %v7391_v25 }
 0x5f0   : > { %4241 = vmatmul.bf16.gmra.mxu3 %v7522_v43 }
 0x5f2   : > { %v4113_v42 = vpop.f32.mrf.mxu2 }
 0x5f3   : > { %v4202_v19 = vpop.f32.mrf.mxu3  ;;  %v4114_v41 = vadd.f32 %v4113_v42, %v4025_v31  ;;  %v3937_v50 = vpop.f32.mrf.mxu0  ;;  %v8284_v31 = vld [vmem:[#allocation62_spill] sm:$0xff] }
 0x5f4   : > { %v4026_v49 = vpop.f32.mrf.mxu1  ;;  %v3938_v8 = vadd.f32 %v3937_v50, %v7539_v12 }
 0x5f5   : > { %v7599_v24 = vadd.f32 %v4202_v19, %v4114_v41 }
 0x5f6   : > { %v4027_v28 = vadd.f32 %v4026_v49, %v3938_v8 }
 0x5fa   : > { %v4115_v32 = vpop.f32.mrf.mxu2 }
 0x5fb   : > { %v4204_v40 = vpop.f32.mrf.mxu3  ;;  %v4116_v61 = vadd.f32 %v4115_v32, %v4027_v28  ;;  %v3940_v33 = vpop.f32.mrf.mxu0 }
 0x5fc   : > { %v4029_v29 = vpop.f32.mrf.mxu1  ;;  %v3941_v18 = vadd.f32 %v3940_v33, %v7539_v12 }
 0x5fd   : > { %v7602_v4 = vadd.f32 %v4204_v40, %v4116_v61 }
 0x5fe   : > { %v4030_v36 = vadd.f32 %v4029_v29, %v3941_v18  ;;  %3979 = vmatmul.bf16.gmra.mxu0 %v8283_v17  ;;  %4068 = vmatmul.bf16.gmra.mxu1 %v8284_v31  ;;  %v8285_v17 = vld [vmem:[#allocation32_spill] sm:$0xff] }
 0x5ff   : > { %4157 = vmatmul.bf16.gmra.mxu2 %v7399_v51 }
 0x600   : > { %4246 = vmatmul.bf16.gmra.mxu3 %v7530_v16 }
 0x602   : > { %v4118_v42 = vpop.f32.mrf.mxu2 }
 0x603   : > { %v4207_v19 = vpop.f32.mrf.mxu3  ;;  %v4119_v41 = vadd.f32 %v4118_v42, %v4030_v36  ;;  %v3942_v50 = vpop.f32.mrf.mxu0  ;;  %v8286_v36 = vld [vmem:[#allocation64_spill] sm:$0xff] }
 0x604   : > { %v4031_v49 = vpop.f32.mrf.mxu1  ;;  %v3943_v8 = vadd.f32 %v3942_v50, %v7539_v12 }
 0x605   : > { %v7609_v28 = vadd.f32 %v4207_v19, %v4119_v41 }
 0x606   : > { %v4032_v32 = vadd.f32 %v4031_v49, %v3943_v8 }
 0x60a   : > { %v4120_v40 = vpop.f32.mrf.mxu2 }
 0x60b   : > { %v4209_v61 = vpop.f32.mrf.mxu3  ;;  %v4121_v33 = vadd.f32 %v4120_v40, %v4032_v32  ;;  %v3945_v29 = vpop.f32.mrf.mxu0 }
 0x60c   : > { %v4034_v18 = vpop.f32.mrf.mxu1  ;;  %v3946_v31 = vadd.f32 %v3945_v29, %v7539_v12 }
 0x60d   : > { %v7612_v51 = vadd.f32 %v4209_v61, %v4121_v33 }
 0x60e   : > { %v4035_v16 = vadd.f32 %v4034_v18, %v3946_v31  ;;  %3984 = vmatmul.bf16.gmra.mxu0 %v8285_v17  ;;  %4073 = vmatmul.bf16.gmra.mxu1 %v8286_v36 }
 0x60f   : > { %4162 = vmatmul.bf16.gmra.mxu2 %v7410_v47 }
 0x610   : > { %4251 = vmatmul.bf16.gmra.mxu3 %v7546_v44 }
 0x612   : > { %v4123_v42 = vpop.f32.mrf.mxu2 }
 0x613   : > { %v4212_v19 = vpop.f32.mrf.mxu3  ;;  %v4124_v41 = vadd.f32 %v4123_v42, %v4035_v16  ;;  %v3947_v50 = vpop.f32.mrf.mxu0 }
 0x614   : > { %v4036_v49 = vpop.f32.mrf.mxu1  ;;  %v3948_v8 = vadd.f32 %v3947_v50, %v7539_v12 }
 0x615   : > { %v7619_v32 = vadd.f32 %v4212_v19, %v4124_v41 }
 0x616   : > { %v4037_v40 = vadd.f32 %v4036_v49, %v3948_v8 }
 0x61a   : > { %v4125_v61 = vpop.f32.mrf.mxu2 }
 0x61b   : > { %v4214_v31 = vpop.f32.mrf.mxu3  ;;  %v4126_v33 = vadd.f32 %v4125_v61, %v4037_v40  ;;  %v3950_v29 = vpop.f32.mrf.mxu0 }
 0x61c   : > { %v4039_v18 = vpop.f32.mrf.mxu1  ;;  %v3951_v36 = vadd.f32 %v3950_v29, %v7539_v12 }
 0x61d   : > { %v7622_v47 = vadd.f32 %v4214_v31, %v4126_v33 }
 0x61e   : > { %v4040_v44 = vadd.f32 %v4039_v18, %v3951_v36  ;;  %4265 = vmatmul.bf16.vlgmr.msra.gmra.mxu0 %v8236_v15  ;;  %4354 = vmatmul.bf16.vlgmr.msra.gmra.mxu1 %v8237_v46 }
 0x61f   : > { %4443 = vmatmul.bf16.vlgmr.msra.gmra.mxu2 %v8238_v62 }
 0x620   : > { %4532 = vmatmul.bf16.vlgmr.msra.gmra.mxu3 %v7418_v52 }
 0x622   : > { %v4128_v16 = vpop.f32.mrf.mxu2 }
 0x623   : > { %v4217_v42 = vpop.f32.mrf.mxu3  ;;  %v4129_v19 = vadd.f32 %v4128_v16, %v4040_v44  ;;  %v3952_v41 = vpop.f32.mrf.mxu0 }
 0x624   : > { %v4041_v50 = vpop.f32.mrf.mxu1  ;;  %v3953_v49 = vadd.f32 %v3952_v41, %v7539_v12 }
 0x625   : > { %v7629_v8 = vadd.f32 %v4217_v42, %v4129_v19 }
 0x626   : > { %v4042_v40 = vadd.f32 %v4041_v50, %v3953_v49 }
 0x62a   : > { %v4130_v61 = vpop.f32.mrf.mxu2 }
 0x62b   : > { %v4219_v36 = vpop.f32.mrf.mxu3  ;;  %v4131_v31 = vadd.f32 %v4130_v61, %v4042_v40  ;;  %v3955_v15 = vpop.f32.mrf.mxu0 }
 0x62c   : > { %v4044_v33 = vpop.f32.mrf.mxu1  ;;  %v3956_v46 = vadd.f32 %v3955_v15, %v7539_v12 }
 0x62d   : > { %v7632_v62 = vadd.f32 %v4219_v36, %v4131_v31 }
 0x62e   : > { %v4045_v52 = vadd.f32 %v4044_v33, %v3956_v46  ;;  %4270 = vmatmul.bf16.gmra.mxu0 %v8240_v27  ;;  %4359 = vmatmul.bf16.gmra.mxu1 %v8241_v60 }
 0x62f   : > { %4448 = vmatmul.bf16.gmra.mxu2 %v8242_v39 }
 0x630   : > { %4537 = vmatmul.bf16.gmra.mxu3 %v7426_v63 }
 0x632   : > { %v4133_v44 = vpop.f32.mrf.mxu2 }
 0x633   : > { %v4222_v29 = vpop.f32.mrf.mxu3  ;;  %v4134_v18 = vadd.f32 %v4133_v44, %v4045_v52  ;;  %v3957_v16 = vpop.f32.mrf.mxu0 }
 0x634   : > { %v4046_v42 = vpop.f32.mrf.mxu1  ;;  %v3958_v19 = vadd.f32 %v3957_v16, %v7539_v12 }
 0x635   : > { %v7639_v41 = vadd.f32 %v4222_v29, %v4134_v18 }
 0x636   : > { %v4047_v50 = vadd.f32 %v4046_v42, %v3958_v19 }
 0x63a   : > { %v4135_v49 = vpop.f32.mrf.mxu2 }
 0x63b   : > { %v4224_v40 = vpop.f32.mrf.mxu3  ;;  %v4136_v61 = vadd.f32 %v4135_v49, %v4047_v50  ;;  %v3960_v27 = vpop.f32.mrf.mxu0 }
 0x63c   : > { %v4049_v36 = vpop.f32.mrf.mxu1  ;;  %v3961_v60 = vadd.f32 %v3960_v27, %v7539_v12 }
 0x63d   : > { %v7642_v39 = vadd.f32 %v4224_v40, %v4136_v61 }
 0x63e   : > { %v4050_v63 = vadd.f32 %v4049_v36, %v3961_v60  ;;  %4275 = vmatmul.bf16.gmra.mxu0 %v8244_v10  ;;  %4364 = vmatmul.bf16.gmra.mxu1 %v8245_v55 }
 0x63f   : > { %4453 = vmatmul.bf16.gmra.mxu2 %v8246_v35 }
 0x640   : > { %4542 = vmatmul.bf16.gmra.mxu3 %v7434_v3 }
 0x642   : > { %v4138_v31 = vpop.f32.mrf.mxu2 }
 0x643   : > { %v4227_v15 = vpop.f32.mrf.mxu3  ;;  %v4139_v33 = vadd.f32 %v4138_v31, %v4050_v63  ;;  %v3962_v46 = vpop.f32.mrf.mxu0 }
 0x644   : > { %v4051_v52 = vpop.f32.mrf.mxu1  ;;  %v3963_v44 = vadd.f32 %v3962_v46, %v7539_v12 }
 0x645   : > { %v7649_v29 = vadd.f32 %v4227_v15, %v4139_v33 }
 0x646   : > { %v4052_v18 = vadd.f32 %v4051_v52, %v3963_v44 }
 0x64a   : > { %v4140_v16 = vpop.f32.mrf.mxu2 }
 0x64b   : > { %v4229_v42 = vpop.f32.mrf.mxu3  ;;  %v4141_v19 = vadd.f32 %v4140_v16, %v4052_v18  ;;  %v3965_v10 = vpop.f32.mrf.mxu0 }
 0x64c   : > { %v4054_v50 = vpop.f32.mrf.mxu1  ;;  %v3966_v55 = vadd.f32 %v3965_v10, %v7539_v12 }
 0x64d   : > { %v7652_v35 = vadd.f32 %v4229_v42, %v4141_v19 }
 0x64e   : > { %v4055_v3 = vadd.f32 %v4054_v50, %v3966_v55  ;;  %4280 = vmatmul.bf16.gmra.mxu0 %v8248_v7  ;;  %4369 = vmatmul.bf16.gmra.mxu1 %v8249_v14 }
 0x64f   : > { %4458 = vmatmul.bf16.gmra.mxu2 %v8250_v57 }
 0x650   : > { %4547 = vmatmul.bf16.gmra.mxu3 %v7442_v21 }
 0x652   : > { %v4143_v49 = vpop.f32.mrf.mxu2 }
 0x653   : > { %v4232_v40 = vpop.f32.mrf.mxu3  ;;  %v4144_v61 = vadd.f32 %v4143_v49, %v4055_v3  ;;  %v3967_v27 = vpop.f32.mrf.mxu0 }
 0x654   : > { %v4056_v36 = vpop.f32.mrf.mxu1  ;;  %v3968_v60 = vadd.f32 %v3967_v27, %v7539_v12 }
 0x655   : > { %v7659_v63 = vadd.f32 %v4232_v40, %v4144_v61 }
 0x656   : > { %v4057_v31 = vadd.f32 %v4056_v36, %v3968_v60 }
 0x65a   : > { %v4145_v15 = vpop.f32.mrf.mxu2 }
 0x65b   : > { %v4234_v33 = vpop.f32.mrf.mxu3  ;;  %v4146_v46 = vadd.f32 %v4145_v15, %v4057_v31  ;;  %v3970_v7 = vpop.f32.mrf.mxu0 }
 0x65c   : > { %v4059_v52 = vpop.f32.mrf.mxu1  ;;  %v3971_v14 = vadd.f32 %v3970_v7, %v7539_v12 }
 0x65d   : > { %v7662_v57 = vadd.f32 %v4234_v33, %v4146_v46 }
 0x65e   : > { %v4060_v21 = vadd.f32 %v4059_v52, %v3971_v14  ;;  %4285 = vmatmul.bf16.gmra.mxu0 %v8252_v1  ;;  %4374 = vmatmul.bf16.gmra.mxu1 %v8253_v37 }
 0x65f   : > { %4463 = vmatmul.bf16.gmra.mxu2 %v8254_v56 }
 0x660   : > { %4552 = vmatmul.bf16.gmra.mxu3 %v7450_v11 }
 0x662   : > { %v4148_v44 = vpop.f32.mrf.mxu2 }
 0x663   : > { %v4237_v18 = vpop.f32.mrf.mxu3  ;;  %v4149_v16 = vadd.f32 %v4148_v44, %v4060_v21  ;;  %v3972_v42 = vpop.f32.mrf.mxu0 }
 0x664   : > { %v4061_v19 = vpop.f32.mrf.mxu1  ;;  %v3973_v10 = vadd.f32 %v3972_v42, %v7539_v12  ;;  %v8289_v42 = vld [vmem:[#allocation15_spill] sm:$0xff] }
 0x665   : > { %v7669_v50 = vadd.f32 %v4237_v18, %v4149_v16  ;;  %v8287_v18 = vld [vmem:[#allocation54_spill] sm:$0xff]  ;;  %v8288_v16 = vld [vmem:[#allocation71_spill] sm:$0xff] }
 0x666   : > { %v4062_v55 = vadd.f32 %v4061_v19, %v3973_v10 }
 0x66a   : > { %v4150_v3 = vpop.f32.mrf.mxu2 }
 0x66b   : > { %v4239_v49 = vpop.f32.mrf.mxu3  ;;  %v4151_v40 = vadd.f32 %v4150_v3, %v4062_v55  ;;  %v3975_v1 = vpop.f32.mrf.mxu0 }
 0x66c   : > { %v4064_v61 = vpop.f32.mrf.mxu1  ;;  %v3976_v37 = vadd.f32 %v3975_v1, %v7539_v12 }
 0x66d   : > { %v7672_v56 = vadd.f32 %v4239_v49, %v4151_v40 }
 0x66e   : > { %v4065_v11 = vadd.f32 %v4064_v61, %v3976_v37  ;;  %4290 = vmatmul.bf16.gmra.mxu0 %v8256_v22  ;;  %4379 = vmatmul.bf16.gmra.mxu1 %v8257_v34 }
 0x66f   : > { %4468 = vmatmul.bf16.gmra.mxu2 %v8258_v23 }
 0x670   : > { %4557 = vmatmul.bf16.gmra.mxu3 %v7458_v58 }
 0x672   : > { %v4153_v27 = vpop.f32.mrf.mxu2 }
 0x673   : > { %v4242_v36 = vpop.f32.mrf.mxu3  ;;  %v4154_v60 = vadd.f32 %v4153_v27, %v4065_v11  ;;  %v3977_v31 = vpop.f32.mrf.mxu0 }
 0x674   : > { %v4066_v15 = vpop.f32.mrf.mxu1  ;;  %v3978_v33 = vadd.f32 %v3977_v31, %v7539_v12 }
 0x675   : > { %v7679_v46 = vadd.f32 %v4242_v36, %v4154_v60 }
 0x676   : > { %v4067_v7 = vadd.f32 %v4066_v15, %v3978_v33  ;;  %v8290_v33 = vld [vmem:[#allocation16_spill] sm:$0xff] }
 0x67a   : > { %v4155_v52 = vpop.f32.mrf.mxu2 }
 0x67b   : > { %v4244_v14 = vpop.f32.mrf.mxu3  ;;  %v4156_v21 = vadd.f32 %v4155_v52, %v4067_v7  ;;  %v3980_v22 = vpop.f32.mrf.mxu0 }
 0x67c   : > { %v4069_v44 = vpop.f32.mrf.mxu1  ;;  %v3981_v34 = vadd.f32 %v3980_v22, %v7539_v12 }
 0x67d   : > { %v7682_v23 = vadd.f32 %v4244_v14, %v4156_v21 }
 0x67e   : > { %v4070_v58 = vadd.f32 %v4069_v44, %v3981_v34  ;;  %4295 = vmatmul.bf16.gmra.mxu0 %v8260_v48  ;;  %4384 = vmatmul.bf16.gmra.mxu1 %v8287_v18  ;;  %v8291_v18 = vld [vmem:[#allocation23_spill] sm:$0xff] }
 0x67f   : > { %4473 = vmatmul.bf16.gmra.mxu2 %v8288_v16  ;;  %v7702_v16 = vperm.slane %v8291_v18, 1 }
 0x680   : > { %4562 = vmatmul.bf16.gmra.mxu3 %v8289_v42 }
 0x682   : > { %v4158_v19 = vpop.f32.mrf.mxu2 }
 0x683   : > { %v4247_v10 = vpop.f32.mrf.mxu3  ;;  %v4159_v55 = vadd.f32 %v4158_v19, %v4070_v58  ;;  %v3982_v3 = vpop.f32.mrf.mxu0 }
 0x684   : > { %v4071_v49 = vpop.f32.mrf.mxu1  ;;  %v3983_v40 = vadd.f32 %v3982_v3, %v7539_v12  ;;  %v8292_v3 = vld [vmem:[#allocation41_spill] sm:$0xff] }
 0x685   : > { %v7689_v1 = vadd.f32 %v4247_v10, %v4159_v55 }
 0x686   : > { %v4072_v61 = vadd.f32 %v4071_v49, %v3983_v40  ;;  %v8293_v49 = vld [vmem:[#allocation56_spill] sm:$0xff]  ;;  %v8295_v40 = vld [vmem:[#allocation17_spill] sm:$0xff] }
 0x68a   : > { %v4160_v37 = vpop.f32.mrf.mxu2 }
 0x68b   : > { %v4249_v11 = vpop.f32.mrf.mxu3  ;;  %v4161_v27 = vadd.f32 %v4160_v37, %v4072_v61  ;;  %v3985_v48 = vpop.f32.mrf.mxu0  ;;  %v4677_v61 = vld [vmem:[%s7984_s7] sm:$0x3] }
 0x68c   : > { %v4074_v36 = vpop.f32.mrf.mxu1  ;;  %v3986_v60 = vadd.f32 %v3985_v48, %v7539_v12 }
 0x68d   : > { %v7692_v31 = vadd.f32 %v4249_v11, %v4161_v27 }
 0x68e   : > { %v4075_v15 = vadd.f32 %v4074_v36, %v3986_v60  ;;  %4300 = vmatmul.bf16.gmra.mxu0 %v8262_v59  ;;  %4389 = vmatmul.bf16.gmra.mxu1 %v8263_v0 }
 0x68f   : > { %4478 = vmatmul.bf16.gmra.mxu2 %v7343_v38 }
 0x690   : > { %4567 = vmatmul.bf16.gmra.mxu3 %v8290_v33  ;;  %v4613_v33 = vmax.f32 %v7549_v26, 0.0 }
 0x692   : > { %v4163_v7 = vpop.f32.mrf.mxu2 }
 0x693   : > { %v4252_v52 = vpop.f32.mrf.mxu3  ;;  %v4164_v14 = vadd.f32 %v4163_v7, %v4075_v15  ;;  %v3987_v21 = vpop.f32.mrf.mxu0  ;;  %v7714_v15 = vperm.slane %v4677_v61, 0 }
 0x694   : > { %v4076_v22 = vpop.f32.mrf.mxu1  ;;  %v3988_v44 = vadd.f32 %v3987_v21, %v7539_v12  ;;  %v8294_v12 = vld [vmem:[#allocation72_spill] sm:$0xff] }
 0x695   : > { %v7699_v34 = vadd.f32 %v4252_v52, %v4164_v14  ;;  %v7718_v14 = vperm.slane %v4677_v61, 1  ;;  %v8298_v61 = vld [vmem:[#allocation18_spill] sm:$0xff] }
 0x696   : > { %v4077_v58 = vadd.f32 %v4076_v22, %v3988_v44  ;;  %v4683_v44 = vmul.f32 %v7714_v15, %v4613_v33 }
 0x69a   : > { %v4165_v59 = vpop.f32.mrf.mxu2 }
 0x69b   : > { %v4254_v42 = vpop.f32.mrf.mxu3  ;;  %v4166_v0 = vadd.f32 %v4165_v59, %v4077_v58  ;;  %v4266_v19 = vpop.f32.mrf.mxu0 }
 0x69c   : > { %v4355_v38 = vpop.f32.mrf.mxu1  ;;  %v4267_v55 = vadd.f32 %v4266_v19, %v7702_v16 }
 0x69d   : > { %v7704_v10 = vadd.f32 %v4254_v42, %v4166_v0 }
 0x69e   : > { %4305 = vmatmul.bf16.gmra.mxu0 %v8292_v3  ;;  %4394 = vmatmul.bf16.gmra.mxu1 %v8293_v49  ;;  %v4356_v37 = vadd.f32 %v4355_v38, %v4267_v55  ;;  %v4615_v55 = vmax.f32 %v7552_v30, 0.0  ;;  %v8296_v49 = vld [vmem:[#allocation57_spill] sm:$0xff] }
 0x69f   : > { %4483 = vmatmul.bf16.gmra.mxu2 %v8294_v12 }
 0x6a0   : > { %4572 = vmatmul.bf16.gmra.mxu3 %v8295_v40  ;;  %v8297_v40 = vld [vmem:[#allocation9_spill] sm:$0xff] }
 0x6a2   : > { %v4444_v11 = vpop.f32.mrf.mxu2 }
 0x6a3   : > { %v4533_v27 = vpop.f32.mrf.mxu3  ;;  %v4445_v48 = vadd.f32 %v4444_v11, %v4356_v37  ;;  %v4268_v36 = vpop.f32.mrf.mxu0  ;;  %v4685_v11 = vmul.f32 %v7714_v15, %v4615_v55 }
 0x6a4   : > { %v4357_v60 = vpop.f32.mrf.mxu1  ;;  %v4269_v52 = vadd.f32 %v4268_v36, %v7702_v16 }
 0x6a5   : > { %v4534_v7 = vadd.f32 %v4533_v27, %v4445_v48 }
 0x6a6   : > { %v4358_v22 = vadd.f32 %v4357_v60, %v4269_v52  ;;  %v8299_v52 = vld [vmem:[#allocation25_spill] sm:$0xff] }
 0x6a7   : > { %v4614_v21 = vmax.f32 %v4534_v7, 0.0 }
 0x6a9   : > { %v4684_v58 = vmul.f32 %v7718_v14, %v4614_v21 }
 0x6aa   : > { %v4446_v18 = vpop.f32.mrf.mxu2 }
 0x6ab   : > { %v4535_v59 = vpop.f32.mrf.mxu3  ;;  %v4447_v42 = vadd.f32 %v4446_v18, %v4358_v22  ;;  %v4271_v0 = vpop.f32.mrf.mxu0  ;;  %v4747_v38 = vadd.f32 %v4684_v58, %v4683_v44 }
 0x6ac   : > { %v4360_v19 = vpop.f32.mrf.mxu1  ;;  %v4272_v3 = vadd.f32 %v4271_v0, %v7702_v16 }
 0x6ad   : > { %v4536_v26 = vadd.f32 %v4535_v59, %v4447_v42  ;;  %4748 = vadd.xlane.f32.xlu0 %v4747_v38 }
 0x6ae   : > { %4310 = vmatmul.bf16.gmra.mxu0 %v8269_v5  ;;  %4399 = vmatmul.bf16.gmra.mxu1 %v8296_v49  ;;  %v4361_v37 = vadd.f32 %v4360_v19, %v4272_v3  ;;  %v4617_v5 = vmax.f32 %v8299_v52, 0.0  ;;  %v8300_v3 = vld [vmem:[#allocation26_spill] sm:$0xff] }
 0x6af   : > { %v4616_v12 = vmax.f32 %v4536_v26, 0.0  ;;  %4488 = vmatmul.bf16.gmra.mxu2 %v8297_v40  ;;  %v4619_v49 = vmax.f32 %v8300_v3, 0.0 }
 0x6b0   : > { %4577 = vmatmul.bf16.gmra.mxu3 %v8298_v61  ;;  %v4687_v18 = vmul.f32 %v7714_v15, %v4617_v5  ;;  %v8301_v61 = vld [vmem:[#allocation43_spill] sm:$0xff] }
 0x6b1   : > { %v4686_v27 = vmul.f32 %v7718_v14, %v4616_v12 }
 0x6b2   : > { %v4449_v48 = vpop.f32.mrf.mxu2 }
 0x6b3   : > { %v4538_v30 = vpop.f32.mrf.mxu3  ;;  %v4450_v36 = vadd.f32 %v4449_v48, %v4361_v37  ;;  %v4273_v60 = vpop.f32.mrf.mxu0  ;;  %v4750_v7 = vadd.f32 %v4686_v27, %v4685_v11  ;;  %v8302_v37 = vld [vmem:[#allocation58_spill] sm:$0xff]  ;;  %v8304_v48 = vld [vmem:[#allocation19_spill] sm:$0xff] }
 0x6b4   : > { %v4362_v33 = vpop.f32.mrf.mxu1  ;;  %v4274_v22 = vadd.f32 %v4273_v60, %v7702_v16  ;;  %v8303_v27 = vld [vmem:[#allocation10_spill] sm:$0xff] }
 0x6b5   : > { %v4539_v21 = vadd.f32 %v4538_v30, %v4450_v36  ;;  %4751 = vadd.xlane.f32.xlu0 %v4750_v7  ;;  %v4689_v36 = vmul.f32 %v7714_v15, %v4619_v49 }
 0x6b6   : > { %v4363_v58 = vadd.f32 %v4362_v33, %v4274_v22 }
 0x6b7   : > { %v4618_v44 = vmax.f32 %v4539_v21, 0.0 }
 0x6b9   : > { %v4688_v59 = vmul.f32 %v7718_v14, %v4618_v44  ;;  %v4621_v44 = vmax.f32 %v7569_v9, 0.0 }
 0x6ba   : > { %v4451_v42 = vpop.f32.mrf.mxu2 }
 0x6bb   : > { %v4540_v0 = vpop.f32.mrf.mxu3  ;;  %v4452_v19 = vadd.f32 %v4451_v42, %v4363_v58  ;;  %v4276_v38 = vpop.f32.mrf.mxu0  ;;  %v4753_v26 = vadd.f32 %v4688_v59, %v4687_v18 }
 0x6bc   : > { %v4365_v55 = vpop.f32.mrf.mxu1  ;;  %v4277_v40 = vadd.f32 %v4276_v38, %v7702_v16 }
 0x6bd   : > { %v4541_v12 = vadd.f32 %v4540_v0, %v4452_v19  ;;  %4754 = vadd.xlane.f32.xlu1 %v4753_v26  ;;  %v4691_v0 = vmul.f32 %v7714_v15, %v4621_v44 }
 0x6be   : > { %4315 = vmatmul.bf16.gmra.mxu0 %v8301_v61  ;;  %4404 = vmatmul.bf16.gmra.mxu1 %v8302_v37  ;;  %v4366_v30 = vadd.f32 %v4365_v55, %v4277_v40  ;;  %v4623_v40 = vmax.f32 %v7572_v13, 0.0 }
 0x6bf   : > { %v4620_v11 = vmax.f32 %v4541_v12, 0.0  ;;  %4493 = vmatmul.bf16.gmra.mxu2 %v8303_v27  ;;  %v8306_v27 = vld [vmem:[#allocation20_spill] sm:$0xff] }
 0x6c0   : > { %4582 = vmatmul.bf16.gmra.mxu3 %v8304_v48 }
 0x6c1   : > { %v4690_v60 = vmul.f32 %v7718_v14, %v4620_v11  ;;  %v8305_v11 = vld [vmem:[#allocation11_spill] sm:$0xff] }
 0x6c2   : > { %v4454_v33 = vpop.f32.mrf.mxu2 }
 0x6c3   : > { %v4543_v7 = vpop.f32.mrf.mxu3  ;;  %v4455_v52 = vadd.f32 %v4454_v33, %v4366_v30  ;;  %v4278_v5 = vpop.f32.mrf.mxu0  ;;  %v4756_v22 = vadd.f32 %v4690_v60, %v4689_v36  ;;  %v4693_v30 = vmul.f32 %v7714_v15, %v4623_v40 }
 0x6c4   : > { %v4367_v21 = vpop.f32.mrf.mxu1  ;;  %v4279_v18 = vadd.f32 %v4278_v5, %v7702_v16 }
 0x6c5   : > { %v4544_v58 = vadd.f32 %v4543_v7, %v4455_v52  ;;  %4757 = vadd.xlane.f32.xlu1 %v4756_v22 }
 0x6c6   : > { %v4368_v42 = vadd.f32 %v4367_v21, %v4279_v18  ;;  %v8307_v21 = vld [vmem:[#allocation63_spill] sm:$0xff] }
 0x6c7   : > { %v4622_v59 = vmax.f32 %v4544_v58, 0.0 }
 0x6c9   : > { %v4692_v19 = vmul.f32 %v7718_v14, %v4622_v59 }
 0x6ca   : > { %v4456_v38 = vpop.f32.mrf.mxu2 }
 0x6cb   : > { %v4545_v55 = vpop.f32.mrf.mxu3  ;;  %v4457_v26 = vadd.f32 %v4456_v38, %v4368_v42  ;;  %v4281_v3 = vpop.f32.mrf.mxu0  ;;  %v4759_v12 = vadd.f32 %v4692_v19, %v4691_v0 }
 0x6cc   : > { %v4370_v49 = vpop.f32.mrf.mxu1  ;;  %v4282_v9 = vadd.f32 %v4281_v3, %v7702_v16  ;;  %v8308_v3 = vld [vmem:[#allocation27_spill] sm:$0xff] }
 0x6cd   : > { %v4546_v61 = vadd.f32 %v4545_v55, %v4457_v26  ;;  %4760 = vadd.xlane.f32.xlu2 %v4759_v12 }
 0x6ce   : > { %4320 = vmatmul.bf16.gmra.mxu0 %v8275_v53  ;;  %4409 = vmatmul.bf16.gmra.mxu1 %v8276_v45  ;;  %v4371_v48 = vadd.f32 %v4370_v49, %v4282_v9  ;;  %v4625_v53 = vmax.f32 %v8307_v21, 0.0  ;;  %v4627_v49 = vmax.f32 %v8308_v3, 0.0  ;;  %v8310_v9 = vld [vmem:[#allocation60_spill] sm:$0xff]  ;;  %v4629_v21 = vmax.f32 %v7589_v6, 0.0 }
 0x6cf   : > { %v4624_v37 = vmax.f32 %v4546_v61, 0.0  ;;  %4498 = vmatmul.bf16.gmra.mxu2 %v8305_v11  ;;  %v8309_v61 = vld [vmem:[#allocation45_spill] sm:$0xff]  ;;  %v8311_v11 = vld [vmem:[#allocation12_spill] sm:$0xff] }
 0x6d0   : > { %4587 = vmatmul.bf16.gmra.mxu3 %v8306_v27  ;;  %v4695_v58 = vmul.f32 %v7714_v15, %v4625_v53  ;;  %v8312_v27 = vld [vmem:[#allocation21_spill] sm:$0xff] }
 0x6d1   : > { %v4694_v36 = vmul.f32 %v7718_v14, %v4624_v37 }
 0x6d2   : > { %v4459_v60 = vpop.f32.mrf.mxu2 }
 0x6d3   : > { %v4548_v13 = vpop.f32.mrf.mxu3  ;;  %v4460_v33 = vadd.f32 %v4459_v60, %v4371_v48  ;;  %v4283_v7 = vpop.f32.mrf.mxu0  ;;  %v4762_v5 = vadd.f32 %v4694_v36, %v4693_v30  ;;  %v4697_v30 = vmul.f32 %v7714_v15, %v4627_v49 }
 0x6d4   : > { %v4372_v52 = vpop.f32.mrf.mxu1  ;;  %v4284_v45 = vadd.f32 %v4283_v7, %v7702_v16 }
 0x6d5   : > { %v4549_v22 = vadd.f32 %v4548_v13, %v4460_v33  ;;  %4763 = vadd.xlane.f32.xlu2 %v4762_v5 }
 0x6d6   : > { %v4373_v59 = vadd.f32 %v4372_v52, %v4284_v45 }
 0x6d7   : > { %v4626_v44 = vmax.f32 %v4549_v22, 0.0 }
 0x6d9   : > { %v4696_v18 = vmul.f32 %v7718_v14, %v4626_v44  ;;  %v4699_v44 = vmul.f32 %v7714_v15, %v4629_v21 }
 0x6da   : > { %v4461_v42 = vpop.f32.mrf.mxu2 }
 0x6db   : > { %v4550_v0 = vpop.f32.mrf.mxu3  ;;  %v4462_v19 = vadd.f32 %v4461_v42, %v4373_v59  ;;  %v4286_v38 = vpop.f32.mrf.mxu0  ;;  %v4765_v26 = vadd.f32 %v4696_v18, %v4695_v58 }
 0x6dc   : > { %v4375_v55 = vpop.f32.mrf.mxu1  ;;  %v4287_v40 = vadd.f32 %v4286_v38, %v7702_v16 }
 0x6dd   : > { %v4551_v12 = vadd.f32 %v4550_v0, %v4462_v19  ;;  %4766 = vadd.xlane.f32.xlu0 %v4765_v26  ;;  %v4631_v26 = vmax.f32 %v7592_v20, 0.0 }
 0x6de   : > { %4325 = vmatmul.bf16.gmra.mxu0 %v8309_v61  ;;  %4414 = vmatmul.bf16.gmra.mxu1 %v8310_v9  ;;  %v4376_v48 = vadd.f32 %v4375_v55, %v4287_v40 }
 0x6df   : > { %v4628_v37 = vmax.f32 %v4551_v12, 0.0  ;;  %4503 = vmatmul.bf16.gmra.mxu2 %v8311_v11  ;;  %v4701_v61 = vmul.f32 %v7714_v15, %v4631_v26 }
 0x6e0   : > { %4592 = vmatmul.bf16.gmra.mxu3 %v8312_v27 }
 0x6e1   : > { %v4698_v36 = vmul.f32 %v7718_v14, %v4628_v37 }
 0x6e2   : > { %v4464_v60 = vpop.f32.mrf.mxu2 }
 0x6e3   : > { %v4553_v13 = vpop.f32.mrf.mxu3  ;;  %v4465_v33 = vadd.f32 %v4464_v60, %v4376_v48  ;;  %v4288_v7 = vpop.f32.mrf.mxu0  ;;  %v4768_v5 = vadd.f32 %v4698_v36, %v4697_v30 }
 0x6e4   : > { %v4377_v52 = vpop.f32.mrf.mxu1  ;;  %v4289_v22 = vadd.f32 %v4288_v7, %v7702_v16 }
 0x6e5   : > { %v4554_v53 = vadd.f32 %v4553_v13, %v4465_v33  ;;  %4769 = vadd.xlane.f32.xlu1 %v4768_v5 }
 0x6e6   : > { %v4378_v18 = vadd.f32 %v4377_v52, %v4289_v22 }
 0x6e7   : > { %v4630_v45 = vmax.f32 %v4554_v53, 0.0  ;;  %v4635_v53 = vmax.f32 %v7602_v4, 0.0 }
 0x6e9   : > { %v4700_v58 = vmul.f32 %v7718_v14, %v4630_v45  ;;  %v8313_v45 = vld [vmem:[#allocation47_spill] sm:$0xff] }
 0x6ea   : > { %v4466_v59 = vpop.f32.mrf.mxu2 }
 0x6eb   : > { %v4555_v42 = vpop.f32.mrf.mxu3  ;;  %v4467_v0 = vadd.f32 %v4466_v59, %v4378_v18  ;;  %v4291_v19 = vpop.f32.mrf.mxu0  ;;  %v4771_v55 = vadd.f32 %v4700_v58, %v4699_v44  ;;  %v8314_v44 = vld [vmem:[#allocation62_spill] sm:$0xff]  ;;  %v8315_v18 = vld [vmem:[#allocation13_spill] sm:$0xff] }
 0x6ec   : > { %v4380_v38 = vpop.f32.mrf.mxu1  ;;  %v4292_v6 = vadd.f32 %v4291_v19, %v7702_v16  ;;  %v8316_v59 = vld [vmem:[#allocation22_spill] sm:$0xff]  ;;  %v4705_v19 = vmul.f32 %v7714_v15, %v4635_v53 }
 0x6ed   : > { %v4556_v3 = vadd.f32 %v4555_v42, %v4467_v0  ;;  %4772 = vadd.xlane.f32.xlu2 %v4771_v55 }
 0x6ee   : > { %4330 = vmatmul.bf16.gmra.mxu0 %v8281_v54  ;;  %4419 = vmatmul.bf16.gmra.mxu1 %v8282_v2  ;;  %v4381_v40 = vadd.f32 %v4380_v38, %v4292_v6  ;;  %v4633_v54 = vmax.f32 %v7599_v24, 0.0 }
 0x6ef   : > { %v4632_v49 = vmax.f32 %v4556_v3, 0.0  ;;  %4508 = vmatmul.bf16.gmra.mxu2 %v7391_v25 }
 0x6f0   : > { %4597 = vmatmul.bf16.gmra.mxu3 %v7522_v43  ;;  %v4703_v43 = vmul.f32 %v7714_v15, %v4633_v54 }
 0x6f1   : > { %v4702_v12 = vmul.f32 %v7718_v14, %v4632_v49  ;;  %v4637_v49 = vmax.f32 %v7609_v28, 0.0 }
 0x6f2   : > { %v4469_v9 = vpop.f32.mrf.mxu2 }
 0x6f3   : > { %v4558_v20 = vpop.f32.mrf.mxu3  ;;  %v4470_v37 = vadd.f32 %v4469_v9, %v4381_v40  ;;  %v4293_v11 = vpop.f32.mrf.mxu0  ;;  %v4774_v48 = vadd.f32 %v4702_v12, %v4701_v61  ;;  %v4707_v9 = vmul.f32 %v7714_v15, %v4637_v49 }
 0x6f4   : > { %v4382_v27 = vpop.f32.mrf.mxu1  ;;  %v4294_v2 = vadd.f32 %v4293_v11, %v7702_v16 }
 0x6f5   : > { %v4559_v30 = vadd.f32 %v4558_v20, %v4470_v37  ;;  %4775 = vadd.xlane.f32.xlu0 %v4774_v48 }
 0x6f6   : > { %v4383_v60 = vadd.f32 %v4382_v27, %v4294_v2 }
 0x6f7   : > { %v4634_v25 = vmax.f32 %v4559_v30, 0.0 }
 0x6f9   : > { %v4704_v36 = vmul.f32 %v7718_v14, %v4634_v25  ;;  %v4639_v25 = vmax.f32 %v7612_v51, 0.0 }
 0x6fa   : > { %v4471_v13 = vpop.f32.mrf.mxu2 }
 0x6fb   : > { %v4560_v33 = vpop.f32.mrf.mxu3  ;;  %v4472_v7 = vadd.f32 %v4471_v13, %v4383_v60  ;;  %v4296_v52 = vpop.f32.mrf.mxu0  ;;  %v4777_v21 = vadd.f32 %v4704_v36, %v4703_v43  ;;  %v8317_v36 = vld [vmem:[#allocation64_spill] sm:$0xff]  ;;  %v8318_v13 = vld [vmem:[#allocation14_spill] sm:$0xff] }
 0x6fc   : > { %v4385_v5 = vpop.f32.mrf.mxu1  ;;  %v4297_v24 = vadd.f32 %v4296_v52, %v7702_v16 }
 0x6fd   : > { %v4561_v22 = vadd.f32 %v4560_v33, %v4472_v7  ;;  %4778 = vadd.xlane.f32.xlu1 %v4777_v21  ;;  %v8319_v33 = vld [vmem:[#allocation24_spill] sm:$0xff] }
 0x6fe   : > { %4335 = vmatmul.bf16.gmra.mxu0 %v8313_v45  ;;  %4424 = vmatmul.bf16.gmra.mxu1 %v8314_v44  ;;  %v4386_v0 = vadd.f32 %v4385_v5, %v4297_v24  ;;  %v4709_v5 = vmul.f32 %v7714_v15, %v4639_v25 }
 0x6ff   : > { %v4636_v58 = vmax.f32 %v4561_v22, 0.0  ;;  %4513 = vmatmul.bf16.gmra.mxu2 %v8315_v18 }
 0x700   : > { %4602 = vmatmul.bf16.gmra.mxu3 %v8316_v59 }
 0x701   : > { %v4706_v42 = vmul.f32 %v7718_v14, %v4636_v58 }
 0x702   : > { %v4474_v38 = vpop.f32.mrf.mxu2 }
 0x703   : > { %v4563_v4 = vpop.f32.mrf.mxu3  ;;  %v4475_v55 = vadd.f32 %v4474_v38, %v4386_v0  ;;  %v4298_v26 = vpop.f32.mrf.mxu0  ;;  %v4780_v6 = vadd.f32 %v4706_v42, %v4705_v19 }
 0x704   : > { %v4387_v3 = vpop.f32.mrf.mxu1  ;;  %v4299_v40 = vadd.f32 %v4298_v26, %v7702_v16 }
 0x705   : > { %v4564_v12 = vadd.f32 %v4563_v4, %v4475_v55  ;;  %4781 = vadd.xlane.f32.xlu2 %v4780_v6  ;;  %v4643_v6 = vmax.f32 %v7622_v47, 0.0 }
 0x706   : > { %v4388_v37 = vadd.f32 %v4387_v3, %v4299_v40 }
 0x707   : > { %v4638_v61 = vmax.f32 %v4564_v12, 0.0  ;;  %v7808_v12 = vld [vmem:[#allocation2] ss:$0 sm:$0xff] }
 0x709   : > { %v4708_v20 = vmul.f32 %v7718_v14, %v4638_v61 }
 0x70a   : > { %v4476_v11 = vpop.f32.mrf.mxu2 }
 0x70b   : > { %v4565_v27 = vpop.f32.mrf.mxu3  ;;  %v4477_v48 = vadd.f32 %v4476_v11, %v4388_v37  ;;  %v4301_v54 = vpop.f32.mrf.mxu0  ;;  %v4783_v2 = vadd.f32 %v4708_v20, %v4707_v9  ;;  %v4713_v11 = vmul.f32 %v7714_v15, %v4643_v6 }
 0x70c   : > { %v4390_v30 = vpop.f32.mrf.mxu1  ;;  %v4302_v28 = vadd.f32 %v4301_v54, %v7702_v16 }
 0x70d   : > { %v4566_v43 = vadd.f32 %v4565_v27, %v4477_v48  ;;  %4784 = vadd.xlane.f32.xlu0 %v4783_v2 }
 0x70e   : > { %4340 = vmatmul.bf16.gmra.mxu0 %v8285_v17  ;;  %4429 = vmatmul.bf16.gmra.mxu1 %v8317_v36  ;;  %v4391_v52 = vadd.f32 %v4390_v30, %v4302_v28  ;;  %v4641_v17 = vmax.f32 %v7619_v32, 0.0 }
 0x70f   : > { %v4640_v60 = vmax.f32 %v4566_v43, 0.0  ;;  %4518 = vmatmul.bf16.gmra.mxu2 %v8318_v13  ;;  %v4645_v43 = vmax.f32 %v7629_v8, 0.0 }
 0x710   : > { %4607 = vmatmul.bf16.gmra.mxu3 %v8319_v33  ;;  %v4711_v59 = vmul.f32 %v7714_v15, %v4641_v17 }
 0x711   : > { %v4710_v7 = vmul.f32 %v7718_v14, %v4640_v60 }
 0x712   : > { %v4479_v21 = vpop.f32.mrf.mxu2 }
 0x713   : > { %v4568_v51 = vpop.f32.mrf.mxu3  ;;  %v4480_v53 = vadd.f32 %v4479_v21, %v4391_v52  ;;  %v4303_v22 = vpop.f32.mrf.mxu0  ;;  %v4786_v45 = vadd.f32 %v4710_v7, %v4709_v5  ;;  %v4715_v7 = vmul.f32 %v7714_v15, %v4645_v43 }
 0x714   : > { %v4392_v24 = vpop.f32.mrf.mxu1  ;;  %v4304_v58 = vadd.f32 %v4303_v22, %v7702_v16 }
 0x715   : > { %v4569_v44 = vadd.f32 %v4568_v51, %v4480_v53  ;;  %4787 = vadd.xlane.f32.xlu1 %v4786_v45 }
 0x716   : > { %v4393_v0 = vadd.f32 %v4392_v24, %v4304_v58  ;;  %v4647_v58 = vmax.f32 %v7632_v62, 0.0 }
 0x717   : > { %v4642_v18 = vmax.f32 %v4569_v44, 0.0 }
 0x719   : > { %v4712_v42 = vmul.f32 %v7718_v14, %v4642_v18 }
 0x71a   : > { %v4481_v19 = vpop.f32.mrf.mxu2 }
 0x71b   : > { %v4570_v38 = vpop.f32.mrf.mxu3  ;;  %v4482_v4 = vadd.f32 %v4481_v19, %v4393_v0  ;;  %v4306_v55 = vpop.f32.mrf.mxu0  ;;  %v4789_v3 = vadd.f32 %v4712_v42, %v4711_v59 }
 0x71c   : > { %v4395_v26 = vpop.f32.mrf.mxu1  ;;  %v4307_v32 = vadd.f32 %v4306_v55, %v7702_v16 }
 0x71d   : > { %v4571_v49 = vadd.f32 %v4570_v38, %v4482_v4  ;;  %4790 = vadd.xlane.f32.xlu2 %v4789_v3  ;;  %v4717_v3 = vmul.f32 %v7714_v15, %v4647_v58 }
 0x71e   : > { %v4396_v20 = vadd.f32 %v4395_v26, %v4307_v32 }
 0x71f   : > { %v4644_v40 = vmax.f32 %v4571_v49, 0.0 }
 0x720   : > { %v4749_v61 = vpop.xlane.xlu0 %4748 }
 0x721   : > { %v4714_v9 = vmul.f32 %v7718_v14, %v4644_v40  ;;  %v4847_v37 = vadd.f32 %v7808_v12, %v4749_v61 }
 0x722   : > { %v4484_v27 = vpop.f32.mrf.mxu2 }
 0x723   : > { %v4573_v48 = vpop.f32.mrf.mxu3  ;;  %v4879_v54 = vsub.f32 0.0, %v4847_v37  ;;  %v4485_v30 = vadd.f32 %v4484_v27, %v4396_v20  ;;  %v4308_v47 = vpop.f32.mrf.mxu0  ;;  %v4792_v25 = vadd.f32 %v4714_v9, %v4713_v11  ;;  %v4649_v37 = vmax.f32 %v7639_v41, 0.0 }
 0x724   : > { %v4397_v2 = vpop.f32.mrf.mxu1  ;;  %v4309_v60 = vadd.f32 %v4308_v47, %v7702_v16 }
 0x725   : > { %v4911_v28 = vmul.f32 1.442695, %v4879_v54  ;;  %v4574_v36 = vadd.f32 %v4573_v48, %v4485_v30  ;;  %4793 = vadd.xlane.f32.xlu0 %v4792_v25  ;;  %v4719_v25 = vmul.f32 %v7714_v15, %v4649_v37 }
 0x726   : > { %v4398_v5 = vadd.f32 %v4397_v2, %v4309_v60 }
 0x727   : > { %6303 = vpow2.f32 %v4911_v28  ;;  %v4646_v13 = vmax.f32 %v4574_v36, 0.0 }
 0x728   : > { %v4752_v33 = vpop.xlane.xlu0 %4751 }
 0x729   : > { %v4716_v52 = vmul.f32 %v7718_v14, %v4646_v13  ;;  %v4848_v21 = vadd.f32 %v7808_v12, %v4752_v33 }
 0x72a   : > { %v4486_v51 = vpop.f32.mrf.mxu2 }
 0x72b   : > { %v4575_v53 = vpop.f32.mrf.mxu3  ;;  %v4880_v22 = vsub.f32 0.0, %v4848_v21  ;;  %v4487_v8 = vadd.f32 %v4486_v51, %v4398_v5  ;;  %v4311_v24 = vpop.f32.mrf.mxu0  ;;  %v4795_v17 = vadd.f32 %v4716_v52, %v4715_v7  ;;  %v4651_v51 = vmax.f32 %v7642_v39, 0.0 }
 0x72c   : > { %v4400_v45 = vpop.f32.mrf.mxu1  ;;  %v4312_v42 = vadd.f32 %v4311_v24, %v7702_v16 }
 0x72d   : > { %v6304_v44 = vpop.eup %6303  ;;  %v4913_v18 = vmul.f32 1.442695, %v4880_v22  ;;  %v4576_v59 = vadd.f32 %v4575_v53, %v4487_v8  ;;  %4796 = vadd.xlane.f32.xlu1 %v4795_v17  ;;  %v4721_v39 = vmul.f32 %v7714_v15, %v4651_v51 }
 0x72e   : > { %v4975_v0 = vadd.f32 1.0, %v6304_v44  ;;  %v4401_v55 = vadd.f32 %v4400_v45, %v4312_v42 }
 0x72f   : > { %6305 = vpow2.f32 %v4913_v18  ;;  %v4648_v19 = vmax.f32 %v4576_v59, 0.0 }
 0x730   : > { %6307 = vrcp.f32 %v4975_v0  ;;  %v4755_v38 = vpop.xlane.xlu1 %4754 }
 0x731   : > { %v4718_v4 = vmul.f32 %v7718_v14, %v4648_v19  ;;  %v4849_v26 = vadd.f32 %v7808_v12, %v4755_v38 }
 0x732   : > { %v4489_v6 = vpop.f32.mrf.mxu2 }
 0x733   : > { %v4578_v62 = vpop.f32.mrf.mxu3  ;;  %v4881_v49 = vsub.f32 0.0, %v4849_v26  ;;  %v4490_v32 = vadd.f32 %v4489_v6, %v4401_v55  ;;  %v4313_v40 = vpop.f32.mrf.mxu0  ;;  %v4798_v9 = vadd.f32 %v4718_v4, %v4717_v3  ;;  %v4653_v6 = vmax.f32 %v7649_v29, 0.0 }
 0x734   : > { %v4402_v61 = vpop.f32.mrf.mxu1  ;;  %v4314_v48 = vadd.f32 %v4313_v40, %v7702_v16 }
 0x735   : > { %v6306_v20 = vpop.eup %6305  ;;  %v4915_v11 = vmul.f32 1.442695, %v4881_v49  ;;  %v4579_v27 = vadd.f32 %v4578_v62, %v4490_v32  ;;  %4799 = vadd.xlane.f32.xlu2 %v4798_v9  ;;  %v4723_v37 = vmul.f32 %v7714_v15, %v4653_v6 }
 0x736   : > { %v6308_v54 = vpop.eup %6307  ;;  %v4976_v30 = vadd.f32 1.0, %v6306_v20  ;;  %v4403_v28 = vadd.f32 %v4402_v61, %v4314_v48 }
 0x737   : > { %5040 = vst.msk [vmem:[%s7827_s30] sm:$0xff] %vm5039_vm2, %v6308_v54  ;;  %6309 = vpow2.f32 %v4915_v11  ;;  %v4650_v47 = vmax.f32 %v4579_v27, 0.0 }
 0x738   : > { %6311 = vrcp.f32 %v4976_v30  ;;  %v4758_v2 = vpop.xlane.xlu1 %4757 }
 0x739   : > { %v4720_v43 = vmul.f32 %v7718_v14, %v4650_v47  ;;  %v4850_v41 = vadd.f32 %v7808_v12, %v4758_v2 }
 0x73a   : > { %v4491_v36 = vpop.f32.mrf.mxu2 }
 0x73b   : > { %v4580_v60 = vpop.f32.mrf.mxu3  ;;  %v4882_v13 = vsub.f32 0.0, %v4850_v41  ;;  %v4492_v33 = vadd.f32 %v4491_v36, %v4403_v28  ;;  %v4316_v7 = vpop.f32.mrf.mxu0  ;;  %v4801_v5 = vadd.f32 %v4720_v43, %v4719_v25  ;;  %v4655_v41 = vmax.f32 %v7652_v35, 0.0 }
 0x73c   : > { %v4405_v52 = vpop.f32.mrf.mxu1  ;;  %v4317_v8 = vadd.f32 %v4316_v7, %v7702_v16 }
 0x73d   : > { %v6310_v21 = vpop.eup %6309  ;;  %v4917_v53 = vmul.f32 1.442695, %v4882_v13  ;;  %v4581_v22 = vadd.f32 %v4580_v60, %v4492_v33  ;;  %4802 = vadd.xlane.f32.xlu0 %v4801_v5  ;;  %v4725_v35 = vmul.f32 %v7714_v15, %v4655_v41 }
 0x73e   : > { %v6312_v24 = vpop.eup %6311  ;;  %v4977_v45 = vadd.f32 1.0, %v6310_v21  ;;  %v4406_v18 = vadd.f32 %v4405_v52, %v4317_v8 }
 0x73f   : > { %5041 = vst.msk [vmem:[%s7827_s30 + $0x8] sm:$0xff] %vm5039_vm2, %v6312_v24  ;;  %6313 = vpow2.f32 %v4917_v53  ;;  %v4652_v17 = vmax.f32 %v4581_v22, 0.0 }
 0x740   : > { %6315 = vrcp.f32 %v4977_v45  ;;  %v4761_v44 = vpop.xlane.xlu2 %4760 }
 0x741   : > { %v4722_v58 = vmul.f32 %v7718_v14, %v4652_v17  ;;  %v4851_v59 = vadd.f32 %v7808_v12, %v4761_v44 }
 0x742   : > { %v4494_v42 = vpop.f32.mrf.mxu2 }
 0x743   : > { %v4583_v0 = vpop.f32.mrf.mxu3  ;;  %v4883_v19 = vsub.f32 0.0, %v4851_v59  ;;  %v4495_v38 = vadd.f32 %v4494_v42, %v4406_v18  ;;  %v4318_v4 = vpop.f32.mrf.mxu0  ;;  %v4804_v26 = vadd.f32 %v4722_v58, %v4721_v39  ;;  %v4657_v59 = vmax.f32 %v7659_v63, 0.0 }
 0x744   : > { %v4407_v55 = vpop.f32.mrf.mxu1  ;;  %v4319_v32 = vadd.f32 %v4318_v4, %v7702_v16 }
 0x745   : > { %v6314_v3 = vpop.eup %6313  ;;  %v4919_v62 = vmul.f32 1.442695, %v4883_v19  ;;  %v4584_v49 = vadd.f32 %v4583_v0, %v4495_v38  ;;  %4805 = vadd.xlane.f32.xlu1 %v4804_v26  ;;  %v4727_v26 = vmul.f32 %v7714_v15, %v4657_v59 }
 0x746   : > { %v6316_v40 = vpop.eup %6315  ;;  %v4978_v61 = vadd.f32 1.0, %v6314_v3  ;;  %v4408_v27 = vadd.f32 %v4407_v55, %v4319_v32 }
 0x747   : > { %5042 = vst.msk [vmem:[%s7827_s30 + $0x10] sm:$0xff] %vm5039_vm2, %v6316_v40  ;;  %6317 = vpow2.f32 %v4919_v62  ;;  %v4654_v9 = vmax.f32 %v4584_v49, 0.0 }
 0x748   : > { %6319 = vrcp.f32 %v4978_v61  ;;  %v4764_v20 = vpop.xlane.xlu2 %4763 }
 0x749   : > { %v4724_v11 = vmul.f32 %v7718_v14, %v4654_v9  ;;  %v4852_v29 = vadd.f32 %v7808_v12, %v4764_v20 }
 0x74a   : > { %v4496_v48 = vpop.f32.mrf.mxu2 }
 0x74b   : > { %v4585_v54 = vpop.f32.mrf.mxu3  ;;  %v4884_v30 = vsub.f32 0.0, %v4852_v29  ;;  %v4497_v47 = vadd.f32 %v4496_v48, %v4408_v27  ;;  %v4321_v2 = vpop.f32.mrf.mxu0  ;;  %v4807_v43 = vadd.f32 %v4724_v11, %v4723_v37  ;;  %v4659_v11 = vmax.f32 %v7662_v57, 0.0 }
 0x74c   : > { %v4410_v25 = vpop.f32.mrf.mxu1  ;;  %v4322_v13 = vadd.f32 %v4321_v2, %v7702_v16 }
 0x74d   : > { %v6318_v28 = vpop.eup %6317  ;;  %v4921_v36 = vmul.f32 1.442695, %v4884_v30  ;;  %v4586_v60 = vadd.f32 %v4585_v54, %v4497_v47  ;;  %4808 = vadd.xlane.f32.xlu2 %v4807_v43  ;;  %v4729_v57 = vmul.f32 %v7714_v15, %v4659_v11 }
 0x74e   : > { %v6320_v33 = vpop.eup %6319  ;;  %v4979_v7 = vadd.f32 1.0, %v6318_v28  ;;  %v4411_v51 = vadd.f32 %v4410_v25, %v4322_v13 }
 0x74f   : > { %5043 = vst.msk [vmem:[%s7827_s30 + $0x18] sm:$0xff] %vm5039_vm2, %v6320_v33  ;;  %6321 = vpow2.f32 %v4921_v36  ;;  %v4656_v52 = vmax.f32 %v4586_v60, 0.0 }
 0x750   : > { %6323 = vrcp.f32 %v4979_v7  ;;  %v4767_v5 = vpop.xlane.xlu0 %4766 }
 0x751   : > { %v4726_v21 = vmul.f32 %v7718_v14, %v4656_v52  ;;  %v4853_v53 = vadd.f32 %v7808_v12, %v4767_v5 }
 0x752   : > { %v4499_v22 = vpop.f32.mrf.mxu2 }
 0x753   : > { %v4588_v8 = vpop.f32.mrf.mxu3  ;;  %v4885_v24 = vsub.f32 0.0, %v4853_v53  ;;  %v4500_v45 = vadd.f32 %v4499_v22, %v4411_v51  ;;  %v4323_v17 = vpop.f32.mrf.mxu0  ;;  %v4810_v58 = vadd.f32 %v4726_v21, %v4725_v35  ;;  %v4661_v21 = vmax.f32 %v7669_v50, 0.0 }
 0x754   : > { %v4412_v44 = vpop.f32.mrf.mxu1  ;;  %v4324_v0 = vadd.f32 %v4323_v17, %v7702_v16 }
 0x755   : > { %v6322_v18 = vpop.eup %6321  ;;  %v4923_v39 = vmul.f32 1.442695, %v4885_v24  ;;  %v4589_v42 = vadd.f32 %v4588_v8, %v4500_v45  ;;  %4811 = vadd.xlane.f32.xlu0 %v4810_v58  ;;  %v4731_v17 = vmul.f32 %v7714_v15, %v4661_v21 }
 0x756   : > { %v6324_v19 = vpop.eup %6323  ;;  %v4980_v38 = vadd.f32 1.0, %v6322_v18  ;;  %v4413_v6 = vadd.f32 %v4412_v44, %v4324_v0 }
 0x757   : > { %5044 = vst.msk [vmem:[%s7827_s30 + $0x20] sm:$0xff] %vm5039_vm2, %v6324_v19  ;;  %6325 = vpow2.f32 %v4923_v39  ;;  %v4658_v4 = vmax.f32 %v4589_v42, 0.0 }
 0x758   : > { %6327 = vrcp.f32 %v4980_v38  ;;  %v4770_v55 = vpop.xlane.xlu1 %4769 }
 0x759   : > { %v4728_v3 = vmul.f32 %v7718_v14, %v4658_v4  ;;  %v4854_v63 = vadd.f32 %v7808_v12, %v4770_v55  ;;  %v4663_v55 = vmax.f32 %v7672_v56, 0.0 }
 0x75a   : > { %v4501_v62 = vpop.f32.mrf.mxu2 }
 0x75b   : > { %v4590_v49 = vpop.f32.mrf.mxu3  ;;  %v4886_v32 = vsub.f32 0.0, %v4854_v63  ;;  %v4502_v40 = vadd.f32 %v4501_v62, %v4413_v6  ;;  %v4326_v61 = vpop.f32.mrf.mxu0  ;;  %v4813_v20 = vadd.f32 %v4728_v3, %v4727_v26  ;;  %v4733_v56 = vmul.f32 %v7714_v15, %v4663_v55 }
 0x75c   : > { %v4415_v9 = vpop.f32.mrf.mxu1  ;;  %v4327_v48 = vadd.f32 %v4326_v61, %v7702_v16 }
 0x75d   : > { %v6326_v37 = vpop.eup %6325  ;;  %v4925_v27 = vmul.f32 1.442695, %v4886_v32  ;;  %v4591_v29 = vadd.f32 %v4590_v49, %v4502_v40  ;;  %4814 = vadd.xlane.f32.xlu1 %v4813_v20 }
 0x75e   : > { %v6328_v54 = vpop.eup %6327  ;;  %v4981_v30 = vadd.f32 1.0, %v6326_v37  ;;  %v4416_v43 = vadd.f32 %v4415_v9, %v4327_v48 }
 0x75f   : > { %5045 = vst.msk [vmem:[%s7827_s30 + $0x28] sm:$0xff] %vm5039_vm2, %v6328_v54  ;;  %6329 = vpow2.f32 %v4925_v27  ;;  %v4660_v47 = vmax.f32 %v4591_v29, 0.0 }
 0x760   : > { %6331 = vrcp.f32 %v4981_v30  ;;  %v4773_v2 = vpop.xlane.xlu2 %4772 }
 0x761   : > { %v4730_v25 = vmul.f32 %v7718_v14, %v4660_v47  ;;  %v4855_v28 = vadd.f32 %v7808_v12, %v4773_v2  ;;  %v4665_v47 = vmax.f32 %v7679_v46, 0.0 }
 0x762   : > { %v4504_v41 = vpop.f32.mrf.mxu2 }
 0x763   : > { %v4593_v36 = vpop.f32.mrf.mxu3  ;;  %v4887_v60 = vsub.f32 0.0, %v4855_v28  ;;  %v4505_v13 = vadd.f32 %v4504_v41, %v4416_v43  ;;  %v4328_v33 = vpop.f32.mrf.mxu0  ;;  %v4816_v52 = vadd.f32 %v4730_v25, %v4729_v57 }
 0x764   : > { %v4417_v7 = vpop.f32.mrf.mxu1  ;;  %v4329_v35 = vadd.f32 %v4328_v33, %v7702_v16 }
 0x765   : > { %v6330_v5 = vpop.eup %6329  ;;  %v4927_v51 = vmul.f32 1.442695, %v4887_v60  ;;  %v4594_v53 = vadd.f32 %v4593_v36, %v4505_v13  ;;  %4817 = vadd.xlane.f32.xlu2 %v4816_v52  ;;  %v4735_v60 = vmul.f32 %v7714_v15, %v4665_v47 }
 0x766   : > { %v6332_v22 = vpop.eup %6331  ;;  %v4982_v8 = vadd.f32 1.0, %v6330_v5  ;;  %v4418_v58 = vadd.f32 %v4417_v7, %v4329_v35 }
 0x767   : > { %5046 = vst.msk [vmem:[%s7827_s30 + $0x30] sm:$0xff] %vm5039_vm2, %v6332_v22  ;;  %6333 = vpow2.f32 %v4927_v51  ;;  %v4662_v24 = vmax.f32 %v4594_v53, 0.0 }
 0x768   : > { %6335 = vrcp.f32 %v4982_v8  ;;  %v4776_v45 = vpop.xlane.xlu0 %4775  ;;  %v4667_v8 = vmax.f32 %v7682_v23, 0.0 }
 0x769   : > { %v4732_v44 = vmul.f32 %v7718_v14, %v4662_v24  ;;  %v4856_v50 = vadd.f32 %v7808_v12, %v4776_v45 }
 0x76a   : > { %v4506_v18 = vpop.f32.mrf.mxu2  ;;  %v4737_v23 = vmul.f32 %v7714_v15, %v4667_v8 }
 0x76b   : > { %v4595_v59 = vpop.f32.mrf.mxu3  ;;  %v4888_v39 = vsub.f32 0.0, %v4856_v50  ;;  %v4507_v42 = vadd.f32 %v4506_v18, %v4418_v58  ;;  %v4331_v0 = vpop.f32.mrf.mxu0  ;;  %v4819_v38 = vadd.f32 %v4732_v44, %v4731_v17 }
 0x76c   : > { %v4420_v19 = vpop.f32.mrf.mxu1  ;;  %v4332_v6 = vadd.f32 %v4331_v0, %v7702_v16 }
 0x76d   : > { %v6334_v4 = vpop.eup %6333  ;;  %v4929_v26 = vmul.f32 1.442695, %v4888_v39  ;;  %v4596_v3 = vadd.f32 %v4595_v59, %v4507_v42  ;;  %4820 = vadd.xlane.f32.xlu0 %v4819_v38 }
 0x76e   : > { %v6336_v63 = vpop.eup %6335  ;;  %v4983_v62 = vadd.f32 1.0, %v6334_v4  ;;  %v4421_v61 = vadd.f32 %v4420_v19, %v4332_v6 }
 0x76f   : > { %5047 = vst.msk [vmem:[%s7827_s30 + $0x38] sm:$0xff] %vm5039_vm2, %v6336_v63  ;;  %6337 = vpow2.f32 %v4929_v26  ;;  %v4664_v49 = vmax.f32 %v4596_v3, 0.0  ;;  %v4669_v63 = vmax.f32 %v7689_v1, 0.0 }
 0x770   : > { %6339 = vrcp.f32 %v4983_v62  ;;  %v4779_v32 = vpop.xlane.xlu1 %4778 }
 0x771   : > { %v4734_v40 = vmul.f32 %v7718_v14, %v4664_v49  ;;  %v4857_v9 = vadd.f32 %v7808_v12, %v4779_v32 }
 0x772   : > { %v4509_v20 = vpop.f32.mrf.mxu2 }
 0x773   : > { %v4598_v37 = vpop.f32.mrf.mxu3  ;;  %v4889_v11 = vsub.f32 0.0, %v4857_v9  ;;  %v4510_v27 = vadd.f32 %v4509_v20, %v4421_v61  ;;  %v4333_v29 = vpop.f32.mrf.mxu0  ;;  %v4822_v54 = vadd.f32 %v4734_v40, %v4733_v56  ;;  %v4739_v20 = vmul.f32 %v7714_v15, %v4669_v63 }
 0x774   : > { %v4422_v48 = vpop.f32.mrf.mxu1  ;;  %v4334_v43 = vadd.f32 %v4333_v29, %v7702_v16 }
 0x775   : > { %v6338_v30 = vpop.eup %6337  ;;  %v4931_v2 = vmul.f32 1.442695, %v4889_v11  ;;  %v4599_v25 = vadd.f32 %v4598_v37, %v4510_v27  ;;  %4823 = vadd.xlane.f32.xlu1 %v4822_v54 }
 0x776   : > { %v6340_v28 = vpop.eup %6339  ;;  %v4984_v57 = vadd.f32 1.0, %v6338_v30  ;;  %v4423_v33 = vadd.f32 %v4422_v48, %v4334_v43 }
 0x777   : > { %5048 = vst.msk [vmem:[%s7827_s30 + $0x40] sm:$0xff] %vm5039_vm2, %v6340_v28  ;;  %6341 = vpow2.f32 %v4931_v2  ;;  %v4666_v41 = vmax.f32 %v4599_v25, 0.0  ;;  %v4671_v25 = vmax.f32 %v7692_v31, 0.0 }
 0x778   : > { %6343 = vrcp.f32 %v4984_v57  ;;  %v4782_v36 = vpop.xlane.xlu2 %4781 }
 0x779   : > { %v4736_v13 = vmul.f32 %v7718_v14, %v4666_v41  ;;  %v4858_v46 = vadd.f32 %v7808_v12, %v4782_v36  ;;  %v4741_v31 = vmul.f32 %v7714_v15, %v4671_v25 }
 0x77a   : > { %v4511_v7 = vpop.f32.mrf.mxu2 }
 0x77b   : > { %v4600_v52 = vpop.f32.mrf.mxu3  ;;  %v4890_v5 = vsub.f32 0.0, %v4858_v46  ;;  %v4512_v21 = vadd.f32 %v4511_v7, %v4423_v33  ;;  %v4336_v51 = vpop.f32.mrf.mxu0  ;;  %v4825_v35 = vadd.f32 %v4736_v13, %v4735_v60 }
 0x77c   : > { %v4425_v53 = vpop.f32.mrf.mxu1  ;;  %v4337_v17 = vadd.f32 %v4336_v51, %v7702_v16 }
 0x77d   : > { %v6342_v22 = vpop.eup %6341  ;;  %v4933_v24 = vmul.f32 1.442695, %v4890_v5  ;;  %v4601_v45 = vadd.f32 %v4600_v52, %v4512_v21  ;;  %4826 = vadd.xlane.f32.xlu2 %v4825_v35 }
 0x77e   : > { %v6344_v44 = vpop.eup %6343  ;;  %v4985_v58 = vadd.f32 1.0, %v6342_v22  ;;  %v4426_v39 = vadd.f32 %v4425_v53, %v4337_v17 }
 0x77f   : > { %5049 = vst.msk [vmem:[%s7827_s30 + $0x48] sm:$0xff] %vm5039_vm2, %v6344_v44  ;;  %6345 = vpow2.f32 %v4933_v24  ;;  %v4668_v50 = vmax.f32 %v4601_v45, 0.0  ;;  %v4673_v24 = vmax.f32 %v7699_v34, 0.0 }
 0x780   : > { %6347 = vrcp.f32 %v4985_v58  ;;  %v4785_v18 = vpop.xlane.xlu0 %4784 }
 0x781   : > { %v4738_v59 = vmul.f32 %v7718_v14, %v4668_v50  ;;  %v4859_v42 = vadd.f32 %v7808_v12, %v4785_v18 }
 0x782   : > { %v4514_v0 = vpop.f32.mrf.mxu2 }
 0x783   : > { %v4603_v19 = vpop.f32.mrf.mxu3  ;;  %v4891_v38 = vsub.f32 0.0, %v4859_v42  ;;  %v4515_v4 = vadd.f32 %v4514_v0, %v4426_v39  ;;  %v4338_v55 = vpop.f32.mrf.mxu0  ;;  %v4828_v26 = vadd.f32 %v4738_v59, %v4737_v23  ;;  %v4743_v42 = vmul.f32 %v7714_v15, %v4673_v24 }
 0x784   : > { %v4427_v3 = vpop.f32.mrf.mxu1  ;;  %v4339_v32 = vadd.f32 %v4338_v55, %v7702_v16 }
 0x785   : > { %v6346_v6 = vpop.eup %6345  ;;  %v4935_v62 = vmul.f32 1.442695, %v4891_v38  ;;  %v4604_v49 = vadd.f32 %v4603_v19, %v4515_v4  ;;  %4829 = vadd.xlane.f32.xlu0 %v4828_v26 }
 0x786   : > { %v6348_v40 = vpop.eup %6347  ;;  %v4986_v61 = vadd.f32 1.0, %v6346_v6  ;;  %v4428_v11 = vadd.f32 %v4427_v3, %v4339_v32  ;;  %v4675_v3 = vmax.f32 %v7704_v10, 0.0 }
 0x787   : > { %5050 = vst.msk [vmem:[%s7827_s30 + $0x50] sm:$0xff] %vm5039_vm2, %v6348_v40  ;;  %6349 = vpow2.f32 %v4935_v62  ;;  %v4670_v9 = vmax.f32 %v4604_v49, 0.0 }
 0x788   : > { %6351 = vrcp.f32 %v4986_v61  ;;  %v4788_v56 = vpop.xlane.xlu1 %4787 }
 0x789   : > { %v4740_v37 = vmul.f32 %v7718_v14, %v4670_v9  ;;  %v4860_v1 = vadd.f32 %v7808_v12, %v4788_v56  ;;  %v4745_v56 = vmul.f32 %v7714_v15, %v4675_v3 }
 0x78a   : > { %v4516_v27 = vpop.f32.mrf.mxu2 }
 0x78b   : > { %v4605_v29 = vpop.f32.mrf.mxu3  ;;  %v4892_v48 = vsub.f32 0.0, %v4860_v1  ;;  %v4517_v54 = vadd.f32 %v4516_v27, %v4428_v11  ;;  %v4341_v30 = vpop.f32.mrf.mxu0  ;;  %v4831_v47 = vadd.f32 %v4740_v37, %v4739_v20 }
 0x78c   : > { %v4342_v57 = vadd.f32 %v4341_v30, %v7702_v16  ;;  %v4430_v60 = vpop.f32.mrf.mxu1 }
 0x78d   : > { %v6350_v2 = vpop.eup %6349  ;;  %v4937_v43 = vmul.f32 1.442695, %v4892_v48  ;;  %v4606_v28 = vadd.f32 %v4605_v29, %v4517_v54  ;;  %4832 = vadd.xlane.f32.xlu1 %v4831_v47 }
 0x78e   : > { %v6352_v41 = vpop.eup %6351  ;;  %v4987_v36 = vadd.f32 1.0, %v6350_v2  ;;  %v4431_v7 = vadd.f32 %v4430_v60, %v4342_v57 }
 0x78f   : > { %5051 = vst.msk [vmem:[%s7827_s30 + $0x58] sm:$0xff] %vm5039_vm2, %v6352_v41  ;;  %6353 = vpow2.f32 %v4937_v43  ;;  %v4672_v13 = vmax.f32 %v4606_v28, 0.0 }
 0x790   : > { %6355 = vrcp.f32 %v4987_v36  ;;  %v4791_v33 = vpop.xlane.xlu2 %4790 }
 0x791   : > { %v4742_v46 = vmul.f32 %v7718_v14, %v4672_v13  ;;  %v4861_v52 = vadd.f32 %v7808_v12, %v4791_v33 }
 0x792   : > { %v4519_v5 = vpop.f32.mrf.mxu2 }
 0x793   : > { %v4608_v21 = vpop.f32.mrf.mxu3  ;;  %v4893_v51 = vsub.f32 0.0, %v4861_v52  ;;  %v4520_v53 = vadd.f32 %v4519_v5, %v4431_v7  ;;  %v4343_v35 = vpop.f32.mrf.mxu0  ;;  %v4834_v22 = vadd.f32 %v4742_v46, %v4741_v31 }
 0x794   : > { %v4344_v44 = vadd.f32 %v4343_v35, %v7702_v16  ;;  %v4432_v59 = vpop.f32.mrf.mxu1 }
 0x795   : > { %v6354_v8 = vpop.eup %6353  ;;  %v4939_v45 = vmul.f32 1.442695, %v4893_v51  ;;  %v4609_v17 = vadd.f32 %v4608_v21, %v4520_v53  ;;  %4835 = vadd.xlane.f32.xlu2 %v4834_v22 }
 0x796   : > { %v6356_v58 = vpop.eup %6355  ;;  %v4988_v50 = vadd.f32 1.0, %v6354_v8  ;;  %v4433_v34 = vadd.f32 %v4432_v59, %v4344_v44 }
 0x797   : > { %5052 = vst.msk [vmem:[%s7827_s30 + $0x60] sm:$0xff] %vm5039_vm2, %v6356_v58  ;;  %6357 = vpow2.f32 %v4939_v45  ;;  %v4674_v18 = vmax.f32 %v4609_v17, 0.0 }
 0x798   : > { %6359 = vrcp.f32 %v4988_v50  ;;  %v4794_v39 = vpop.xlane.xlu0 %4793 }
 0x799   : > { %v4744_v23 = vmul.f32 %v7718_v14, %v4674_v18  ;;  %v4862_v0 = vadd.f32 %v7808_v12, %v4794_v39 }
 0x79a   : > { %v4521_v19 = vpop.f32.mrf.mxu2 }
 0x79b   : > { %v4894_v16 = vsub.f32 0.0, %v4862_v0  ;;  %v4522_v38 = vadd.f32 %v4521_v19, %v4433_v34  ;;  %v4837_v4 = vadd.f32 %v4744_v23, %v4743_v42  ;;  %v4610_v55 = vpop.f32.mrf.mxu3 }
 0x79d   : > { %v6358_v26 = vpop.eup %6357  ;;  %v4941_v6 = vmul.f32 1.442695, %v4894_v16  ;;  %v4611_v63 = vadd.f32 %v4610_v55, %v4522_v38  ;;  %4838 = vadd.xlane.f32.xlu0 %v4837_v4 }
 0x79e   : > { %v6360_v62 = vpop.eup %6359  ;;  %v4989_v49 = vadd.f32 1.0, %v6358_v26 }
 0x79f   : > { %5053 = vst.msk [vmem:[%s7827_s30 + $0x68] sm:$0xff] %vm5039_vm2, %v6360_v62  ;;  %6361 = vpow2.f32 %v4941_v6  ;;  %v4676_v32 = vmax.f32 %v4611_v63, 0.0 }
 0x7a0   : > { %6363 = vrcp.f32 %v4989_v49  ;;  %v4797_v40 = vpop.xlane.xlu1 %4796 }
 0x7a1   : > { %v4746_v61 = vmul.f32 %v7718_v14, %v4676_v32  ;;  %v4863_v9 = vadd.f32 %v7808_v12, %v4797_v40 }
 0x7a3   : > { %v4895_v20 = vsub.f32 0.0, %v4863_v9  ;;  %v4840_v10 = vadd.f32 %v4746_v61, %v4745_v56 }
 0x7a5   : > { %v6362_v37 = vpop.eup %6361  ;;  %v4943_v11 = vmul.f32 1.442695, %v4895_v20  ;;  %4841 = vadd.xlane.f32.xlu1 %v4840_v10 }
 0x7a6   : > { %v6364_v1 = vpop.eup %6363  ;;  %v4990_v27 = vadd.f32 1.0, %v6362_v37 }
 0x7a7   : > { %5054 = vst.msk [vmem:[%s7827_s30 + $0x70] sm:$0xff] %vm5039_vm2, %v6364_v1  ;;  %6365 = vpow2.f32 %v4943_v11 }
 0x7a8   : > { %6367 = vrcp.f32 %v4990_v27  ;;  %v4800_v29 = vpop.xlane.xlu2 %4799 }
 0x7a9   : > { %v4864_v48 = vadd.f32 %v7808_v12, %v4800_v29 }
 0x7ab   : > { %v4896_v14 = vsub.f32 0.0, %v4864_v48 }
 0x7ad   : > { %v6366_v54 = vpop.eup %6365  ;;  %v4945_v30 = vmul.f32 1.442695, %v4896_v14 }
 0x7ae   : > { %v6368_v15 = vpop.eup %6367  ;;  %v4991_v47 = vadd.f32 1.0, %v6366_v54 }
 0x7af   : > { %5055 = vst.msk [vmem:[%s7827_s30 + $0x78] sm:$0xff] %vm5039_vm2, %v6368_v15  ;;  %6369 = vpow2.f32 %v4945_v30 }
 0x7b0   : > { %6371 = vrcp.f32 %v4991_v47  ;;  %v4803_v2 = vpop.xlane.xlu0 %4802 }
 0x7b1   : > { %v4865_v25 = vadd.f32 %v7808_v12, %v4803_v2 }
 0x7b3   : > { %v4897_v43 = vsub.f32 0.0, %v4865_v25 }
 0x7b5   : > { %v6370_v28 = vpop.eup %6369  ;;  %v4947_v57 = vmul.f32 1.442695, %v4897_v43 }
 0x7b6   : > { %v6372_v41 = vpop.eup %6371  ;;  %v4992_v36 = vadd.f32 1.0, %v6370_v28 }
 0x7b7   : > { %5056 = vst.msk [vmem:[%s7827_s30 + $0x80] sm:$0xff] %vm5039_vm2, %v6372_v41  ;;  %6373 = vpow2.f32 %v4947_v57 }
 0x7b8   : > { %6375 = vrcp.f32 %v4992_v36  ;;  %v4806_v60 = vpop.xlane.xlu1 %4805 }
 0x7b9   : > { %v4866_v13 = vadd.f32 %v7808_v12, %v4806_v60 }
 0x7bb   : > { %v4898_v33 = vsub.f32 0.0, %v4866_v13 }
 0x7bd   : > { %v6374_v46 = vpop.eup %6373  ;;  %v4949_v7 = vmul.f32 1.442695, %v4898_v33 }
 0x7be   : > { %v6376_v52 = vpop.eup %6375  ;;  %v4993_v31 = vadd.f32 1.0, %v6374_v46 }
 0x7bf   : > { %5057 = vst.msk [vmem:[%s7827_s30 + $0x88] sm:$0xff] %vm5039_vm2, %v6376_v52  ;;  %6377 = vpow2.f32 %v4949_v7 }
 0x7c0   : > { %6379 = vrcp.f32 %v4993_v31  ;;  %v4809_v5 = vpop.xlane.xlu2 %4808 }
 0x7c1   : > { %v4867_v21 = vadd.f32 %v7808_v12, %v4809_v5 }
 0x7c3   : > { %v4899_v51 = vsub.f32 0.0, %v4867_v21  ;;  %v6432_v21 = vld [vmem:[#allocation2] ss:$0 sm:$0xff] }
 0x7c5   : > { %v6378_v53 = vpop.eup %6377  ;;  %v4951_v35 = vmul.f32 1.442695, %v4899_v51 }
 0x7c6   : > { %v6380_v22 = vpop.eup %6379  ;;  %v4994_v8 = vadd.f32 1.0, %v6378_v53 }
 0x7c7   : > { %5058 = vst.msk [vmem:[%s7827_s30 + $0x90] sm:$0xff] %vm5039_vm2, %v6380_v22  ;;  %6381 = vpow2.f32 %v4951_v35 }
 0x7c8   : > { %6383 = vrcp.f32 %v4994_v8  ;;  %v4812_v24 = vpop.xlane.xlu0 %4811 }
 0x7c9   : > { %v4868_v45 = vadd.f32 %v7808_v12, %v4812_v24 }
 0x7cb   : > { %v4900_v17 = vsub.f32 0.0, %v4868_v45 }
 0x7cd   : > { %v6382_v44 = vpop.eup %6381  ;;  %v4953_v58 = vmul.f32 1.442695, %v4900_v17 }
 0x7ce   : > { %v6384_v50 = vpop.eup %6383  ;;  %v4995_v18 = vadd.f32 1.0, %v6382_v44 }
 0x7cf   : > { %5059 = vst.msk [vmem:[%s7827_s30 + $0x98] sm:$0xff] %vm5039_vm2, %v6384_v50  ;;  %6385 = vpow2.f32 %v4953_v58 }
 0x7d0   : > { %6387 = vrcp.f32 %v4995_v18  ;;  %v4815_v59 = vpop.xlane.xlu1 %4814 }
 0x7d1   : > { %v4869_v39 = vadd.f32 %v7808_v12, %v4815_v59 }
 0x7d3   : > { %v4901_v42 = vsub.f32 0.0, %v4869_v39 }
 0x7d5   : > { %v6386_v23 = vpop.eup %6385  ;;  %v4955_v34 = vmul.f32 1.442695, %v4901_v42 }
 0x7d6   : > { %v6388_v0 = vpop.eup %6387  ;;  %v4996_v19 = vadd.f32 1.0, %v6386_v23 }
 0x7d7   : > { %5060 = vst.msk [vmem:[%s7827_s30 + $0xa0] sm:$0xff] %vm5039_vm2, %v6388_v0  ;;  %6389 = vpow2.f32 %v4955_v34 }
 0x7d8   : > { %6391 = vrcp.f32 %v4996_v19  ;;  %v4818_v16 = vpop.xlane.xlu2 %4817 }
 0x7d9   : > { %v4870_v38 = vadd.f32 %v7808_v12, %v4818_v16 }
 0x7db   : > { %v4902_v4 = vsub.f32 0.0, %v4870_v38 }
 0x7dd   : > { %v6390_v55 = vpop.eup %6389  ;;  %v4957_v26 = vmul.f32 1.442695, %v4902_v4 }
 0x7de   : > { %v6392_v3 = vpop.eup %6391  ;;  %v4997_v6 = vadd.f32 1.0, %v6390_v55 }
 0x7df   : > { %5061 = vst.msk [vmem:[%s7827_s30 + $0xa8] sm:$0xff] %vm5039_vm2, %v6392_v3  ;;  %6393 = vpow2.f32 %v4957_v26 }
 0x7e0   : > { %6395 = vrcp.f32 %v4997_v6  ;;  %v4821_v63 = vpop.xlane.xlu0 %4820 }
 0x7e1   : > { %v4871_v62 = vadd.f32 %v7808_v12, %v4821_v63 }
 0x7e3   : > { %v4903_v49 = vsub.f32 0.0, %v4871_v62 }
 0x7e5   : > { %v6394_v32 = vpop.eup %6393  ;;  %v4959_v40 = vmul.f32 1.442695, %v4903_v49 }
 0x7e6   : > { %v6396_v61 = vpop.eup %6395  ;;  %v4998_v9 = vadd.f32 1.0, %v6394_v32 }
 0x7e7   : > { %5062 = vst.msk [vmem:[%s7827_s30 + $0xb0] sm:$0xff] %vm5039_vm2, %v6396_v61  ;;  %6397 = vpow2.f32 %v4959_v40 }
 0x7e8   : > { %6399 = vrcp.f32 %v4998_v9  ;;  %v4824_v56 = vpop.xlane.xlu1 %4823 }
 0x7e9   : > { %v4872_v20 = vadd.f32 %v7808_v12, %v4824_v56 }
 0x7eb   : > { %v4904_v10 = vsub.f32 0.0, %v4872_v20 }
 0x7ed   : > { %v6398_v37 = vpop.eup %6397  ;;  %v4961_v11 = vmul.f32 1.442695, %v4904_v10 }
 0x7ee   : > { %v6400_v1 = vpop.eup %6399  ;;  %v4999_v27 = vadd.f32 1.0, %v6398_v37 }
 0x7ef   : > { %5063 = vst.msk [vmem:[%s7827_s30 + $0xb8] sm:$0xff] %vm5039_vm2, %v6400_v1  ;;  %6401 = vpow2.f32 %v4961_v11 }
 0x7f0   : > { %6403 = vrcp.f32 %v4999_v27  ;;  %v4827_v29 = vpop.xlane.xlu2 %4826 }
 0x7f1   : > { %v4873_v48 = vadd.f32 %v7808_v12, %v4827_v29 }
 0x7f3   : > { %v4905_v14 = vsub.f32 0.0, %v4873_v48 }
 0x7f5   : > { %v6402_v54 = vpop.eup %6401  ;;  %v4963_v30 = vmul.f32 1.442695, %v4905_v14 }
 0x7f6   : > { %v6404_v15 = vpop.eup %6403  ;;  %v5000_v47 = vadd.f32 1.0, %v6402_v54 }
 0x7f7   : > { %5064 = vst.msk [vmem:[%s7827_s30 + $0xc0] sm:$0xff] %vm5039_vm2, %v6404_v15  ;;  %6405 = vpow2.f32 %v4963_v30 }
 0x7f8   : > { %6407 = vrcp.f32 %v5000_v47  ;;  %v4830_v2 = vpop.xlane.xlu0 %4829 }
 0x7f9   : > { %v4874_v25 = vadd.f32 %v7808_v12, %v4830_v2 }
 0x7fb   : > { %v4906_v43 = vsub.f32 0.0, %v4874_v25 }
 0x7fd   : > { %v6406_v28 = vpop.eup %6405  ;;  %v4965_v57 = vmul.f32 1.442695, %v4906_v43 }
 0x7fe   : > { %v6408_v41 = vpop.eup %6407  ;;  %v5001_v36 = vadd.f32 1.0, %v6406_v28 }
 0x7ff   : > { %5065 = vst.msk [vmem:[%s7827_s30 + $0xc8] sm:$0xff] %vm5039_vm2, %v6408_v41  ;;  %6409 = vpow2.f32 %v4965_v57 }
 0x800   : > { %6411 = vrcp.f32 %v5001_v36  ;;  %v4833_v60 = vpop.xlane.xlu1 %4832 }
 0x801   : > { %v4875_v13 = vadd.f32 %v7808_v12, %v4833_v60 }
 0x803   : > { %v4907_v33 = vsub.f32 0.0, %v4875_v13 }
 0x805   : > { %v6410_v46 = vpop.eup %6409  ;;  %v4967_v7 = vmul.f32 1.442695, %v4907_v33 }
 0x806   : > { %v6412_v52 = vpop.eup %6411  ;;  %v5002_v31 = vadd.f32 1.0, %v6410_v46 }
 0x807   : > { %5066 = vst.msk [vmem:[%s7827_s30 + $0xd0] sm:$0xff] %vm5039_vm2, %v6412_v52  ;;  %6413 = vpow2.f32 %v4967_v7 }
 0x808   : > { %6415 = vrcp.f32 %v5002_v31  ;;  %v4836_v5 = vpop.xlane.xlu2 %4835 }
 0x809   : > { %v4876_v51 = vadd.f32 %v6432_v21, %v4836_v5 }
 0x80b   : > { %v4908_v53 = vsub.f32 0.0, %v4876_v51 }
 0x80d   : > { %v6414_v35 = vpop.eup %6413  ;;  %v4969_v22 = vmul.f32 1.442695, %v4908_v53 }
 0x80e   : > { %v6416_v8 = vpop.eup %6415  ;;  %v5003_v24 = vadd.f32 1.0, %v6414_v35 }
 0x80f   : > { %5067 = vst.msk [vmem:[%s7827_s30 + $0xd8] sm:$0xff] %vm5039_vm2, %v6416_v8  ;;  %6417 = vpow2.f32 %v4969_v22 }
 0x810   : > { %6419 = vrcp.f32 %v5003_v24  ;;  %v4839_v12 = vpop.xlane.xlu0 %4838 }
 0x811   : > { %v4877_v45 = vadd.f32 %v6432_v21, %v4839_v12 }
 0x813   : > { %v4909_v17 = vsub.f32 0.0, %v4877_v45 }
 0x815   : > { %v6418_v44 = vpop.eup %6417  ;;  %v4971_v58 = vmul.f32 1.442695, %v4909_v17 }
 0x816   : > { %v6420_v50 = vpop.eup %6419  ;;  %v5004_v18 = vadd.f32 1.0, %v6418_v44 }
 0x817   : > { %5068 = vst.msk [vmem:[%s7827_s30 + $0xe0] sm:$0xff] %vm5039_vm2, %v6420_v50  ;;  %6421 = vpow2.f32 %v4971_v58 }
 0x818   : > { %6423 = vrcp.f32 %v5004_v18  ;;  %v4842_v59 = vpop.xlane.xlu1 %4841 }
 0x819   : > { %v4878_v39 = vadd.f32 %v6432_v21, %v4842_v59 }
 0x81b   : > { %v4910_v42 = vsub.f32 0.0, %v4878_v39 }
 0x81d   : > { %v6422_v23 = vpop.eup %6421  ;;  %v4973_v34 = vmul.f32 1.442695, %v4910_v42 }
 0x81e   : > { %v6424_v0 = vpop.eup %6423  ;;  %v5005_v19 = vadd.f32 1.0, %v6422_v23 }
 0x81f   : > { %5069 = vst.msk [vmem:[%s7827_s30 + $0xe8] sm:$0xff] %vm5039_vm2, %v6424_v0  ;;  %6425 = vpow2.f32 %v4973_v34 }
 0x820   : > { %6427 = vrcp.f32 %v5005_v19 }
 0x825   : > { %v6426_v16 = vpop.eup %6425 }
 0x826   : > { %v6428_v38 = vpop.eup %6427  ;;  %v5006_v4 = vadd.f32 1.0, %v6426_v16 }
 0x827   : > { %5070 = vst.msk [vmem:[%s7827_s30 + $0xf0] sm:$0xff] %vm5039_vm2, %v6428_v38 }
 0x828   : > { %6429 = vrcp.f32 %v5006_v4 }
 0x82e   : > { %v6430_v55 = vpop.eup %6429 }
 0x82f   : > { %5071 = vst.msk [vmem:[%s7827_s30 + $0xf8] sm:$0xff] %vm5039_vm2, %v6430_v55 }
 0x830 PF: > { %s23_s11 = sadd.s32 1, %s6507_s11  }
 0x831   : > { %p20_p7 = scmp.ge.s32.totalorder %s23_s11, 4  }
 0x833   :  { %22 = sbr.rel (!%p20_p7) target bundleno = 5 (0x5), region = 95 }
 0x838   :  { %5094 = vsyncpa [#allocation4], 1 }
 0x839   :  { %5096 = vsyncpa [#allocation4 + $0x1], 1 }
 0x83a   :  { %5097 = vsyncpa [#allocation6], 1 }

</bundles_post_ra>
